<compile_context>
chip_gen: v7x
topology: tpu7x:2x2x1
jax: 0.10.0
libtpu: 0.0.40
codegen_flags: <defaults>
</compile_context>

<pallas_src>
import functools

import jax
import jax.numpy as jnp
import numpy as np
from jax import lax
from jax.experimental import pallas as pl
from jax.experimental.pallas import tpu as pltpu

HIGHEST = jax.lax.Precision.HIGHEST

N_BATCH = 2
IMG = 20                 # 20x20 single-channel board
FRAME = IMG * IMG        # lanes per image in the flattened frame
STATE_DIM = 5            # stateValues has STATE_DIM - 1 = 4 features
ACTION_DIM = 2
MAX_ACTION = 2.0
BN_EPS = 1e-5

# Tap offsets in the flattened (row-major, W=20) frame.
_TAPS_3x3_D1 = tuple(di * IMG + dj for di in range(3) for dj in range(3))          # dilation 1
_TAPS_3x3_D2 = tuple(2 * di * IMG + 2 * dj for di in range(3) for dj in range(3))  # dilation 2
_TAPS_POOL = (0, 1, IMG, IMG + 1)                                                  # 2x2 max pool
_GAP_OFFS = (0, 2, 2 * IMG, 2 * IMG + 2)                                           # 2x2 GAP cells

_NT = (((1,), (1,)), ((), ()))   # dot_general dims for A @ B^T (contract last with last)

# Sublane (row) offsets of each weight block inside the packed (96, 144) conv buffer.
_W1_R, _W2_R, _W3_R, _W4_R, _W5_R, _W6_R = 0, 8, 24, 32, 48, 64
# Sublane offsets of each folded-BN bias inside the packed (48, 1) bias buffer.
_B2_R, _B3_R, _B5_R = 0, 16, 32
# Sublane offsets of the FC biases inside the packed (24, 400) buffer.
_FB1_R, _FB2_R, _FB3_R = 0, 8, 16


# --------------------------- fused Pallas kernel ---------------------------

def _actor_kernel(x0_ref, sv_ref, w_ref, b_ref, sel_ref,
                  fw1_ref, fw2_ref, fw3_ref, fb_ref, o_ref, *, max_action):
    f32 = jnp.float32

    def relu(v):
        return jnp.maximum(v, 0.0)

    def conv(w, src, taps, out_len, bias=None):
        # ONE matmul per conv: stack the 9 lane-shifted slices along the sublane /
        # contraction axis (all pieces are 8- or 16-row aligned, so no relayout).
        rhs = jnp.concatenate([src[:, off:off + out_len] for off in taps], axis=0)
        y = jnp.dot(w, rhs, preferred_element_type=f32)
        return y if bias is None else y + bias

    x0 = x0_ref[...]                       # (1, N*400)
    m0 = x0.shape[1]

    # convblock1: Conv(1->8, 3x3) -> ReLU.  Cin=1 so it's 9 VPU broadcast FMAs (no MXU).
    l1 = m0 - _TAPS_3x3_D1[-1]
    w1 = w_ref[_W1_R:_W1_R + 8, 0:9]       # (8, 9) per-tap columns
    a1 = w1[:, 0:1] * x0[:, 0:l1]
    for t in range(1, 9):
        off = _TAPS_3x3_D1[t]
        a1 = a1 + w1[:, t:t + 1] * x0[:, off:off + l1]
    a1 = relu(a1)                          # (8, 758)   [BN1 folded into conv2]

    # convblock2: Conv(8->12, 3x3) with folded BN1 scale/shift.
    l2 = l1 - _TAPS_3x3_D1[-1]
    a2 = relu(conv(w_ref[_W2_R:_W2_R + 12, 0:72], a1, _TAPS_3x3_D1, l2,
                   b_ref[_B2_R:_B2_R + 12, :]))                      # (12, 716)

    # convblock3: Conv(12->8, 1x1) with folded BN2 scale/shift.
    a3 = relu(jnp.dot(w_ref[_W3_R:_W3_R + 8, 0:12], a2, preferred_element_type=f32)
              + b_ref[_B3_R:_B3_R + 8, :])                           # (8, 716)

    # pool1: MaxPool2d(2,2); outputs stay at even frame positions (dilation-2 convs next).
    lp = l2 - _TAPS_POOL[-1]
    a3p = jnp.maximum(jnp.maximum(a3[:, 0:lp], a3[:, 1:1 + lp]),
                      jnp.maximum(a3[:, IMG:IMG + lp], a3[:, IMG + 1:IMG + 1 + lp]))

    # convblock4: Conv(8->12, 3x3, frame-dilation 2); Cout padded to 16 (zero rows).
    l4 = lp - _TAPS_3x3_D2[-1]
    a4 = relu(conv(w_ref[_W4_R:_W4_R + 16, 0:72], a3p, _TAPS_3x3_D2, l4))   # (16, 611)

    # convblock5: Conv(12->16, 3x3, frame-dilation 2) with folded BN4; Cin padded to 16.
    l5 = l4 - _TAPS_3x3_D2[-1]
    a5 = relu(conv(w_ref[_W5_R:_W5_R + 16, 0:144], a4, _TAPS_3x3_D2, l5,
                   b_ref[_B5_R:_B5_R + 16, :]))                      # (16, 527)

    # convblock6: Conv(16->32, 3x3, frame-dilation 2) with folded BN5 scale
    # (its folded shift is constant over the GAP window -> folded into fc1's bias).
    l6 = l5 - _TAPS_3x3_D2[-1]
    y6 = conv(w_ref[_W6_R:_W6_R + 32, 0:144], a5, _TAPS_3x3_D2, l6)  # (32, 443)

    # GAP: selector NT-matmul gathers + averages the 2x2 valid conv6 outputs per image
    # and lands the result directly in (N, 32) row form (layout flip for free).
    feat = lax.dot_general(sel_ref[...], y6, _NT, preferred_element_type=f32)   # (N, 32)

    # MLP head on z = [feat, stateValues].
    z = jnp.concatenate([feat, sv_ref[...]], axis=1)                 # (N, 36)
    h = relu(jnp.dot(z, fw1_ref[...], preferred_element_type=f32)
             + fb_ref[_FB1_R:_FB1_R + 1, 0:400])
    h = relu(jnp.dot(h, fw2_ref[...], preferred_element_type=f32)
             + fb_ref[_FB2_R:_FB2_R + 1, 0:300])
    out = (jnp.dot(h, fw3_ref[...], preferred_element_type=f32)
           + fb_ref[_FB3_R:_FB3_R + 1, 0:ACTION_DIM])
    o_ref[...] = max_action * jnp.tanh(out)


# --------------------------- one-time host-side parameter packing ---------------------------

def _pack_taps(w_hwio, cin_pad, cout_pad):
    """(kh,kw,cin,cout) HWIO -> (cout_pad, kh*kw*cin_pad); row index = tap*cin_pad + cin."""
    kh, kw, cin, cout = w_hwio.shape
    wp = np.zeros((cout_pad, kh * kw, cin_pad), np.float32)
    wp[:cout, :, :cin] = np.transpose(w_hwio, (3, 0, 1, 2)).reshape(cout, kh * kw, cin)
    return wp.reshape(cout_pad, kh * kw * cin_pad)


def prepare_params(params, n_batch):
    """One-time packing (run OUTSIDE the jitted hot path): fold eval-mode BN into the
    following conv, stack conv taps along the contraction dim, and coalesce all the
    small tensors into a few VMEM-friendly buffers (9 kernel inputs total)."""
    p = {k: np.asarray(v, np.float32) for k, v in params.items()}

    def scale_in(w, s):               # fold BN scale over the conv's INPUT channels
        return w * s.reshape(1, 1, -1, 1)

    def shift_bias(w, t):             # folded BN shift -> per-OUTPUT-channel bias
        return np.einsum("hwio,i->o", w, t.reshape(-1))

    w2 = scale_in(p["cw2"], p["s1"]); b2 = shift_bias(p["cw2"], p["t1"])
    w3 = scale_in(p["cw3"], p["s2"]); b3 = shift_bias(p["cw3"], p["t2"])
    w5 = scale_in(p["cw5"], p["s4"]); b5 = shift_bias(p["cw5"], p["t4"])
    w6 = scale_in(p["cw6"], p["s5"]); b6 = shift_bias(p["cw6"], p["t5"])

    wpack = np.zeros((96, 144), np.float32)
    wpack[_W1_R:_W1_R + 8, 0:9] = np.transpose(p["cw1"], (3, 0, 1, 2)).reshape(8, 9)
    wpack[_W2_R:_W2_R + 12, 0:72] = _pack_taps(w2, 8, 12)
    wpack[_W3_R:_W3_R + 8, 0:12] = np.transpose(w3[0, 0], (1, 0))
    wpack[_W4_R:_W4_R + 16, 0:72] = _pack_taps(p["cw4"], 8, 16)     # Cout 12 -> pad 16
    wpack[_W5_R:_W5_R + 16, 0:144] = _pack_taps(w5, 16, 16)         # Cin  12 -> pad 16
    wpack[_W6_R:_W6_R + 32, 0:144] = _pack_taps(w6, 16, 32)

    bpack = np.zeros((48, 1), np.float32)
    bpack[_B2_R:_B2_R + 12, 0] = b2
    bpack[_B3_R:_B3_R + 8, 0] = b3
    bpack[_B5_R:_B5_R + 16, 0] = b5

    # conv6's folded BN5 shift (per channel, constant over GAP) goes into fc1's bias.
    fb1_eff = p["fb1"].reshape(-1) + b6 @ p["fw1"][:32, :]
    fbias = np.zeros((24, 400), np.float32)
    fbias[_FB1_R, :400] = fb1_eff
    fbias[_FB2_R, :300] = p["fb2"].reshape(-1)
    fbias[_FB3_R, :ACTION_DIM] = p["fb3"].reshape(-1)

    # GAP selector: 0.25 at the 4 valid conv6 output lanes of each image.  The frame
    # geometry (exactly a 2x2 block of valid conv6 outputs) only holds for a 20x20 board.
    assert (IMG - 4) // 2 - 6 == 2, "GAP selector assumes a 20x20 input board"
    l6 = n_batch * FRAME - 2 * _TAPS_3x3_D1[-1] - _TAPS_POOL[-1] - 3 * _TAPS_3x3_D2[-1]
    sel = np.zeros((n_batch, l6), np.float32)
    for n in range(n_batch):
        for q in _GAP_OFFS:
            sel[n, n * FRAME + q] = 0.25

    return {
        "wpack": jnp.asarray(wpack), "bpack": jnp.asarray(bpack), "sel": jnp.asarray(sel),
        "fw1": jnp.asarray(p["fw1"]), "fw2": jnp.asarray(p["fw2"]),
        "fw3": jnp.asarray(p["fw3"]), "fbias": jnp.asarray(fbias),
    }


# --------------------------- wrapper (single pallas_call, no per-call packing) ---------------------------

def pallas_actor_forward(packed, state_img_nchw, state_values, max_action):
    n = state_img_nchw.shape[0]
    if state_img_nchw.shape[1:] != (1, IMG, IMG):
        raise ValueError(f"expected (N, 1, {IMG}, {IMG}) board, got {state_img_nchw.shape}")
    l6 = n * FRAME - 2 * _TAPS_3x3_D1[-1] - _TAPS_POOL[-1] - 3 * _TAPS_3x3_D2[-1]
    if packed["sel"].shape != (n, l6):
        raise ValueError("packed params were prepared for a different batch size")

    # flattened-frame layout: lane index = n*400 + i*20 + j, channels on sublanes
    x0 = state_img_nchw.astype(jnp.float32).reshape(1, n * FRAME)
    sv = state_values.astype(jnp.float32)

    inputs = (x0, sv, packed["wpack"], packed["bpack"], packed["sel"],
              packed["fw1"], packed["fw2"], packed["fw3"], packed["fbias"])
    kernel = functools.partial(_actor_kernel, max_action=float(max_action))
    vmem = pl.BlockSpec(memory_space=pltpu.MemorySpace.VMEM)
    return pl.pallas_call(
        kernel,
        out_shape=jax.ShapeDtypeStruct((n, ACTION_DIM), jnp.float32),
        in_specs=[vmem] * len(inputs),
        out_specs=vmem,
    )(*inputs)


# --------------------------- reference (pure JAX, HIGHEST precision) ---------------------------

def _conv2d(x, w):
    return lax.conv_general_dilated(x, w, window_strides=(1, 1), padding="VALID",
                                    dimension_numbers=("NHWC", "HWIO", "NHWC"),
                                    precision=HIGHEST)


def reference_forward(params, state_img_nchw, state_values, max_action):
    x = jnp.transpose(state_img_nchw, (0, 2, 3, 1)).astype(jnp.float32)
    x = _conv2d(x, params["cw1"]); x = jnp.maximum(x, 0.0)
    x = x * params["s1"][0] + params["t1"][0]
    x = _conv2d(x, params["cw2"]); x = jnp.maximum(x, 0.0)
    x = x * params["s2"][0] + params["t2"][0]
    x = _conv2d(x, params["cw3"]); x = jnp.maximum(x, 0.0)
    N, H, W, C = x.shape
    x = x.reshape(N, H // 2, 2, W // 2, 2, C).max(axis=(2, 4))
    x = _conv2d(x, params["cw4"]); x = jnp.maximum(x, 0.0)
    x = x * params["s4"][0] + params["t4"][0]
    x = _conv2d(x, params["cw5"]); x = jnp.maximum(x, 0.0)
    x = x * params["s5"][0] + params["t5"][0]
    x = _conv2d(x, params["cw6"])
    feat = jnp.mean(x, axis=(1, 2))
    z = jnp.concatenate([feat, state_values.astype(jnp.float32)], axis=1)
    h = jnp.maximum(jnp.dot(z, params["fw1"], precision=HIGHEST) + params["fb1"], 0.0)
    h = jnp.maximum(jnp.dot(h, params["fw2"], precision=HIGHEST) + params["fb2"], 0.0)
    return max_action * jnp.tanh(jnp.dot(h, params["fw3"], precision=HIGHEST) + params["fb3"])


# --------------------------- deterministic parameter init ---------------------------

def init_params(key):
    ks = iter(jax.random.split(key, 32))

    def conv_w(kh, kw, cin, cout):
        return (jax.random.normal(next(ks), (kh, kw, cin, cout), jnp.float32)
                / jnp.sqrt(float(kh * kw * cin)))

    def bn_fold(c):
        gamma = 1.0 + 0.1 * jax.random.normal(next(ks), (c,), jnp.float32)
        beta = 0.1 * jax.random.normal(next(ks), (c,), jnp.float32)
        mean = 0.1 * jax.random.normal(next(ks), (c,), jnp.float32)
        var = 1.0 + 0.1 * jnp.abs(jax.random.normal(next(ks), (c,), jnp.float32))
        scale = gamma / jnp.sqrt(var + BN_EPS)
        shift = beta - mean * scale
        return scale.reshape(1, c), shift.reshape(1, c)

    def linear(fin, fout):
        w = jax.random.normal(next(ks), (fin, fout), jnp.float32) / jnp.sqrt(float(fin))
        b = 0.01 * jax.random.normal(next(ks), (1, fout), jnp.float32)
        return w, b

    p = {}
    p["cw1"] = conv_w(3, 3, 1, 8);   p["s1"], p["t1"] = bn_fold(8)
    p["cw2"] = conv_w(3, 3, 8, 12);  p["s2"], p["t2"] = bn_fold(12)
    p["cw3"] = conv_w(1, 1, 12, 8)
    p["cw4"] = conv_w(3, 3, 8, 12);  p["s4"], p["t4"] = bn_fold(12)
    p["cw5"] = conv_w(3, 3, 12, 16); p["s5"], p["t5"] = bn_fold(16)
    p["cw6"] = conv_w(3, 3, 16, 32)
    fin = (STATE_DIM - 1) + 32
    p["fw1"], p["fb1"] = linear(fin, 400)
    p["fw2"], p["fb2"] = linear(400, 300)
    p["fw3"], p["fb3"] = linear(300, ACTION_DIM)
    return p


# TODO(synk): Dropout2d (training-mode stochastic channel masking) is not implemented;
#             forward here is eval-mode, matching PyTorch model.eval() semantics.

if __name__ == "__main__":
    key = jax.random.PRNGKey(0)
    pkey, ikey, vkey = jax.random.split(key, 3)
    params = init_params(pkey)

    # PyTorch-convention inputs: stateImg NCHW, stateValues (N, state_dim - 1).
    state_img = jax.random.normal(ikey, (N_BATCH, 1, IMG, IMG), jnp.float32)
    state_values = jax.random.normal(vkey, (N_BATCH, STATE_DIM - 1), jnp.float32)

    # One-time host-side packing (hoisted out of the per-call hot path).
    packed = prepare_params(params, N_BATCH)

    fwd = jax.jit(functools.partial(pallas_actor_forward, max_action=MAX_ACTION))
    out = jax.block_until_ready(fwd(packed, state_img, state_values))

    ref = reference_forward(params, state_img, state_values, MAX_ACTION)
    # Tolerance sized for default (bf16-pass) MXU precision in the kernel vs the
    # HIGHEST-precision pure-JAX reference; outputs lie in (-2, 2).
    np.testing.assert_allclose(np.asarray(out), np.asarray(ref), rtol=2e-2, atol=2e-2)
    assert out.shape == (N_BATCH, ACTION_DIM)
    print("KERNEL_OK")
</pallas_src>

<mosaic_0001>
module attributes {stable_mosaic.version = 11 : i64} {
  func.func @_actor_kernel(%arg0: memref<1x800xf32, #tpu.memory_space<vmem>>, %arg1: memref<2x4xf32, #tpu.memory_space<vmem>>, %arg2: memref<96x144xf32, #tpu.memory_space<vmem>>, %arg3: memref<48x1xf32, #tpu.memory_space<vmem>>, %arg4: memref<2x443xf32, #tpu.memory_space<vmem>>, %arg5: memref<36x400xf32, #tpu.memory_space<vmem>>, %arg6: memref<400x300xf32, #tpu.memory_space<vmem>>, %arg7: memref<300x2xf32, #tpu.memory_space<vmem>>, %arg8: memref<24x400xf32, #tpu.memory_space<vmem>>, %arg9: memref<2x2xf32, #tpu.memory_space<vmem>>) attributes {dimension_semantics = [], scalar_prefetch = 0 : i64, scratch_operands = 0 : i64, tpu.core_type = #tpu.core_type<tc>} {
    %c0 = arith.constant 0 : index
    %c0_0 = arith.constant 0 : index
    %0 = vector.load %arg0[%c0, %c0_0] : memref<1x800xf32, #tpu.memory_space<vmem>>, vector<1x800xf32>
    %c0_1 = arith.constant 0 : index
    %c0_2 = arith.constant 0 : index
    %1 = vector.load %arg2[%c0_1, %c0_2] : memref<96x144xf32, #tpu.memory_space<vmem>>, vector<8x9xf32>
    %2 = vector.extract_strided_slice %1 {offsets = [0, 0], sizes = [8, 1], strides = [1, 1]} : vector<8x9xf32> to vector<8x1xf32>
    %3 = vector.extract_strided_slice %0 {offsets = [0, 0], sizes = [1, 758], strides = [1, 1]} : vector<1x800xf32> to vector<1x758xf32>
    %4 = vector.broadcast %2 : vector<8x1xf32> to vector<8x758xf32>
    %5 = vector.broadcast %3 : vector<1x758xf32> to vector<8x758xf32>
    %6 = arith.mulf %4, %5 : vector<8x758xf32>
    %7 = vector.extract_strided_slice %1 {offsets = [0, 1], sizes = [8, 1], strides = [1, 1]} : vector<8x9xf32> to vector<8x1xf32>
    %8 = vector.extract_strided_slice %0 {offsets = [0, 1], sizes = [1, 758], strides = [1, 1]} : vector<1x800xf32> to vector<1x758xf32>
    %9 = vector.broadcast %7 : vector<8x1xf32> to vector<8x758xf32>
    %10 = vector.broadcast %8 : vector<1x758xf32> to vector<8x758xf32>
    %11 = arith.mulf %9, %10 : vector<8x758xf32>
    %12 = arith.addf %6, %11 : vector<8x758xf32>
    %13 = vector.extract_strided_slice %1 {offsets = [0, 2], sizes = [8, 1], strides = [1, 1]} : vector<8x9xf32> to vector<8x1xf32>
    %14 = vector.extract_strided_slice %0 {offsets = [0, 2], sizes = [1, 758], strides = [1, 1]} : vector<1x800xf32> to vector<1x758xf32>
    %15 = vector.broadcast %13 : vector<8x1xf32> to vector<8x758xf32>
    %16 = vector.broadcast %14 : vector<1x758xf32> to vector<8x758xf32>
    %17 = arith.mulf %15, %16 : vector<8x758xf32>
    %18 = arith.addf %12, %17 : vector<8x758xf32>
    %19 = vector.extract_strided_slice %1 {offsets = [0, 3], sizes = [8, 1], strides = [1, 1]} : vector<8x9xf32> to vector<8x1xf32>
    %20 = vector.extract_strided_slice %0 {offsets = [0, 20], sizes = [1, 758], strides = [1, 1]} : vector<1x800xf32> to vector<1x758xf32>
    %21 = vector.broadcast %19 : vector<8x1xf32> to vector<8x758xf32>
    %22 = vector.broadcast %20 : vector<1x758xf32> to vector<8x758xf32>
    %23 = arith.mulf %21, %22 : vector<8x758xf32>
    %24 = arith.addf %18, %23 : vector<8x758xf32>
    %25 = vector.extract_strided_slice %1 {offsets = [0, 4], sizes = [8, 1], strides = [1, 1]} : vector<8x9xf32> to vector<8x1xf32>
    %26 = vector.extract_strided_slice %0 {offsets = [0, 21], sizes = [1, 758], strides = [1, 1]} : vector<1x800xf32> to vector<1x758xf32>
    %27 = vector.broadcast %25 : vector<8x1xf32> to vector<8x758xf32>
    %28 = vector.broadcast %26 : vector<1x758xf32> to vector<8x758xf32>
    %29 = arith.mulf %27, %28 : vector<8x758xf32>
    %30 = arith.addf %24, %29 : vector<8x758xf32>
    %31 = vector.extract_strided_slice %1 {offsets = [0, 5], sizes = [8, 1], strides = [1, 1]} : vector<8x9xf32> to vector<8x1xf32>
    %32 = vector.extract_strided_slice %0 {offsets = [0, 22], sizes = [1, 758], strides = [1, 1]} : vector<1x800xf32> to vector<1x758xf32>
    %33 = vector.broadcast %31 : vector<8x1xf32> to vector<8x758xf32>
    %34 = vector.broadcast %32 : vector<1x758xf32> to vector<8x758xf32>
    %35 = arith.mulf %33, %34 : vector<8x758xf32>
    %36 = arith.addf %30, %35 : vector<8x758xf32>
    %37 = vector.extract_strided_slice %1 {offsets = [0, 6], sizes = [8, 1], strides = [1, 1]} : vector<8x9xf32> to vector<8x1xf32>
    %38 = vector.extract_strided_slice %0 {offsets = [0, 40], sizes = [1, 758], strides = [1, 1]} : vector<1x800xf32> to vector<1x758xf32>
    %39 = vector.broadcast %37 : vector<8x1xf32> to vector<8x758xf32>
    %40 = vector.broadcast %38 : vector<1x758xf32> to vector<8x758xf32>
    %41 = arith.mulf %39, %40 : vector<8x758xf32>
    %42 = arith.addf %36, %41 : vector<8x758xf32>
    %43 = vector.extract_strided_slice %1 {offsets = [0, 7], sizes = [8, 1], strides = [1, 1]} : vector<8x9xf32> to vector<8x1xf32>
    %44 = vector.extract_strided_slice %0 {offsets = [0, 41], sizes = [1, 758], strides = [1, 1]} : vector<1x800xf32> to vector<1x758xf32>
    %45 = vector.broadcast %43 : vector<8x1xf32> to vector<8x758xf32>
    %46 = vector.broadcast %44 : vector<1x758xf32> to vector<8x758xf32>
    %47 = arith.mulf %45, %46 : vector<8x758xf32>
    %48 = arith.addf %42, %47 : vector<8x758xf32>
    %49 = vector.extract_strided_slice %1 {offsets = [0, 8], sizes = [8, 1], strides = [1, 1]} : vector<8x9xf32> to vector<8x1xf32>
    %50 = vector.extract_strided_slice %0 {offsets = [0, 42], sizes = [1, 758], strides = [1, 1]} : vector<1x800xf32> to vector<1x758xf32>
    %51 = vector.broadcast %49 : vector<8x1xf32> to vector<8x758xf32>
    %52 = vector.broadcast %50 : vector<1x758xf32> to vector<8x758xf32>
    %53 = arith.mulf %51, %52 : vector<8x758xf32>
    %54 = arith.addf %48, %53 : vector<8x758xf32>
    %cst = arith.constant 0.000000e+00 : f32
    %55 = vector.broadcast %cst : f32 to vector<8x758xf32>
    %56 = arith.maximumf %54, %55 : vector<8x758xf32>
    %c8 = arith.constant 8 : index
    %c0_3 = arith.constant 0 : index
    %57 = vector.load %arg2[%c8, %c0_3] : memref<96x144xf32, #tpu.memory_space<vmem>>, vector<12x72xf32>
    %c0_4 = arith.constant 0 : index
    %c0_5 = arith.constant 0 : index
    %58 = vector.load %arg3[%c0_4, %c0_5] : memref<48x1xf32, #tpu.memory_space<vmem>>, vector<12x1xf32>
    %59 = vector.extract_strided_slice %56 {offsets = [0, 0], sizes = [8, 716], strides = [1, 1]} : vector<8x758xf32> to vector<8x716xf32>
    %60 = vector.extract_strided_slice %56 {offsets = [0, 1], sizes = [8, 716], strides = [1, 1]} : vector<8x758xf32> to vector<8x716xf32>
    %61 = vector.extract_strided_slice %56 {offsets = [0, 2], sizes = [8, 716], strides = [1, 1]} : vector<8x758xf32> to vector<8x716xf32>
    %62 = vector.extract_strided_slice %56 {offsets = [0, 20], sizes = [8, 716], strides = [1, 1]} : vector<8x758xf32> to vector<8x716xf32>
    %63 = vector.extract_strided_slice %56 {offsets = [0, 21], sizes = [8, 716], strides = [1, 1]} : vector<8x758xf32> to vector<8x716xf32>
    %64 = vector.extract_strided_slice %56 {offsets = [0, 22], sizes = [8, 716], strides = [1, 1]} : vector<8x758xf32> to vector<8x716xf32>
    %65 = vector.extract_strided_slice %56 {offsets = [0, 40], sizes = [8, 716], strides = [1, 1]} : vector<8x758xf32> to vector<8x716xf32>
    %66 = vector.extract_strided_slice %56 {offsets = [0, 41], sizes = [8, 716], strides = [1, 1]} : vector<8x758xf32> to vector<8x716xf32>
    %67 = vector.extract_strided_slice %56 {offsets = [0, 42], sizes = [8, 716], strides = [1, 1]} : vector<8x758xf32> to vector<8x716xf32>
    %68 = tpu.concatenate %59, %60, %61, %62, %63, %64, %65, %66, %67 in 0 : vector<8x716xf32>, vector<8x716xf32>, vector<8x716xf32>, vector<8x716xf32>, vector<8x716xf32>, vector<8x716xf32>, vector<8x716xf32>, vector<8x716xf32>, vector<8x716xf32> -> vector<72x716xf32>
    %cst_6 = arith.constant dense<0.000000e+00> : vector<12x716xf32>
    %69 = tpu.matmul %57, %68, %cst_6 {dimension_numbers = #tpu.dot_dimension_numbers<[1], [0], [0], [1], [0, 0, 1, 1], [], []>} : vector<12x72xf32>, vector<72x716xf32>, vector<12x716xf32> -> vector<12x716xf32>
    %70 = vector.broadcast %58 : vector<12x1xf32> to vector<12x716xf32>
    %71 = arith.addf %69, %70 : vector<12x716xf32>
    %cst_7 = arith.constant 0.000000e+00 : f32
    %72 = vector.broadcast %cst_7 : f32 to vector<12x716xf32>
    %73 = arith.maximumf %71, %72 : vector<12x716xf32>
    %c24 = arith.constant 24 : index
    %c0_8 = arith.constant 0 : index
    %74 = vector.load %arg2[%c24, %c0_8] : memref<96x144xf32, #tpu.memory_space<vmem>>, vector<8x12xf32>
    %cst_9 = arith.constant dense<0.000000e+00> : vector<8x716xf32>
    %75 = tpu.matmul %74, %73, %cst_9 {dimension_numbers = #tpu.dot_dimension_numbers<[1], [0], [0], [1], [0, 0, 1, 1], [], []>} : vector<8x12xf32>, vector<12x716xf32>, vector<8x716xf32> -> vector<8x716xf32>
    %c16 = arith.constant 16 : index
    %c0_10 = arith.constant 0 : index
    %76 = vector.load %arg3[%c16, %c0_10] : memref<48x1xf32, #tpu.memory_space<vmem>>, vector<8x1xf32>
    %77 = vector.broadcast %76 : vector<8x1xf32> to vector<8x716xf32>
    %78 = arith.addf %75, %77 : vector<8x716xf32>
    %cst_11 = arith.constant 0.000000e+00 : f32
    %79 = vector.broadcast %cst_11 : f32 to vector<8x716xf32>
    %80 = arith.maximumf %78, %79 : vector<8x716xf32>
    %81 = vector.extract_strided_slice %80 {offsets = [0, 0], sizes = [8, 695], strides = [1, 1]} : vector<8x716xf32> to vector<8x695xf32>
    %82 = vector.extract_strided_slice %80 {offsets = [0, 1], sizes = [8, 695], strides = [1, 1]} : vector<8x716xf32> to vector<8x695xf32>
    %83 = arith.maximumf %81, %82 : vector<8x695xf32>
    %84 = vector.extract_strided_slice %80 {offsets = [0, 20], sizes = [8, 695], strides = [1, 1]} : vector<8x716xf32> to vector<8x695xf32>
    %85 = vector.extract_strided_slice %80 {offsets = [0, 21], sizes = [8, 695], strides = [1, 1]} : vector<8x716xf32> to vector<8x695xf32>
    %86 = arith.maximumf %84, %85 : vector<8x695xf32>
    %87 = arith.maximumf %83, %86 : vector<8x695xf32>
    %c32 = arith.constant 32 : index
    %c0_12 = arith.constant 0 : index
    %88 = vector.load %arg2[%c32, %c0_12] : memref<96x144xf32, #tpu.memory_space<vmem>>, vector<16x72xf32>
    %89 = vector.extract_strided_slice %87 {offsets = [0, 0], sizes = [8, 611], strides = [1, 1]} : vector<8x695xf32> to vector<8x611xf32>
    %90 = vector.extract_strided_slice %87 {offsets = [0, 2], sizes = [8, 611], strides = [1, 1]} : vector<8x695xf32> to vector<8x611xf32>
    %91 = vector.extract_strided_slice %87 {offsets = [0, 4], sizes = [8, 611], strides = [1, 1]} : vector<8x695xf32> to vector<8x611xf32>
    %92 = vector.extract_strided_slice %87 {offsets = [0, 40], sizes = [8, 611], strides = [1, 1]} : vector<8x695xf32> to vector<8x611xf32>
    %93 = vector.extract_strided_slice %87 {offsets = [0, 42], sizes = [8, 611], strides = [1, 1]} : vector<8x695xf32> to vector<8x611xf32>
    %94 = vector.extract_strided_slice %87 {offsets = [0, 44], sizes = [8, 611], strides = [1, 1]} : vector<8x695xf32> to vector<8x611xf32>
    %95 = vector.extract_strided_slice %87 {offsets = [0, 80], sizes = [8, 611], strides = [1, 1]} : vector<8x695xf32> to vector<8x611xf32>
    %96 = vector.extract_strided_slice %87 {offsets = [0, 82], sizes = [8, 611], strides = [1, 1]} : vector<8x695xf32> to vector<8x611xf32>
    %97 = vector.extract_strided_slice %87 {offsets = [0, 84], sizes = [8, 611], strides = [1, 1]} : vector<8x695xf32> to vector<8x611xf32>
    %98 = tpu.concatenate %89, %90, %91, %92, %93, %94, %95, %96, %97 in 0 : vector<8x611xf32>, vector<8x611xf32>, vector<8x611xf32>, vector<8x611xf32>, vector<8x611xf32>, vector<8x611xf32>, vector<8x611xf32>, vector<8x611xf32>, vector<8x611xf32> -> vector<72x611xf32>
    %cst_13 = arith.constant dense<0.000000e+00> : vector<16x611xf32>
    %99 = tpu.matmul %88, %98, %cst_13 {dimension_numbers = #tpu.dot_dimension_numbers<[1], [0], [0], [1], [0, 0, 1, 1], [], []>} : vector<16x72xf32>, vector<72x611xf32>, vector<16x611xf32> -> vector<16x611xf32>
    %cst_14 = arith.constant 0.000000e+00 : f32
    %100 = vector.broadcast %cst_14 : f32 to vector<16x611xf32>
    %101 = arith.maximumf %99, %100 : vector<16x611xf32>
    %c48 = arith.constant 48 : index
    %c0_15 = arith.constant 0 : index
    %102 = vector.load %arg2[%c48, %c0_15] : memref<96x144xf32, #tpu.memory_space<vmem>>, vector<16x144xf32>
    %c32_16 = arith.constant 32 : index
    %c0_17 = arith.constant 0 : index
    %103 = vector.load %arg3[%c32_16, %c0_17] : memref<48x1xf32, #tpu.memory_space<vmem>>, vector<16x1xf32>
    %104 = vector.extract_strided_slice %101 {offsets = [0, 0], sizes = [16, 527], strides = [1, 1]} : vector<16x611xf32> to vector<16x527xf32>
    %105 = vector.extract_strided_slice %101 {offsets = [0, 2], sizes = [16, 527], strides = [1, 1]} : vector<16x611xf32> to vector<16x527xf32>
    %106 = vector.extract_strided_slice %101 {offsets = [0, 4], sizes = [16, 527], strides = [1, 1]} : vector<16x611xf32> to vector<16x527xf32>
    %107 = vector.extract_strided_slice %101 {offsets = [0, 40], sizes = [16, 527], strides = [1, 1]} : vector<16x611xf32> to vector<16x527xf32>
    %108 = vector.extract_strided_slice %101 {offsets = [0, 42], sizes = [16, 527], strides = [1, 1]} : vector<16x611xf32> to vector<16x527xf32>
    %109 = vector.extract_strided_slice %101 {offsets = [0, 44], sizes = [16, 527], strides = [1, 1]} : vector<16x611xf32> to vector<16x527xf32>
    %110 = vector.extract_strided_slice %101 {offsets = [0, 80], sizes = [16, 527], strides = [1, 1]} : vector<16x611xf32> to vector<16x527xf32>
    %111 = vector.extract_strided_slice %101 {offsets = [0, 82], sizes = [16, 527], strides = [1, 1]} : vector<16x611xf32> to vector<16x527xf32>
    %112 = vector.extract_strided_slice %101 {offsets = [0, 84], sizes = [16, 527], strides = [1, 1]} : vector<16x611xf32> to vector<16x527xf32>
    %113 = tpu.concatenate %104, %105, %106, %107, %108, %109, %110, %111, %112 in 0 : vector<16x527xf32>, vector<16x527xf32>, vector<16x527xf32>, vector<16x527xf32>, vector<16x527xf32>, vector<16x527xf32>, vector<16x527xf32>, vector<16x527xf32>, vector<16x527xf32> -> vector<144x527xf32>
    %cst_18 = arith.constant dense<0.000000e+00> : vector<16x527xf32>
    %114 = tpu.matmul %102, %113, %cst_18 {dimension_numbers = #tpu.dot_dimension_numbers<[1], [0], [0], [1], [0, 0, 1, 1], [], []>} : vector<16x144xf32>, vector<144x527xf32>, vector<16x527xf32> -> vector<16x527xf32>
    %115 = vector.broadcast %103 : vector<16x1xf32> to vector<16x527xf32>
    %116 = arith.addf %114, %115 : vector<16x527xf32>
    %cst_19 = arith.constant 0.000000e+00 : f32
    %117 = vector.broadcast %cst_19 : f32 to vector<16x527xf32>
    %118 = arith.maximumf %116, %117 : vector<16x527xf32>
    %c64 = arith.constant 64 : index
    %c0_20 = arith.constant 0 : index
    %119 = vector.load %arg2[%c64, %c0_20] : memref<96x144xf32, #tpu.memory_space<vmem>>, vector<32x144xf32>
    %120 = vector.extract_strided_slice %118 {offsets = [0, 0], sizes = [16, 443], strides = [1, 1]} : vector<16x527xf32> to vector<16x443xf32>
    %121 = vector.extract_strided_slice %118 {offsets = [0, 2], sizes = [16, 443], strides = [1, 1]} : vector<16x527xf32> to vector<16x443xf32>
    %122 = vector.extract_strided_slice %118 {offsets = [0, 4], sizes = [16, 443], strides = [1, 1]} : vector<16x527xf32> to vector<16x443xf32>
    %123 = vector.extract_strided_slice %118 {offsets = [0, 40], sizes = [16, 443], strides = [1, 1]} : vector<16x527xf32> to vector<16x443xf32>
    %124 = vector.extract_strided_slice %118 {offsets = [0, 42], sizes = [16, 443], strides = [1, 1]} : vector<16x527xf32> to vector<16x443xf32>
    %125 = vector.extract_strided_slice %118 {offsets = [0, 44], sizes = [16, 443], strides = [1, 1]} : vector<16x527xf32> to vector<16x443xf32>
    %126 = vector.extract_strided_slice %118 {offsets = [0, 80], sizes = [16, 443], strides = [1, 1]} : vector<16x527xf32> to vector<16x443xf32>
    %127 = vector.extract_strided_slice %118 {offsets = [0, 82], sizes = [16, 443], strides = [1, 1]} : vector<16x527xf32> to vector<16x443xf32>
    %128 = vector.extract_strided_slice %118 {offsets = [0, 84], sizes = [16, 443], strides = [1, 1]} : vector<16x527xf32> to vector<16x443xf32>
    %129 = tpu.concatenate %120, %121, %122, %123, %124, %125, %126, %127, %128 in 0 : vector<16x443xf32>, vector<16x443xf32>, vector<16x443xf32>, vector<16x443xf32>, vector<16x443xf32>, vector<16x443xf32>, vector<16x443xf32>, vector<16x443xf32>, vector<16x443xf32> -> vector<144x443xf32>
    %cst_21 = arith.constant dense<0.000000e+00> : vector<32x443xf32>
    %130 = tpu.matmul %119, %129, %cst_21 {dimension_numbers = #tpu.dot_dimension_numbers<[1], [0], [0], [1], [0, 0, 1, 1], [], []>} : vector<32x144xf32>, vector<144x443xf32>, vector<32x443xf32> -> vector<32x443xf32>
    %c0_22 = arith.constant 0 : index
    %c0_23 = arith.constant 0 : index
    %131 = vector.load %arg4[%c0_22, %c0_23] : memref<2x443xf32, #tpu.memory_space<vmem>>, vector<2x443xf32>
    %cst_24 = arith.constant dense<0.000000e+00> : vector<2x32xf32>
    %132 = tpu.matmul %131, %130, %cst_24 {dimension_numbers = #tpu.dot_dimension_numbers<[1], [1], [0], [0], [0, 0, 1, 0], [], []>} : vector<2x443xf32>, vector<32x443xf32>, vector<2x32xf32> -> vector<2x32xf32>
    %c0_25 = arith.constant 0 : index
    %c0_26 = arith.constant 0 : index
    %133 = vector.load %arg1[%c0_25, %c0_26] : memref<2x4xf32, #tpu.memory_space<vmem>>, vector<2x4xf32>
    %134 = tpu.concatenate %132, %133 in 1 : vector<2x32xf32>, vector<2x4xf32> -> vector<2x36xf32>
    %c0_27 = arith.constant 0 : index
    %c0_28 = arith.constant 0 : index
    %135 = vector.load %arg5[%c0_27, %c0_28] : memref<36x400xf32, #tpu.memory_space<vmem>>, vector<36x400xf32>
    %cst_29 = arith.constant dense<0.000000e+00> : vector<2x400xf32>
    %136 = tpu.matmul %134, %135, %cst_29 {dimension_numbers = #tpu.dot_dimension_numbers<[1], [0], [0], [1], [0, 0, 1, 1], [], []>} : vector<2x36xf32>, vector<36x400xf32>, vector<2x400xf32> -> vector<2x400xf32>
    %c0_30 = arith.constant 0 : index
    %c0_31 = arith.constant 0 : index
    %137 = vector.load %arg8[%c0_30, %c0_31] : memref<24x400xf32, #tpu.memory_space<vmem>>, vector<1x400xf32>
    %138 = vector.broadcast %137 : vector<1x400xf32> to vector<2x400xf32>
    %139 = arith.addf %136, %138 : vector<2x400xf32>
    %cst_32 = arith.constant 0.000000e+00 : f32
    %140 = vector.broadcast %cst_32 : f32 to vector<2x400xf32>
    %141 = arith.maximumf %139, %140 : vector<2x400xf32>
    %c0_33 = arith.constant 0 : index
    %c0_34 = arith.constant 0 : index
    %142 = vector.load %arg6[%c0_33, %c0_34] : memref<400x300xf32, #tpu.memory_space<vmem>>, vector<400x300xf32>
    %cst_35 = arith.constant dense<0.000000e+00> : vector<2x300xf32>
    %143 = tpu.matmul %141, %142, %cst_35 {dimension_numbers = #tpu.dot_dimension_numbers<[1], [0], [0], [1], [0, 0, 1, 1], [], []>} : vector<2x400xf32>, vector<400x300xf32>, vector<2x300xf32> -> vector<2x300xf32>
    %c8_36 = arith.constant 8 : index
    %c0_37 = arith.constant 0 : index
    %144 = vector.load %arg8[%c8_36, %c0_37] : memref<24x400xf32, #tpu.memory_space<vmem>>, vector<1x300xf32>
    %145 = vector.broadcast %144 : vector<1x300xf32> to vector<2x300xf32>
    %146 = arith.addf %143, %145 : vector<2x300xf32>
    %cst_38 = arith.constant 0.000000e+00 : f32
    %147 = vector.broadcast %cst_38 : f32 to vector<2x300xf32>
    %148 = arith.maximumf %146, %147 : vector<2x300xf32>
    %c0_39 = arith.constant 0 : index
    %c0_40 = arith.constant 0 : index
    %149 = vector.load %arg7[%c0_39, %c0_40] : memref<300x2xf32, #tpu.memory_space<vmem>>, vector<300x2xf32>
    %cst_41 = arith.constant dense<0.000000e+00> : vector<2x2xf32>
    %150 = tpu.matmul %148, %149, %cst_41 {dimension_numbers = #tpu.dot_dimension_numbers<[1], [0], [0], [1], [0, 0, 1, 1], [], []>} : vector<2x300xf32>, vector<300x2xf32>, vector<2x2xf32> -> vector<2x2xf32>
    %c16_42 = arith.constant 16 : index
    %c0_43 = arith.constant 0 : index
    %151 = vector.load %arg8[%c16_42, %c0_43] : memref<24x400xf32, #tpu.memory_space<vmem>>, vector<1x2xf32>
    %152 = vector.broadcast %151 : vector<1x2xf32> to vector<2x2xf32>
    %153 = arith.addf %150, %152 : vector<2x2xf32>
    %154 = math.tanh %153 : vector<2x2xf32>
    %cst_44 = arith.constant 2.000000e+00 : f32
    %155 = vector.broadcast %cst_44 : f32 to vector<2x2xf32>
    %156 = arith.mulf %155, %154 : vector<2x2xf32>
    %c0_45 = arith.constant 0 : index
    %c0_46 = arith.constant 0 : index
    %157 = vector.load %arg9[%c0_45, %c0_46] : memref<2x2xf32, #tpu.memory_space<vmem>>, vector<2x2xf32>
    tpu.vector_store %arg9[%c0_45, %c0_46], %156 {strides = array<i32>} : memref<2x2xf32, #tpu.memory_space<vmem>>, vector<2x2xf32>,
    return
  }
}

</mosaic_0001>

<bundles_post_ra>
// kernel: pallas_actor_forward.1
= control target key start
LH: loop header
LB: loop body
LE: loop exit
PB: predicated region body
PF: predicated region fallthrough
CT: control target
= control target key end

     0   :  { %14 = vsyncpa [#allocation3], 0  ;;  %s7039_s0 = inlined_call_operand.vmem [shape: f32[1,800], index: 0, kind: input, shape index: {}]   ;;  %s7040_s1 = inlined_call_operand.vmem [shape: f32[2,4], index: 1, kind: input, shape index: {}]   ;;  %s7041_s2 = inlined_call_operand.vmem [shape: f32[96,144], index: 2, kind: input, shape index: {}]   ;;  %s7042_s3 = inlined_call_operand.vmem [shape: f32[48,1], index: 3, kind: input, shape index: {}]   ;;  %s7043_s4 = inlined_call_operand.vmem [shape: f32[2,443], index: 4, kind: input, shape index: {}]   ;;  %s7044_s5 = inlined_call_operand.vmem [shape: f32[36,400], index: 5, kind: input, shape index: {}]   ;;  %s7045_s6 = inlined_call_operand.hbm [shape: f32[400,300], index: 6, kind: input, shape index: {}]   ;;  %s7046_s7 = inlined_call_operand.vmem [shape: f32[300,2], index: 7, kind: input, shape index: {}]   ;;  %s7047_s8 = inlined_call_operand.vmem [shape: f32[24,400], index: 8, kind: input, shape index: {}]   ;;  %s7048_s9 = inlined_call_operand.hbm [shape: f32[2,2], index: 9, kind: output, shape index: {}]  }
   0x1   :  { %15 = vsyncpa [#allocation4], 0  ;;  %s5140_s30 = smov [#allocation2]   ;;  %s5092_s13 = scalar_lea.hbm %s7045_s6, 19200 }
   0x2   :  { %s33_s10 = sshll.u32 %s5140_s30, 4  ;;  %p5093_p0 = scmp.ne.s32.totalorder %s7045_s6, %s5092_s13  ;;  %s34_s10 = int_to_ptr.vmem [resolvable:$true] %s33_s10 }
   0x3   :  { %p5096_p1 = scmp.lt.u32.totalorder %s5092_s13, %s7045_s6 }
   0x5   :  { %p5098_p2 = pnand %p5096_p1, %p5093_p0 }
   0x7   :  { %5101 = shalt.err (!%p5098_p2)
}
   0x8   :  { %s5102_s18 = scalar_lea.vmem %s34_s10, 19200  ;;  %p5107_p4 = scmp.lt.s32.totalorder %s34_s10, %s34_s10 }
   0x9   :  { %p5103_p3 = scmp.ne.s32.totalorder %s34_s10, %s5102_s18  ;;  %p5108_p5 = scmp.lt.s32.totalorder %s5102_s18, %s5102_s18 }
   0xb   :  { %p5109_p6 = por %p5108_p5, %p5107_p4 }
   0xd   :  { %p5110_p7 = pnand %p5109_p6, %p5103_p3 }
   0xf   :  { %5113 = shalt.err (!%p5110_p7)
}
  0x10   :  { %s5141_s19 = smov 384   ;;  %s5142_s20 = smov 24  }
  0x11   :  { %39 = dma.hbm_to_vmem [thread:$0]  %s7045_s6, 19200, %s34_s10, [#allocation3], %s5141_s19, %s5141_s19, %s5142_s20  }
  0x12   :  { %5136 = dma.done.wait [#allocation3], 19200  }
  0x13   :  { %5137 = vsyncadd [#allocation3], 4294948096  ;;  %v5143_v0 = vmov 1   ;;  %v5144_v1 = vmov 3   ;;  %v48_v2 = vld [vmem:[%s7041_s2] sm:$0xff]  ;;  %v5145_v3 = vmov 2   ;;  %v55_v10 = vlaneseq }
  0x14   :  { %4524 = vset.pattern.permute.xlu0 %v5143_v0  ;;  %4526 = vset.pattern.permute.xlu1 %v5144_v1  ;;  %v5146_v4 = vmov 4   ;;  %v5147_v5 = vmov 5   ;;  %v5148_v6 = vmov 6   ;;  %v5149_v7 = vmov 7   ;;  %v5246_v14 = vld [vmem:[%s7039_s0] sm:$0x7f] }
  0x15   :  { %92 = vperm.xlu0 %4524, %v48_v2   ;;  %184 = vperm.xlu1 %4526, %v48_v2   ;;  %v5150_v8 = vmov 0   ;;  %v5151_v9 = vmov 8   ;;  %v5237_v11 = vshrl.u32 %v55_v10, 7  ;;  %s5152_s0 = smov 127   ;;  %s5153_s26 = smov 126   ;;  %vm119_vm0 = vcmask 1039360  }
  0x16   :  { %s5154_s27 = smov 108   ;;  %s5155_s28 = smov 107   ;;  %vm165_vm1 = vcmask 1031168   ;;  %vm220_vm2 = vcmask 883712   ;;  %vm271_vm3 = vcmask 875520   ;;  %vm322_vm4 = vcmask 867328  }
  0x17   :  { %v7049_v12 = vsub.s32 3, %v5237_v11  ;;  %v5241_v13 = vsub.s32 1, %v5237_v11  ;;  %v5258_v17 = vsub.s32 2, %v5237_v11  ;;  %v5271_v22 = vsub.s32 0, %v5237_v11  ;;  %s5156_s29 = smov 106   ;;  %s5157_s30 = smov 88  }
  0x18   :  { %v73_v52 = vsub.s32 4, %v5237_v11  ;;  %s5158_s10 = smov 87   ;;  %v77_v58 = vsub.s32 5, %v5237_v11  ;;  %s5159_s11 = smov 86   ;;  %vm373_vm5 = vcmask 719872   ;;  %vm424_vm6 = vcmask 711680  }
  0x19   :  { %4525 = vset.pattern.permute.xlu0 %v5145_v3  ;;  %4527 = vset.pattern.permute.xlu1 %v5146_v4  ;;  %v5251_v15 = vrot.slane %v5246_v14, %v7049_v12  ;;  %v5255_v16 = vrot.slane %v5246_v14, %v5241_v13  ;;  %v5268_v21 = vrot.slane %v5246_v14, %v5258_v17  ;;  %vm475_vm7 = vcmask 703488   ;;  %s5162_s24 = smov 46   ;;  %s5163_s6 = smov 48  }
  0x1a   :  { %138 = vperm.xlu0 %4525, %v48_v2   ;;  %240 = vperm.xlu1 %4527, %v48_v2   ;;  %v5281_v25 = vrot.slane %v5246_v14, %v5271_v22  ;;  %v5363_v55 = vrot.slane %v5246_v14, %v73_v52  ;;  %v5378_v62 = vrot.slane %v5246_v14, %v77_v58  ;;  %vm704_vm8 = vcmask 588800   ;;  %s5164_s25 = smov 44  }
  0x1b   :  { %vm965_vm9 = vcmask 1043456   ;;  %vm5161_vm10 = vmmov 1   ;;  %vm961_vm12 = vcmask 97280   ;;  %vm1309_vm13 = vcmask 1014784  }
  0x1c   :  { %vm5850_vm11 = vmpackc.low %vm965_vm9, %vm5161_vm10  ;;  %vm1376_vm14 = vcmask 687104   ;;  %vm1422_vm15 = vcmask 375808  }
  0x1e   :  { %4528 = vset.pattern.permute.xlu1 %v5147_v5  ;;  %4529 = vset.pattern.permute.xlu0 %v5148_v6 }
  0x1f   :  { %291 = vperm.xlu1 %4528, %v48_v2   ;;  %342 = vperm.xlu0 %4529, %v48_v2  }
  0x23   :  { %4530 = vset.pattern.permute.xlu1 %v5149_v7  ;;  %4532 = vset.pattern.permute.xlu0 %v5150_v8  ;;  %v189_v7 = vsub.s32 6, %v5237_v11 }
  0x24   :  { %393 = vperm.xlu1 %4530, %v48_v2   ;;  %51 = vperm.xlu0 %4532, %v48_v2  }
  0x25   :  { %v190_v10 = vrot.slane %v5246_v14, %v189_v7 }
  0x28   :  { %4531 = vset.pattern.permute.xlu1 %v5151_v9 }
  0x29   :  { %444 = vperm.xlu1 %4531, %v48_v2  }
  0x2d   :  { %4628 = vset.pattern.permute.xlu1 %v5150_v8 }
  0x94   :  { %v5260_v18 = vpop.permute.xlu0 %92  ;;  %v5291_v29 = vpop.permute.xlu1 %184 }
  0x95   :  { %v98_v19 = vmul.f32 %v5260_v18, %v5251_v15  ;;  %v96_v20 = vmul.f32 %v5260_v18, %v5255_v16  ;;  %v97_v24 = vmul.f32 %v5260_v18, %v5268_v21  ;;  %v95_v28 = vmul.f32 %v5260_v18, %v5281_v25 }
  0x96   :  { %v193_v31 = vmul.f32 %v5291_v29, %v5255_v16  ;;  %v195_v32 = vmul.f32 %v5291_v29, %v5251_v15  ;;  %v194_v35 = vmul.f32 %v5291_v29, %v5268_v21  ;;  %v192_v38 = vmul.f32 %v5291_v29, %v5281_v25 }
  0x97   :  { %113 = vrot.lane.b32.xlu0 %v98_v19, %s5152_s0  ;;  %109 = vrot.lane.b32.xlu1 %v96_v20, %s5152_s0  ;;  %v99_v59 = vmul.f32 %v5260_v18, %v5363_v55  ;;  %v100_v0 = vmul.f32 %v5260_v18, %v5378_v62  ;;  %v196_v4 = vmul.f32 %v5291_v29, %v5363_v55 }
  0x98   :  { %v197_v8 = vmul.f32 %v5291_v29, %v5378_v62  ;;  %v198_v19 = vmul.f32 %v190_v10, %v5291_v29 }
  0x99   :  { %v5275_v23 = vpop.permute.xlu0 %138  ;;  %v5305_v34 = vpop.permute.xlu1 %240 }
  0x9a   :  { %v142_v26 = vmul.f32 %v5275_v23, %v5255_v16  ;;  %v144_v27 = vmul.f32 %v5275_v23, %v5251_v15  ;;  %v143_v30 = vmul.f32 %v5275_v23, %v5268_v21  ;;  %v141_v33 = vmul.f32 %v5275_v23, %v5281_v25 }
  0x9b   :  { %111 = vrot.lane.b32.xlu1 %v97_v24, %s5152_s0  ;;  %v244_v36 = vmul.f32 %v5305_v34, %v5255_v16  ;;  %v246_v37 = vmul.f32 %v5305_v34, %v5251_v15  ;;  %v245_v40 = vmul.f32 %v5305_v34, %v5268_v21  ;;  %v243_v43 = vmul.f32 %v5305_v34, %v5281_v25 }
  0x9c   :  { %155 = vrot.lane.b32.xlu0 %v142_v26, %s5153_s26  ;;  %v145_v2 = vmul.f32 %v5275_v23, %v5363_v55  ;;  %v146_v5 = vmul.f32 %v5275_v23, %v5378_v62  ;;  %v247_v6 = vmul.f32 %v5305_v34, %v5363_v55  ;;  %v248_v18 = vmul.f32 %v5305_v34, %v5378_v62 }
  0x9d   :  { %v249_v26 = vmul.f32 %v5305_v34, %v190_v10 }
  0x9e   :  { %v5319_v39 = vpop.permute.xlu1 %291  ;;  %v5333_v44 = vpop.permute.xlu0 %342 }
  0x9f   :  { %107 = vrot.lane.b32.xlu1 %v95_v28, %s5152_s0  ;;  %v295_v41 = vmul.f32 %v5319_v39, %v5255_v16  ;;  %v297_v42 = vmul.f32 %v5319_v39, %v5251_v15  ;;  %v296_v45 = vmul.f32 %v5319_v39, %v5268_v21  ;;  %v346_v46 = vmul.f32 %v5333_v44, %v5255_v16 }
  0xa0   :  { %159 = vrot.lane.b32.xlu0 %v144_v27, %s5153_s26  ;;  %v348_v47 = vmul.f32 %v5333_v44, %v5251_v15  ;;  %v294_v48 = vmul.f32 %v5319_v39, %v5281_v25  ;;  %v347_v50 = vmul.f32 %v5333_v44, %v5268_v21  ;;  %v345_v54 = vmul.f32 %v5333_v44, %v5281_v25 }
  0xa1   :  { %v298_v9 = vmul.f32 %v5319_v39, %v5363_v55  ;;  %v299_v20 = vmul.f32 %v5319_v39, %v5378_v62  ;;  %v350_v23 = vmul.f32 %v5333_v44, %v5378_v62  ;;  %v349_v14 = vmul.f32 %v5333_v44, %v5363_v55 }
  0xa2   :  { %v300_v27 = vmul.f32 %v5319_v39, %v190_v10 }
  0xa3   :  { %157 = vrot.lane.b32.xlu1 %v143_v30, %s5153_s26  ;;  %v5347_v49 = vpop.permute.xlu1 %393  ;;  %v5444_v34 = vpop.permute.xlu0 %51 }
  0xa4   :  { %208 = vrot.lane.b32.xlu0 %v193_v31, %s5154_s27  ;;  %v397_v51 = vmul.f32 %v5347_v49, %v5255_v16  ;;  %v399_v53 = vmul.f32 %v5347_v49, %v5251_v15  ;;  %v398_v56 = vmul.f32 %v5347_v49, %v5268_v21  ;;  %v396_v61 = vmul.f32 %v5347_v49, %v5281_v25 }
  0xa5   :  { %v400_v24 = vmul.f32 %v5347_v49, %v5363_v55  ;;  %v401_v28 = vmul.f32 %v5347_v49, %v5378_v62  ;;  %v402_v31 = vmul.f32 %v5347_v49, %v190_v10 }
  0xa7   :  { %153 = vrot.lane.b32.xlu1 %v141_v33, %s5153_s26 }
  0xa8   :  { %212 = vrot.lane.b32.xlu0 %v195_v32, %s5154_s27  ;;  %v445_v57 = vpop.permute.xlu1 %444  ;;  %v351_v32 = vmul.f32 %v5333_v44, %v190_v10 }
  0xa9   :  { %v448_v60 = vmul.f32 %v445_v57, %v5255_v16  ;;  %v450_v63 = vmul.f32 %v445_v57, %v5251_v15  ;;  %v449_v1 = vmul.f32 %v445_v57, %v5268_v21  ;;  %v447_v3 = vmul.f32 %v445_v57, %v5281_v25 }
  0xaa   :  { %v452_v29 = vmul.f32 %v445_v57, %v5378_v62  ;;  %v451_v30 = vmul.f32 %v445_v57, %v5363_v55  ;;  %v453_v33 = vmul.f32 %v445_v57, %v190_v10 }
  0xab   :  { %210 = vrot.lane.b32.xlu1 %v194_v35, %s5154_s27 }
  0xac   :  { %259 = vrot.lane.b32.xlu0 %v244_v36, %s5155_s28 }
  0xaf   :  { %206 = vrot.lane.b32.xlu1 %v192_v38, %s5154_s27 }
  0xb0   :  { %263 = vrot.lane.b32.xlu0 %v246_v37, %s5155_s28 }
  0xb3   :  { %261 = vrot.lane.b32.xlu1 %v245_v40, %s5155_s28 }
  0xb4   :  { %310 = vrot.lane.b32.xlu0 %v295_v41, %s5156_s29 }
  0xb7   :  { %257 = vrot.lane.b32.xlu1 %v243_v43, %s5155_s28 }
  0xb8   :  { %314 = vrot.lane.b32.xlu0 %v297_v42, %s5156_s29 }
  0xbb   :  { %312 = vrot.lane.b32.xlu1 %v296_v45, %s5156_s29 }
  0xbc   :  { %361 = vrot.lane.b32.xlu0 %v346_v46, %s5157_s30 }
  0xbf   :  { %308 = vrot.lane.b32.xlu1 %v294_v48, %s5156_s29 }
  0xc0   :  { %365 = vrot.lane.b32.xlu0 %v348_v47, %s5157_s30 }
  0xc3   :  { %363 = vrot.lane.b32.xlu1 %v347_v50, %s5157_s30 }
  0xc4   :  { %412 = vrot.lane.b32.xlu0 %v397_v51, %s5158_s10 }
  0xc7   :  { %359 = vrot.lane.b32.xlu1 %v345_v54, %s5157_s30 }
  0xc8   :  { %416 = vrot.lane.b32.xlu0 %v399_v53, %s5158_s10 }
  0xcb   :  { %414 = vrot.lane.b32.xlu1 %v398_v56, %s5158_s10 }
  0xcc   :  { %115 = vrot.lane.b32.xlu0 %v99_v59, %s5152_s0 }
  0xcf   :  { %410 = vrot.lane.b32.xlu1 %v396_v61, %s5158_s10  ;;  %v86_v61 = vmul.f32 %v5255_v16, %v5444_v34 }
  0xd0   :  { %463 = vrot.lane.b32.xlu0 %v448_v60, %s5159_s11  ;;  %v87_v60 = vmul.f32 %v5268_v21, %v5444_v34 }
  0xd3   :  { %117 = vrot.lane.b32.xlu1 %v100_v0, %s5152_s0 }
  0xd4   :  { %467 = vrot.lane.b32.xlu0 %v450_v63, %s5159_s11 }
  0xd7   :  { %465 = vrot.lane.b32.xlu1 %v449_v1, %s5159_s11 }
  0xd8   :  { %161 = vrot.lane.b32.xlu0 %v145_v2, %s5153_s26 }
  0xdb   :  { %461 = vrot.lane.b32.xlu1 %v447_v3, %s5159_s11 }
  0xdc   :  { %214 = vrot.lane.b32.xlu0 %v196_v4, %s5154_s27 }
  0xdf   :  { %163 = vrot.lane.b32.xlu1 %v146_v5, %s5153_s26 }
  0xe0   :  { %265 = vrot.lane.b32.xlu0 %v247_v6, %s5155_s28 }
  0xe3   :  { %216 = vrot.lane.b32.xlu1 %v197_v8, %s5154_s27 }
  0xe4   :  { %316 = vrot.lane.b32.xlu0 %v298_v9, %s5156_s29 }
  0xe7   :  { %267 = vrot.lane.b32.xlu1 %v248_v18, %s5155_s28 }
  0xe8   :  { %218 = vrot.lane.b32.xlu0 %v198_v19, %s5154_s27 }
  0xeb   :  { %318 = vrot.lane.b32.xlu1 %v299_v20, %s5156_s29 }
  0xec   :  { %369 = vrot.lane.b32.xlu0 %v350_v23, %s5157_s30 }
  0xef   :  { %367 = vrot.lane.b32.xlu1 %v349_v14, %s5157_s30 }
  0xf0   :  { %418 = vrot.lane.b32.xlu0 %v400_v24, %s5158_s10 }
  0xf3   :  { %269 = vrot.lane.b32.xlu1 %v249_v26, %s5155_s28 }
  0xf4   :  { %320 = vrot.lane.b32.xlu0 %v300_v27, %s5156_s29 }
  0xf7   :  { %420 = vrot.lane.b32.xlu1 %v401_v28, %s5158_s10 }
  0xf8   :  { %471 = vrot.lane.b32.xlu0 %v452_v29, %s5159_s11 }
  0xfb   :  { %469 = vrot.lane.b32.xlu1 %v451_v30, %s5159_s11 }
  0xfc   :  { %422 = vrot.lane.b32.xlu0 %v402_v31, %s5158_s10 }
  0xff   :  { %371 = vrot.lane.b32.xlu1 %v351_v32, %s5157_s30 }
 0x103   :  { %473 = vrot.lane.b32.xlu1 %v453_v33, %s5159_s11 }
 0x109   :  { %v5446_v35 = vpop.permute.xlu0 %113  ;;  %v5448_v36 = vpop.permute.xlu1 %109 }
 0x10d   :  { %v112_v37 = vpop.permute.xlu1 %111 }
 0x10e   :  { %v5450_v38 = vpop.permute.xlu0 %155  ;;  %v121_v0 = vsel %vm119_vm0, %v5448_v36, %v112_v37  ;;  %v122_v1 = vsel %vm119_vm0, %v112_v37, %v5446_v35 }
 0x10f   :  { %v132_v4 = vadd.f32 %v121_v0, %v86_v61  ;;  %v133_v16 = vadd.f32 %v122_v1, %v87_v60 }
 0x111   :  { %v5452_v39 = vpop.permute.xlu1 %107 }
 0x112   :  { %v5454_v40 = vpop.permute.xlu0 %159 }
 0x115   :  { %v158_v41 = vpop.permute.xlu1 %157 }
 0x116   :  { %v5456_v42 = vpop.permute.xlu0 %208  ;;  %v167_v3 = vsel %vm165_vm1, %v5450_v38, %v158_v41  ;;  %v168_v21 = vsel %vm165_vm1, %v158_v41, %v5454_v40 }
 0x117   :  { %v178_v9 = vadd.f32 %v167_v3, %v132_v4  ;;  %v179_v10 = vadd.f32 %v168_v21, %v133_v16 }
 0x119   :  { %v5458_v43 = vpop.permute.xlu1 %153 }
 0x11a   :  { %v5460_v44 = vpop.permute.xlu0 %212 }
 0x11d   :  { %v211_v45 = vpop.permute.xlu1 %210 }
 0x11e   :  { %v5462_v46 = vpop.permute.xlu0 %259  ;;  %v222_v6 = vsel %vm220_vm2, %v5456_v42, %v211_v45  ;;  %v223_v7 = vsel %vm220_vm2, %v211_v45, %v5460_v44 }
 0x11f   :  { %v234_v20 = vadd.f32 %v222_v6, %v178_v9  ;;  %v235_v23 = vadd.f32 %v223_v7, %v179_v10 }
 0x121   :  { %v5464_v47 = vpop.permute.xlu1 %206 }
 0x122   :  { %v5466_v48 = vpop.permute.xlu0 %263 }
 0x125   :  { %v262_v49 = vpop.permute.xlu1 %261 }
 0x126   :  { %v5468_v50 = vpop.permute.xlu0 %310  ;;  %v273_v18 = vsel %vm271_vm3, %v5462_v46, %v262_v49  ;;  %v274_v19 = vsel %vm271_vm3, %v262_v49, %v5466_v48 }
 0x127   :  { %v285_v28 = vadd.f32 %v273_v18, %v234_v20  ;;  %v286_v29 = vadd.f32 %v274_v19, %v235_v23 }
 0x129   :  { %v5470_v51 = vpop.permute.xlu1 %257 }
 0x12a   :  { %v5472_v52 = vpop.permute.xlu0 %314 }
 0x12d   :  { %v313_v53 = vpop.permute.xlu1 %312 }
 0x12e   :  { %v5474_v54 = vpop.permute.xlu0 %361  ;;  %v324_v24 = vsel %vm322_vm4, %v5468_v50, %v313_v53  ;;  %v325_v26 = vsel %vm322_vm4, %v313_v53, %v5472_v52 }
 0x12f   :  { %v336_v32 = vadd.f32 %v324_v24, %v285_v28  ;;  %v337_v33 = vadd.f32 %v325_v26, %v286_v29  ;;  %v85_v28 = vmul.f32 %v5281_v25, %v5444_v34  ;;  %v120_v29 = vsel %vm119_vm0, %v5452_v39, %v5448_v36 }
 0x131   :  { %v5476_v56 = vpop.permute.xlu1 %308 }
 0x132   :  { %v5478_v57 = vpop.permute.xlu0 %365 }
 0x135   :  { %v364_v58 = vpop.permute.xlu1 %363 }
 0x136   :  { %v5480_v59 = vpop.permute.xlu0 %412  ;;  %v375_v30 = vsel %vm373_vm5, %v5474_v54, %v364_v58  ;;  %v376_v31 = vsel %vm373_vm5, %v364_v58, %v5478_v57 }
 0x137   :  { %v387_v53 = vadd.f32 %v375_v30, %v336_v32  ;;  %v388_v60 = vadd.f32 %v376_v31, %v337_v33  ;;  %v88_v31 = vmul.f32 %v5251_v15, %v5444_v34  ;;  %v166_v33 = vsel %vm165_vm1, %v5458_v43, %v5450_v38 }
 0x138   :  { %v272_v38 = vsel %vm271_vm3, %v5470_v51, %v5462_v46 }
 0x139   :  { %v5486_v63 = vpop.permute.xlu1 %359 }
 0x13a   :  { %v5492_v2 = vpop.permute.xlu0 %416  ;;  %v374_v46 = vsel %vm373_vm5, %v5486_v63, %v5474_v54 }
 0x13d   :  { %v415_v5 = vpop.permute.xlu1 %414 }
 0x13e   :  { %v5502_v8 = vpop.permute.xlu0 %115  ;;  %v426_v41 = vsel %vm424_vm6, %v5480_v59, %v415_v5  ;;  %v427_v45 = vsel %vm424_vm6, %v415_v5, %v5492_v2 }
 0x13f   :  { %v438_v61 = vadd.f32 %v426_v41, %v387_v53  ;;  %v439_v0 = vadd.f32 %v427_v45, %v388_v60  ;;  %v123_v30 = vsel %vm119_vm0, %v5446_v35, %v5502_v8  ;;  %v131_v41 = vadd.f32 %v120_v29, %v85_v28 }
 0x140   :  { %v134_v45 = vadd.f32 %v123_v30, %v88_v31  ;;  %v221_v35 = vsel %vm220_vm2, %v5464_v47, %v5456_v42  ;;  %v323_v42 = vsel %vm322_vm4, %v5476_v56, %v5468_v50 }
 0x141   :  { %v5508_v14 = vpop.permute.xlu1 %410  ;;  %v177_v39 = vadd.f32 %v166_v33, %v131_v41 }
 0x142   :  { %v5514_v27 = vpop.permute.xlu0 %463  ;;  %v425_v50 = vsel %vm424_vm6, %v5508_v14, %v5480_v59 }
 0x143   :  { %v233_v43 = vadd.f32 %v221_v35, %v177_v39 }
 0x145   :  { %v5520_v37 = vpop.permute.xlu1 %117  ;;  %v284_v47 = vadd.f32 %v272_v38, %v233_v43 }
 0x146   :  { %v5526_v49 = vpop.permute.xlu0 %467 }
 0x147   :  { %v335_v51 = vadd.f32 %v323_v42, %v284_v47 }
 0x149   :  { %v466_v1 = vpop.permute.xlu1 %465  ;;  %v386_v56 = vadd.f32 %v374_v46, %v335_v51 }
 0x14a   :  { %v477_v58 = vsel %vm475_vm7, %v5514_v27, %v466_v1  ;;  %v478_v3 = vsel %vm475_vm7, %v466_v1, %v5526_v49  ;;  %v5532_v21 = vpop.permute.xlu0 %161 }
 0x14b   :  { %v489_v4 = vadd.f32 %v477_v58, %v438_v61  ;;  %v490_v16 = vadd.f32 %v478_v3, %v439_v0  ;;  %v169_v25 = vsel %vm165_vm1, %v5454_v40, %v5532_v21  ;;  %v437_v63 = vadd.f32 %v425_v50, %v386_v56  ;;  %v503_v50 = vld [vmem:[%s7042_s3 + $0x8] sm:$0xf]  ;;  %v502_v56 = vld [vmem:[%s7042_s3] sm:$0xff] }
 0x14c   :  { %v180_v53 = vadd.f32 %v169_v25, %v134_v45  ;;  %v124_v25 = vsel %vm119_vm0, %v5502_v8, %v5520_v37 }
 0x14d   :  { %v5534_v6 = vmax.f32 %v489_v4, 0.0  ;;  %v5536_v5 = vmax.f32 %v490_v16, 0.0  ;;  %v462_v7 = vpop.permute.xlu1 %461 }
 0x14e   :  { %v5538_v9 = vpop.permute.xlu0 %214  ;;  %v476_v28 = vsel %vm475_vm7, %v462_v7, %v5514_v27 }
 0x14f   :  { %v5542_v10 = vpack.i.bf16 %v5536_v5, %v5534_v6  ;;  %v224_v15 = vsel %vm220_vm2, %v5460_v44, %v5538_v9  ;;  %v488_v59 = vadd.f32 %v476_v28, %v437_v63 }
 0x150   :  { %v236_v61 = vadd.f32 %v224_v15, %v180_v53 }
 0x151   :  { %4534 = vrot.lane.b32.xlu0 %v5542_v10, %s5152_s0  ;;  %v5546_v18 = vpop.permute.xlu1 %163  ;;  %v5623_v41 = vmax.f32 %v488_v59, 0.0 }
 0x152   :  { %v5548_v19 = vpop.permute.xlu0 %265 }
 0x153   :  { %v275_v40 = vsel %vm271_vm3, %v5466_v48, %v5548_v19 }
 0x154   :  { %v287_v0 = vadd.f32 %v275_v40, %v236_v61 }
 0x155   :  { %4544 = vrot.lane.b32.xlu0 %v5542_v10, %s5153_s26  ;;  %v5552_v20 = vpop.permute.xlu1 %216 }
 0x156   :  { %v5554_v23 = vpop.permute.xlu0 %316 }
 0x157   :  { %v326_v44 = vsel %vm322_vm4, %v5472_v52, %v5554_v23  ;;  %v90_v52 = vmul.f32 %v5378_v62, %v5444_v34 }
 0x158   :  { %v338_v3 = vadd.f32 %v326_v44, %v287_v0 }
 0x159   :  { %v5556_v24 = vpop.permute.xlu1 %267 }
 0x15a   :  { %v219_v26 = vpop.permute.xlu0 %218 }
 0x15b   :  { %v226_v30 = vsel %vm220_vm2, %v5552_v20, %v219_v26  ;;  %v89_v26 = vmul.f32 %v5363_v55, %v5444_v34  ;;  %v225_v55 = vsel %vm220_vm2, %v5538_v9, %v5552_v20 }
 0x15d   :  { %v5568_v32 = vpop.permute.xlu1 %318  ;;  %v135_v38 = vadd.f32 %v124_v25, %v89_v26 }
 0x15e   :  { %v5576_v36 = vpop.permute.xlu0 %369  ;;  %v327_v9 = vsel %vm322_vm4, %v5554_v23, %v5568_v32 }
 0x161   :  { %v368_v60 = vpop.permute.xlu1 %367 }
 0x162   :  { %v419_v1 = vpop.permute.xlu0 %418  ;;  %v377_v48 = vsel %vm373_vm5, %v5478_v57, %v368_v60  ;;  %v136_v57 = vadd.f32 %v5520_v37, %v90_v52  ;;  %v378_v44 = vsel %vm373_vm5, %v368_v60, %v5576_v36  ;;  %v955_v52 = vld [vmem:[%s7042_s3 + $0x10] sm:$0xff] }
 0x163   :  { %v389_v4 = vadd.f32 %v377_v48, %v338_v3  ;;  %v428_v54 = vsel %vm424_vm6, %v5492_v2, %v419_v1  ;;  %v7050_v3 = vmov 0.0  }
 0x164   :  { %v182_v14 = vadd.f32 %v5546_v18, %v136_v57  ;;  %775 = vmatprep.mubr.f32.mxu0 %v7050_v3  ;;  %852 = vmatprep.mubr.f32.mxu1 %v7050_v3 }
 0x165   :  { %v270_v58 = vpop.permute.xlu1 %269  ;;  %v440_v31 = vadd.f32 %v428_v54, %v389_v4 }
 0x166   :  { %v321_v29 = vpop.permute.xlu0 %320  ;;  %v277_v33 = vsel %vm271_vm3, %v5556_v24, %v270_v58  ;;  %v238_v7 = vadd.f32 %v226_v30, %v182_v14 }
 0x167   :  { %v328_v53 = vsel %vm322_vm4, %v5568_v32, %v321_v29 }
 0x168   :  { %v289_v45 = vadd.f32 %v277_v33, %v238_v7 }
 0x169   :  { %v421_v16 = vpop.permute.xlu1 %420 }
 0x16a   :  { %v472_v35 = vpop.permute.xlu0 %471  ;;  %v340_v40 = vadd.f32 %v328_v53, %v289_v45  ;;  %v429_v0 = vsel %vm424_vm6, %v419_v1, %v421_v16 }
 0x16d   :  { %v470_v62 = vpop.permute.xlu1 %469 }
 0x16e   :  { %v479_v27 = vsel %vm475_vm7, %v5526_v49, %v470_v62  ;;  %v170_v49 = vsel %vm165_vm1, %v5532_v21, %v5546_v18  ;;  %v276_v21 = vsel %vm271_vm3, %v5548_v19, %v5556_v24  ;;  %v423_v43 = vpop.permute.xlu0 %422  ;;  %v480_v32 = vsel %vm475_vm7, %v470_v62, %v472_v35 }
 0x16f   :  { %v491_v2 = vadd.f32 %v479_v27, %v440_v31  ;;  %v181_v37 = vadd.f32 %v170_v49, %v135_v38  ;;  %v430_v19 = vsel %vm424_vm6, %v421_v16, %v423_v43 }
 0x171   :  { %v5625_v15 = vmax.f32 %v491_v2, 0.0  ;;  %v372_v39 = vpop.permute.xlu1 %371  ;;  %v237_v18 = vadd.f32 %v225_v55, %v181_v37 }
 0x172   :  { %v379_v34 = vsel %vm373_vm5, %v5576_v36, %v372_v39 }
 0x173   :  { %v4553_v8 = vpack.i.bf16 %v5625_v15, %v5623_v41  ;;  %v391_v61 = vadd.f32 %v379_v34, %v340_v40  ;;  %v288_v20 = vadd.f32 %v276_v21, %v237_v18 }
 0x175   :  { %4554 = vrot.lane.b32.xlu0 %v4553_v8, %s5153_s26  ;;  %4539 = vrot.lane.b32.xlu1 %v4553_v8, %s5152_s0  ;;  %v474_v42 = vpop.permute.xlu1 %473  ;;  %v339_v24 = vadd.f32 %v327_v9, %v288_v20  ;;  %v442_v47 = vadd.f32 %v430_v19, %v391_v61 }
 0x176   :  { %v481_v58 = vsel %vm475_vm7, %v472_v35, %v474_v42 }
 0x177   :  { %v390_v23 = vadd.f32 %v378_v44, %v339_v24  ;;  %v493_v48 = vadd.f32 %v481_v58, %v442_v47 }
 0x179   :  { %4564 = vrot.lane.b32.xlu0 %v5542_v10, %s5155_s28  ;;  %4549 = vrot.lane.b32.xlu1 %v5542_v10, %s5154_s27  ;;  %v441_v46 = vadd.f32 %v429_v0, %v390_v23  ;;  %v5663_v36 = vmax.f32 %v493_v48, 0.0 }
 0x17b   :  { %v492_v51 = vadd.f32 %v480_v32, %v441_v46 }
 0x17d   :  { %4574 = vrot.lane.b32.xlu0 %v4553_v8, %s5155_s28  ;;  %4559 = vrot.lane.b32.xlu1 %v4553_v8, %s5154_s27  ;;  %v5665_v60 = vmax.f32 %v492_v51, 0.0 }
 0x17f   :  { %v4598_v1 = vpack.i.bf16 %v5663_v36, %v5665_v60 }
 0x181   :  { %4584 = vrot.lane.b32.xlu0 %v5542_v10, %s5157_s30  ;;  %4569 = vrot.lane.b32.xlu1 %v5542_v10, %s5156_s29 }
 0x185   :  { %4594 = vrot.lane.b32.xlu0 %v4553_v8, %s5157_s30  ;;  %4579 = vrot.lane.b32.xlu1 %v4553_v8, %s5156_s29 }
 0x189   :  { %4599 = vrot.lane.b32.xlu0 %v4598_v1, %s5152_s0  ;;  %4589 = vrot.lane.b32.xlu1 %v5542_v10, %s5158_s10  ;;  %v4623_v10 = vpack.i.bf16 %v5665_v60, %v5625_v15 }
 0x18d   :  { %4609 = vrot.lane.b32.xlu0 %v4598_v1, %s5154_s27  ;;  %648 = vrot.lane.b32.xlu1 %v5623_v41, %s5158_s10 }
 0x191   :  { %675 = vrot.lane.b32.xlu0 %v5536_v5, %s5159_s11  ;;  %4604 = vrot.lane.b32.xlu1 %v4598_v1, %s5153_s26 }
 0x195   :  { %4614 = vrot.lane.b32.xlu0 %v4598_v1, %s5155_s28  ;;  %673 = vrot.lane.b32.xlu1 %v5534_v6, %s5159_s11 }
 0x199   :  { %4619 = vrot.lane.b32.xlu0 %v4598_v1, %s5157_s30  ;;  %671 = vrot.lane.b32.xlu1 %v5623_v41, %s5159_s11 }
 0x19d   :  { %612 = vrot.lane.b32.xlu0 %v5663_v36, %s5156_s29  ;;  %610 = vrot.lane.b32.xlu1 %v5665_v60, %s5156_s29 }
 0x1a1   :  { %677 = vrot.lane.b32.xlu0 %v5625_v15, %s5159_s11  ;;  %4624 = vrot.lane.b32.xlu1 %v4623_v10, %s5158_s10 }
 0x1a5   :  { %681 = vrot.lane.b32.xlu0 %v5663_v36, %s5159_s11  ;;  %658 = vrot.lane.b32.xlu1 %v5663_v36, %s5158_s10 }
 0x1a9   :  { %701 = vperm.xlu0 %4532, %v503_v50   ;;  %679 = vrot.lane.b32.xlu1 %v5665_v60, %s5159_s11 }
 0x1ad   :  { %696 = vperm.xlu1 %4628, %v502_v56  }
 0x1b1   :  { %958 = vperm.xlu1 %4628, %v955_v52  }
 0x1c3   :  { %v4535_v4 = vpop.permute.xlu0 %4534 }
 0x1c4   :  { %v4537_v16 = vunpack.i.h.bf16 %v4535_v4  ;;  %v4536_v28 = vunpack.i.l.bf16 %v4535_v4 }
 0x1c6   :  { %v523_v54 = vsel %vm119_vm0, %v4536_v28, %v4537_v16 }
 0x1c7   :  { %v3966_v63 = vpack.c.bf16 %v523_v54, %v5534_v6  ;;  %v5714_v57 = vpop.permute.xlu0 %4544 }
 0x1c8   :  { %v4547_v14 = vunpack.i.h.bf16 %v5714_v57  ;;  %v4546_v31 = vunpack.i.l.bf16 %v5714_v57  ;;  %v5798_v57 = vld [vmem:[%s7041_s2 + $0x10] sm:$0xff] }
 0x1c9   :  { %3967 = vmatprep.subr.bf16.mxu0 %v3966_v63 }
 0x1ca   :  { %v546_v26 = vsel %vm165_vm1, %v4546_v31, %v4547_v14 }
 0x1e7   :  { %v5716_v29 = vpop.permute.xlu0 %4554  ;;  %v4540_v30 = vpop.permute.xlu1 %4539 }
 0x1e8   :  { %v4541_v59 = vunpack.i.l.bf16 %v4540_v30  ;;  %v4556_v25 = vunpack.i.l.bf16 %v5716_v29  ;;  %v4542_v24 = vunpack.i.h.bf16 %v4540_v30 }
 0x1ea   :  { %v522_v62 = vsel %vm119_vm0, %v4541_v59, %v4536_v28  ;;  %v545_v8 = vsel %vm165_vm1, %v4556_v25, %v4546_v31  ;;  %v524_v56 = vsel %vm119_vm0, %v4537_v16, %v4542_v24 }
 0x1eb   :  { %v5721_v33 = vpop.permute.xlu0 %4564  ;;  %v5723_v27 = vpop.permute.xlu1 %4549  ;;  %v3968_v7 = vpack.c.bf16 %v522_v62, %v5623_v41  ;;  %v3984_v16 = vpack.c.bf16 %v524_v56, %v5536_v5 }
 0x1ec   :  { %v4552_v6 = vunpack.i.h.bf16 %v5723_v27  ;;  %v4551_v2 = vunpack.i.l.bf16 %v5723_v27  ;;  %v4567_v53 = vunpack.i.h.bf16 %v5721_v33  ;;  %v4566_v38 = vunpack.i.l.bf16 %v5721_v33 }
 0x1ed   :  { %3969 = vmatpush1.bf16.msra.mxu0 %v3968_v7 }
 0x1ee   :  { %v569_v45 = vsel %vm220_vm2, %v4551_v2, %v4552_v6  ;;  %v592_v61 = vsel %vm271_vm3, %v4566_v38, %v4567_v53 }
 0x1ef   :  { %v5735_v35 = vpop.permute.xlu0 %4574  ;;  %v4560_v39 = vpop.permute.xlu1 %4559  ;;  %v3970_v49 = vpack.c.bf16 %v569_v45, %v546_v26  ;;  %v4557_v26 = vunpack.i.h.bf16 %v5716_v29 }
 0x1f0   :  { %v4561_v41 = vunpack.i.l.bf16 %v4560_v39  ;;  %v4576_v43 = vunpack.i.l.bf16 %v5735_v35  ;;  %v4562_v7 = vunpack.i.h.bf16 %v4560_v39 }
 0x1f1   :  { %3971 = vmatprep.subr.bf16.mxu0 %v3970_v49  ;;  %v547_v29 = vsel %vm165_vm1, %v4547_v14, %v4557_v26 }
 0x1f2   :  { %v568_v55 = vsel %vm220_vm2, %v4561_v41, %v4551_v2  ;;  %v591_v58 = vsel %vm271_vm3, %v4576_v43, %v4566_v38 }
 0x1f3   :  { %v5741_v34 = vpop.permute.xlu0 %4584  ;;  %v5743_v37 = vpop.permute.xlu1 %4569  ;;  %v3972_v40 = vpack.c.bf16 %v568_v55, %v545_v8 }
 0x1f4   :  { %v4572_v21 = vunpack.i.h.bf16 %v5743_v37  ;;  %v4571_v18 = vunpack.i.l.bf16 %v5743_v37  ;;  %v4587_v47 = vunpack.i.h.bf16 %v5741_v34  ;;  %v4586_v0 = vunpack.i.l.bf16 %v5741_v34 }
 0x1f5   :  { %3973 = vmatpush1.bf16.msra.mxu0 %v3972_v40 }
 0x1f6   :  { %v615_v9 = vsel %vm322_vm4, %v4571_v18, %v4572_v21  ;;  %v638_v52 = vsel %vm373_vm5, %v4586_v0, %v4587_v47 }
 0x1f7   :  { %v5754_v20 = vpop.permute.xlu0 %4594  ;;  %v5756_v42 = vpop.permute.xlu1 %4579  ;;  %v3974_v44 = vpack.c.bf16 %v615_v9, %v592_v61 }
 0x1f8   :  { %v4581_v19 = vunpack.i.l.bf16 %v5756_v42  ;;  %v4596_v51 = vunpack.i.l.bf16 %v5754_v20  ;;  %v4582_v61 = vunpack.i.h.bf16 %v5756_v42 }
 0x1f9   :  { %3975 = vmatprep.subr.bf16.mxu0 %v3974_v44 }
 0x1fa   :  { %v614_v23 = vsel %vm322_vm4, %v4581_v19, %v4571_v18  ;;  %v637_v31 = vsel %vm373_vm5, %v4596_v51, %v4586_v0 }
 0x1fb   :  { %v4600_v32 = vpop.permute.xlu0 %4599  ;;  %v5763_v46 = vpop.permute.xlu1 %4589  ;;  %v3976_v48 = vpack.c.bf16 %v614_v23, %v591_v58  ;;  %v4577_v58 = vunpack.i.h.bf16 %v5735_v35 }
 0x1fc   :  { %v4601_v1 = vunpack.i.l.bf16 %v4600_v32  ;;  %v4592_v10 = vunpack.i.h.bf16 %v5763_v46  ;;  %v4591_v50 = vunpack.i.l.bf16 %v5763_v46  ;;  %v4602_v38 = vunpack.i.h.bf16 %v4600_v32 }
 0x1fd   :  { %3977 = vmatpush1.bf16.msra.mxu0 %v3976_v48 }
 0x1fe   :  { %v661_v4 = vsel %vm424_vm6, %v4591_v50, %v4592_v10  ;;  %v525_v28 = vsel %vm119_vm0, %v4542_v24, %v4601_v1  ;;  %v526_v27 = vsel %vm119_vm0, %v4601_v1, %v4602_v38  ;;  %v3998_v0 = vpack.c.bf16 %v4602_v38, %v5663_v36  ;;  %v501_v36 = vld [vmem:[%s7041_s2 + $0x20] sm:$0xf] }
 0x1ff   :  { %v4610_v54 = vpop.permute.xlu0 %4609  ;;  %v649_v63 = vpop.permute.xlu1 %648  ;;  %v3978_v30 = vpack.c.bf16 %v661_v4, %v638_v52  ;;  %v3982_v59 = vpack.c.bf16 %v525_v28, %v5625_v15  ;;  %v570_v15 = vsel %vm220_vm2, %v4552_v6, %v4562_v7  ;;  %v4000_v23 = vpack.c.bf16 %v526_v27, %v5665_v60 }
 0x200   :  { %v660_v62 = vsel %vm424_vm6, %v649_v63, %v4591_v50  ;;  %v4611_v25 = vunpack.i.l.bf16 %v4610_v54  ;;  %v3988_v43 = vpack.c.bf16 %v570_v15, %v547_v29  ;;  %v4612_v14 = vunpack.i.h.bf16 %v4610_v54 }
 0x201   :  { %v3980_v2 = vpack.c.bf16 %v660_v62, %v637_v31  ;;  %3979 = vmatprep.subr.bf16.mxu0 %v3978_v30  ;;  %3983 = vmatprep.subr.bf16.mxu1 %v3982_v59  ;;  %v616_v60 = vsel %vm322_vm4, %v4572_v21, %v4582_v61  ;;  %v4597_v52 = vunpack.i.h.bf16 %v5754_v20  ;;  %v593_v54 = vsel %vm271_vm3, %v4567_v53, %v4577_v58 }
 0x202   :  { %3985 = vmatpush1.bf16.msra.mxu1 %v3984_v16  ;;  %v571_v39 = vsel %vm220_vm2, %v4562_v7, %v4611_v25  ;;  %v572_v35 = vsel %vm220_vm2, %v4611_v25, %v4612_v14  ;;  %v3992_v30 = vpack.c.bf16 %v616_v60, %v593_v54 }
 0x203   :  { %v5781_v45 = vpop.permute.xlu0 %675  ;;  %v4605_v49 = vpop.permute.xlu1 %4604  ;;  %3981 = vmatpush1.bf16.msra.mxu0 %v3980_v2  ;;  %v639_v25 = vsel %vm373_vm5, %v4587_v47, %v4597_v52 }
 0x204   :  { %v4606_v41 = vunpack.i.l.bf16 %v4605_v49  ;;  %v4607_v6 = vunpack.i.h.bf16 %v4605_v49 }
 0x206   :  { %v548_v5 = vsel %vm165_vm1, %v4557_v26, %v4606_v41  ;;  %v549_v42 = vsel %vm165_vm1, %v4606_v41, %v4607_v6  ;;  %v4002_v32 = vpack.c.bf16 %v4612_v14, %v4607_v6 }
 0x207   :  { %v4615_v8 = vpop.permute.xlu0 %4614  ;;  %v674_v55 = vpop.permute.xlu1 %673  ;;  %v3986_v40 = vpack.c.bf16 %v571_v39, %v548_v5  ;;  %v4004_v28 = vpack.c.bf16 %v572_v35, %v549_v42  ;;  %v954_v42 = vld [vmem:[%s7041_s2 + $0x30] sm:$0xff] }
 0x208   :  { %v684_v18 = vsel %vm475_vm7, %v674_v55, %v5781_v45  ;;  %v4616_v19 = vunpack.i.l.bf16 %v4615_v8  ;;  %v4617_v1 = vunpack.i.h.bf16 %v4615_v8 }
 0x209   :  { %727 = vmatprep.subr.mxu0 %v684_v18  ;;  %3987 = vmatprep.subr.bf16.mxu1 %v3986_v40 }
 0x20a   :  { %3989 = vmatpush1.bf16.msra.mxu1 %v3988_v43  ;;  %v594_v56 = vsel %vm271_vm3, %v4577_v58, %v4616_v19  ;;  %v595_v62 = vsel %vm271_vm3, %v4616_v19, %v4617_v1  ;;  %v7063_v58 = vmov 0  ;;  %vm2031_vm3 = vcmask 130048  }
 0x20b   :  { %v4620_v9 = vpop.permute.xlu0 %4619  ;;  %v672_v44 = vpop.permute.xlu1 %671  ;;  %v7064_v58 = vsel %vm5850_vm11, 4294967295, %v7063_v58 }
 0x20c   :  { %v683_v24 = vsel %vm475_vm7, %v672_v44, %v674_v55  ;;  %v4621_v63 = vunpack.i.l.bf16 %v4620_v9  ;;  %v4622_v31 = vunpack.i.h.bf16 %v4620_v9  ;;  %7065 = vst [vmem:[#allocation8_spill] sm:$0xff] %v7064_v58 }
 0x20d   :  { %728 = vmatpush1.msra.mxu0 %v683_v24 }
 0x20e   :  { %3791 = vmatmul.mubr.msk.f32.vlgmr.msra.gmra.mrb[0].mxu0 %vm704_vm8, %v5798_v57  ;;  %3999 = vmatprep.subr.bf16.mxu0 %v3998_v0  ;;  %v640_v53 = vsel %vm373_vm5, %v4597_v52, %v4621_v63  ;;  %v641_v38 = vsel %vm373_vm5, %v4621_v63, %v4622_v31 }
 0x20f   :  { %v613_v48 = vpop.permute.xlu0 %612  ;;  %v611_v51 = vpop.permute.xlu1 %610  ;;  %4001 = vmatpush1.bf16.msra.mxu0 %v4000_v23  ;;  %781 = vmatprep.mubr.f32.mxu0 %v7050_v3 }
 0x210   :  { %v617_v50 = vsel %vm322_vm4, %v4582_v61, %v611_v51  ;;  %4003 = vmatprep.subr.bf16.mxu0 %v4002_v32  ;;  %v4006_v37 = vpack.c.bf16 %v613_v48, %v4617_v1  ;;  %v618_v21 = vsel %vm322_vm4, %v611_v51, %v613_v48 }
 0x211   :  { %v3990_v4 = vpack.c.bf16 %v617_v50, %v594_v56  ;;  %v4008_v33 = vpack.c.bf16 %v618_v21, %v595_v62 }
 0x212   :  { %3792 = vmatmul.mubr.msk.f32.gmra.mrb[2].mxu0 %vm704_vm8, %v501_v36 }
 0x213   :  { %v4625_v59 = vpop.permute.xlu1 %4624  ;;  %3991 = vmatprep.subr.bf16.mxu1 %v3990_v4  ;;  %4005 = vmatpush1.bf16.msra.mxu0 %v4004_v28  ;;  %v678_v7 = vpop.permute.xlu0 %677 }
 0x214   :  { %v4627_v20 = vunpack.i.h.bf16 %v4625_v59  ;;  %v4626_v16 = vunpack.i.l.bf16 %v4625_v59  ;;  %3993 = vmatpush1.bf16.msra.mxu1 %v3992_v30  ;;  %4007 = vmatprep.subr.bf16.mxu0 %v4006_v37  ;;  %v685_v46 = vsel %vm475_vm7, %v5781_v45, %v678_v7 }
 0x215   :  { %929 = vmatprep.mubr.f32.mxu0 %v7050_v3 }
 0x216   :  { %v663_v2 = vsel %vm424_vm6, %v4626_v16, %v4627_v20  ;;  %v662_v26 = vsel %vm424_vm6, %v4592_v10, %v4626_v16 }
 0x217   :  { %v659_v49 = vpop.permute.xlu1 %658  ;;  %4009 = vmatpush1.bf16.msra.mxu0 %v4008_v33  ;;  %v3994_v41 = vpack.c.bf16 %v663_v2, %v640_v53  ;;  %v3996_v15 = vpack.c.bf16 %v662_v26, %v639_v25  ;;  %v682_v34 = vpop.permute.xlu0 %681 }
 0x218   :  { %v664_v5 = vsel %vm424_vm6, %v4627_v20, %v659_v49  ;;  %v4010_v39 = vpack.c.bf16 %v659_v49, %v4622_v31  ;;  %vm2969_vm6 = vcmask 293888  }
 0x219   :  { %v4012_v8 = vpack.c.bf16 %v664_v5, %v641_v38  ;;  %3995 = vmatprep.subr.bf16.mxu1 %v3994_v41 }
 0x21a   :  { %3997 = vmatpush1.bf16.msra.mxu1 %v3996_v15  ;;  %4011 = vmatprep.subr.bf16.mxu0 %v4010_v39 }
 0x21b   :  { %v680_v55 = vpop.permute.xlu1 %679  ;;  %4013 = vmatpush1.bf16.msra.mxu0 %v4012_v8 }
 0x21c   :  { %881 = vmatprep.subr.mxu0 %v682_v34  ;;  %v686_v47 = vsel %vm475_vm7, %v678_v7, %v680_v55  ;;  %v687_v10 = vsel %vm475_vm7, %v680_v55, %v682_v34 }
 0x21d   :  { %804 = vmatprep.subr.mxu1 %v686_v47 }
 0x21e   :  { %805 = vmatpush1.msra.mxu1 %v685_v46 }
 0x21f   :  { %3793 = vmatmul.mubr.msk.f32.vlgmr.msra.gmra.mrb[0].mxu1 %vm704_vm8, %v5798_v57  ;;  %882 = vmatpush1.msra.mxu0 %v687_v10 }
 0x220   :  { %3795 = vmatmul.mubr.msk.f32.vlgmr.msra.gmra.mrb[4].mxu0 %vm704_vm8, %v5798_v57  ;;  %858 = vmatprep.mubr.f32.mxu1 %v7050_v3 }
 0x221   :  { %935 = vmatprep.mubr.f32.mxu0 %v7050_v3 }
 0x223   :  { %3794 = vmatmul.mubr.msk.f32.gmra.mrb[2].mxu1 %vm704_vm8, %v501_v36 }
 0x224   :  { %3796 = vmatmul.mubr.msk.f32.gmra.mrb[6].mxu0 %vm704_vm8, %v501_v36  ;;  %1048 = vmatprep.mubr.f32.mxu1 %v7050_v3 }
 0x225   :  { %1603 = vmatprep.mubr.f32.mxu0 %v7050_v3 }
 0x228   :  { %v702_v27 = vpop.permute.xlu0 %701 }
 0x22c   :  { %v697_v45 = vpop.permute.xlu1 %696 }
 0x230   :  { %v959_v41 = vpop.permute.xlu1 %958 }
 0x2e1   :  { %v777_v40 = vpop.f32.mrb[0].mxu0 }
 0x2e2   :  { %v779_v29 = vpop.f32.mrb[1].mxu0  ;;  %v778_v18 = vadd.f32 %v777_v40, %v697_v45 }
 0x2e3   :  { %v780_v43 = vadd.f32 %v779_v29, %v697_v45 }
 0x2e4   :  { %v942_v9 = vmax.f32 %v778_v18, 0.0 }
 0x2e5   :  { %v783_v6 = vpop.f32.mrb[2].mxu0  ;;  %v943_v14 = vmax.f32 %v780_v43, 0.0 }
 0x2e6   :  { %v784_v61 = vadd.f32 %v783_v6, %v702_v27  ;;  %v785_v44 = vpop.f32.mrb[3].mxu0 }
 0x2e7   :  { %v786_v57 = vadd.f32 %v785_v44, %v702_v27 }
 0x2e8   :  { %v948_v19 = vmax.f32 %v784_v61, 0.0 }
 0x2e9   :  { %v949_v24 = vmax.f32 %v786_v57, 0.0 }
 0x2ea   :  { %v4017_v0 = vpack.c.bf16 %v948_v19, %v942_v9 }
 0x2eb   :  { %v4014_v23 = vpack.c.bf16 %v949_v24, %v943_v14 }
 0x2ed   :  { %4016 = vmatprep.subr.msk.bf16.mxu1 %vm5850_vm11, %v4014_v23 }
 0x2ee   :  { %4019 = vmatpush1.bf16.msk.msra.mxu1 %vm5850_vm11, %v4017_v0 }
 0x2f1   :  { %3799 = vmatmul.mubr.msk.f32.vlgmr.msra.gmra.mrb[4].mxu1 %vm961_vm12, %v954_v42 }
 0x2f2   :  { %v854_v32 = vpop.f32.mrb[0].mxu1  ;;  %1119 = vmatprep.mubr.f32.mxu1 %v7050_v3 }
 0x2f3   :  { %v856_v48 = vpop.f32.mrb[1].mxu1  ;;  %v931_v51 = vpop.f32.mrb[4].mxu0  ;;  %v855_v60 = vadd.f32 %v854_v32, %v697_v45 }
 0x2f4   :  { %v933_v36 = vpop.f32.mrb[5].mxu0  ;;  %v857_v35 = vadd.f32 %v856_v48, %v697_v45  ;;  %v932_v1 = vadd.f32 %v931_v51, %v697_v45 }
 0x2f5   :  { %v934_v56 = vadd.f32 %v933_v36, %v697_v45  ;;  %v944_v21 = vmax.f32 %v855_v60, 0.0 }
 0x2f6   :  { %v860_v50 = vpop.f32.mrb[2].mxu1  ;;  %v945_v31 = vmax.f32 %v857_v35, 0.0  ;;  %v946_v62 = vmax.f32 %v932_v1, 0.0 }
 0x2f7   :  { %v861_v52 = vadd.f32 %v860_v50, %v702_v27  ;;  %v862_v4 = vpop.f32.mrb[3].mxu1  ;;  %v937_v28 = vpop.f32.mrb[6].mxu0  ;;  %v947_v33 = vmax.f32 %v934_v56, 0.0 }
 0x2f8   :  { %v863_v54 = vadd.f32 %v862_v4, %v702_v27  ;;  %v938_v63 = vadd.f32 %v937_v28, %v702_v27  ;;  %v939_v37 = vpop.f32.mrb[7].mxu0 }
 0x2f9   :  { %v950_v30 = vmax.f32 %v861_v52, 0.0  ;;  %v940_v59 = vadd.f32 %v939_v37, %v702_v27 }
 0x2fa   :  { %v951_v20 = vmax.f32 %v863_v54, 0.0  ;;  %v952_v16 = vmax.f32 %v938_v63, 0.0 }
 0x2fb   :  { %v4023_v7 = vpack.c.bf16 %v950_v30, %v944_v21  ;;  %v953_v53 = vmax.f32 %v940_v59, 0.0 }
 0x2fc   :  { %v4020_v2 = vpack.c.bf16 %v951_v20, %v945_v31  ;;  %v4029_v25 = vpack.c.bf16 %v952_v16, %v946_v62 }
 0x2fd   :  { %v4026_v26 = vpack.c.bf16 %v953_v53, %v947_v33 }
 0x2fe   :  { %4022 = vmatprep.subr.msk.bf16.mxu1 %vm5850_vm11, %v4020_v2 }
 0x2ff   :  { %4025 = vmatpush1.bf16.msk.msra.mxu1 %vm5850_vm11, %v4023_v7 }
 0x300   :  { %4028 = vmatprep.subr.msk.bf16.mxu1 %vm5850_vm11, %v4026_v26 }
 0x302   :  { %3802 = vmatmul.mubr.msk.f32.vlgmr.msra.gmra.mrb[6].mxu1 %vm961_vm12, %v954_v42 }
 0x303   :  { %4031 = vmatpush1.bf16.msk.msra.mxu1 %vm5850_vm11, %v4029_v25  ;;  %1190 = vmatprep.mubr.f32.mxu1 %v7050_v3 }
 0x306   :  { %3805 = vmatmul.mubr.msk.f32.vlgmr.msra.gmra.mrb[8].mxu1 %vm961_vm12, %v954_v42 }
 0x307   :  { %1526 = vmatprep.mubr.f32.mxu1 %v7050_v3 }
 0x3c4   :  { %v1050_v49 = vpop.f32.mrb[4].mxu1 }
 0x3c5   :  { %v1052_v15 = vpop.f32.mrb[5].mxu1  ;;  %v1051_v46 = vadd.f32 %v1050_v49, %v959_v41 }
 0x3c6   :  { %v1053_v38 = vadd.f32 %v1052_v15, %v959_v41 }
 0x3c7   :  { %v1197_v27 = vmax.f32 %v1051_v46, 0.0 }
 0x3c8   :  { %v1198_v5 = vmax.f32 %v1053_v38, 0.0 }
 0x3ca   :  { %1211 = vrot.lane.b32.xlu0 %v1198_v5, %s5152_s0 }
 0x3d5   :  { %v1121_v39 = vpop.f32.mrb[6].mxu1 }
 0x3d6   :  { %v1122_v8 = vadd.f32 %v1121_v39, %v959_v41  ;;  %v1123_v34 = vpop.f32.mrb[7].mxu1 }
 0x3d7   :  { %v1124_v55 = vadd.f32 %v1123_v34, %v959_v41 }
 0x3d8   :  { %v1199_v47 = vmax.f32 %v1122_v8, 0.0 }
 0x3d9   :  { %v1200_v10 = vmax.f32 %v1124_v55, 0.0  ;;  %v1192_v45 = vpop.f32.mrb[8].mxu1 }
 0x3da   :  { %v1193_v40 = vadd.f32 %v1192_v45, %v959_v41  ;;  %v1194_v29 = vpop.f32.mrb[9].mxu1  ;;  %1213 = vrot.lane.b32.xlu1 %v1199_v47, %s5152_s0 }
 0x3db   :  { %1215 = vrot.lane.b32.xlu0 %v1200_v10, %s5152_s0  ;;  %v1195_v43 = vadd.f32 %v1194_v29, %v959_v41 }
 0x3dc   :  { %v1201_v18 = vmax.f32 %v1193_v40, 0.0 }
 0x3dd   :  { %v1202_v6 = vmax.f32 %v1195_v43, 0.0 }
 0x3de   :  { %1217 = vrot.lane.b32.xlu1 %v1201_v18, %s5152_s0 }
 0x3df   :  { %1209 = vrot.lane.b32.xlu0 %v1197_v27, %s5152_s0 }
 0x3e2   :  { %1219 = vrot.lane.b32.xlu1 %v1202_v6, %s5152_s0  ;;  %s5165_s0 = smov 124  }
 0x43c   :  { %v1212_v61 = vpop.permute.xlu0 %1211 }
 0x44c   :  { %v1214_v9 = vpop.permute.xlu1 %1213 }
 0x44d   :  { %v1222_v44 = vsel %vm119_vm0, %v1212_v61, %v1214_v9  ;;  %v1216_v57 = vpop.permute.xlu0 %1215 }
 0x44e   :  { %v1233_v14 = vmax.f32 %v1198_v5, %v1222_v44  ;;  %v1223_v19 = vsel %vm119_vm0, %v1214_v9, %v1216_v57 }
 0x44f   :  { %v1234_v24 = vmax.f32 %v1199_v47, %v1223_v19 }
 0x450   :  { %v1218_v0 = vpop.permute.xlu1 %1217  ;;  %1246 = vrot.lane.b32.xlu0 %v1233_v14, %s5154_s27 }
 0x451   :  { %v1224_v23 = vsel %vm119_vm0, %v1216_v57, %v1218_v0  ;;  %1248 = vrot.lane.b32.xlu1 %v1234_v24, %s5154_s27  ;;  %v1210_v42 = vpop.permute.xlu0 %1209 }
 0x452   :  { %v1235_v32 = vmax.f32 %v1200_v10, %v1224_v23  ;;  %v1221_v48 = vsel %vm119_vm0, %v1210_v42, %v1212_v61 }
 0x453   :  { %v1232_v51 = vmax.f32 %v1197_v27, %v1221_v48 }
 0x454   :  { %v1220_v36 = vpop.permute.xlu1 %1219  ;;  %1250 = vrot.lane.b32.xlu0 %v1235_v32, %s5154_s27 }
 0x455   :  { %v1225_v60 = vsel %vm119_vm0, %v1218_v0, %v1220_v36  ;;  %1244 = vrot.lane.b32.xlu1 %v1232_v51, %s5154_s27  ;;  %v1237_v1 = vmax.f32 %v1202_v6, %v1220_v36  ;;  %vm1399_vm0 = vcmask 392192  }
 0x456   :  { %v1236_v35 = vmax.f32 %v1201_v18, %v1225_v60 }
 0x458   :  { %1252 = vrot.lane.b32.xlu0 %v1236_v35, %s5154_s27 }
 0x459   :  { %1254 = vrot.lane.b32.xlu1 %v1237_v1, %s5154_s27  ;;  %s5166_s27 = smov 84  }
 0x4c2   :  { %v1247_v50 = vpop.permute.xlu0 %1246 }
 0x4c3   :  { %v1249_v56 = vpop.permute.xlu1 %1248 }
 0x4c4   :  { %v1257_v54 = vsel %vm220_vm2, %v1247_v50, %v1249_v56 }
 0x4c5   :  { %v1268_v30 = vmax.f32 %v1233_v14, %v1257_v54 }
 0x4c6   :  { %v1251_v52 = vpop.permute.xlu0 %1250 }
 0x4c7   :  { %v1258_v4 = vsel %vm220_vm2, %v1249_v56, %v1251_v52  ;;  %v1245_v28 = vpop.permute.xlu1 %1244 }
 0x4c8   :  { %v1256_v63 = vsel %vm220_vm2, %v1245_v28, %v1247_v50  ;;  %v5895_v37 = vmax.f32 %v1234_v24, %v1258_v4 }
 0x4c9   :  { %v5897_v21 = vmax.f32 %v1232_v51, %v1256_v63 }
 0x4ca   :  { %v4629_v59 = vpack.i.bf16 %v5895_v37, %v1268_v30  ;;  %v1253_v31 = vpop.permute.xlu0 %1252 }
 0x4cb   :  { %1410 = vrot.lane.b32.xlu1 %v5897_v21, %s5162_s24  ;;  %1387 = vrot.lane.b32.xlu0 %v5897_v21, %s5163_s6  ;;  %v1259_v62 = vsel %vm220_vm2, %v1251_v52, %v1253_v31  ;;  %v1255_v33 = vpop.permute.xlu1 %1254 }
 0x4cc   :  { %v5911_v20 = vmax.f32 %v1235_v32, %v1259_v62  ;;  %v1260_v7 = vsel %vm220_vm2, %v1253_v31, %v1255_v33  ;;  %v1272_v2 = vmax.f32 %v1237_v1, %v1255_v33  ;;  %vm1445_vm2 = vcmask 359424  }
 0x4cd   :  { %v5925_v53 = vmax.f32 %v1236_v35, %v1260_v7 }
 0x4ce   :  { %v4664_v16 = vpack.i.bf16 %v5911_v20, %v5897_v21 }
 0x4cf   :  { %1435 = vrot.lane.b32.xlu1 %v1268_v30, %s5164_s25  ;;  %4630 = vrot.lane.b32.xlu0 %v4629_v59, %s5153_s26  ;;  %v4689_v25 = vpack.i.bf16 %v1272_v2, %v5925_v53  ;;  %v4704_v26 = vpack.i.bf16 %v5925_v53, %v5911_v20 }
 0x4d3   :  { %4640 = vrot.lane.b32.xlu1 %v4629_v59, %s5157_s30  ;;  %4635 = vrot.lane.b32.xlu0 %v4629_v59, %s5165_s0 }
 0x4d7   :  { %4650 = vrot.lane.b32.xlu1 %v4629_v59, %s5166_s27  ;;  %4645 = vrot.lane.b32.xlu0 %v4629_v59, %s5159_s11 }
 0x4db   :  { %4660 = vrot.lane.b32.xlu1 %v4629_v59, %s5162_s24  ;;  %4655 = vrot.lane.b32.xlu0 %v4629_v59, %s5163_s6 }
 0x4df   :  { %1437 = vrot.lane.b32.xlu0 %v5895_v37, %s5164_s25  ;;  %4665 = vrot.lane.b32.xlu1 %v4664_v16, %s5153_s26 }
 0x4e3   :  { %4670 = vrot.lane.b32.xlu0 %v4664_v16, %s5165_s0  ;;  %4675 = vrot.lane.b32.xlu1 %v4664_v16, %s5157_s30 }
 0x4e7   :  { %4680 = vrot.lane.b32.xlu0 %v4664_v16, %s5159_s11  ;;  %4685 = vrot.lane.b32.xlu1 %v4664_v16, %s5166_s27 }
 0x4eb   :  { %1288 = vrot.lane.b32.xlu0 %v5925_v53, %s5153_s26  ;;  %1433 = vrot.lane.b32.xlu1 %v5897_v21, %s5164_s25 }
 0x4ef   :  { %4690 = vrot.lane.b32.xlu0 %v4689_v25, %s5157_s30  ;;  %1307 = vrot.lane.b32.xlu1 %v5925_v53, %s5165_s0 }
 0x4f3   :  { %4695 = vrot.lane.b32.xlu0 %v4689_v25, %s5159_s11  ;;  %4700 = vrot.lane.b32.xlu1 %v4689_v25, %s5166_s27 }
 0x4f7   :  { %4705 = vrot.lane.b32.xlu0 %v4704_v26, %s5163_s6  ;;  %4710 = vrot.lane.b32.xlu1 %v4704_v26, %s5162_s24 }
 0x4fb   :  { %1397 = vrot.lane.b32.xlu0 %v1272_v2, %s5163_s6  ;;  %1420 = vrot.lane.b32.xlu1 %v1272_v2, %s5162_s24 }
 0x4ff   :  { %1439 = vrot.lane.b32.xlu0 %v5911_v20, %s5164_s25  ;;  %1441 = vrot.lane.b32.xlu1 %v5925_v53, %s5164_s25 }
 0x503   :  { %1443 = vrot.lane.b32.xlu0 %v1272_v2, %s5164_s25 }
 0x53d   :  { %v5948_v49 = vpop.permute.xlu1 %1410  ;;  %v5950_v41 = vpop.permute.xlu0 %1387 }
 0x541   :  { %v5952_v15 = vpop.permute.xlu1 %1435  ;;  %v4631_v38 = vpop.permute.xlu0 %4630 }
 0x542   :  { %v4633_v5 = vunpack.i.h.bf16 %v4631_v38  ;;  %v4632_v39 = vunpack.i.l.bf16 %v4631_v38 }
 0x544   :  { %v1291_v8 = vsel %vm165_vm1, %v4632_v39, %v4633_v5 }
 0x545   :  { %v5955_v34 = vpop.permute.xlu1 %4640  ;;  %v5957_v55 = vpop.permute.xlu0 %4635  ;;  %v4032_v47 = vpack.c.bf16 %v1291_v8, %v1268_v30 }
 0x546   :  { %v4638_v45 = vunpack.i.h.bf16 %v5957_v55  ;;  %v4637_v40 = vunpack.i.l.bf16 %v5957_v55  ;;  %v4643_v43 = vunpack.i.h.bf16 %v5955_v34  ;;  %v4642_v27 = vunpack.i.l.bf16 %v5955_v34 }
 0x547   :  { %4033 = vmatprep.subr.bf16.mxu1 %v4032_v47 }
 0x548   :  { %v1311_v57 = vsel %vm1309_vm13, %v4637_v40, %v4638_v45  ;;  %v1333_v0 = vsel %vm373_vm5, %v4642_v27, %v4643_v43 }
 0x549   :  { %v5959_v46 = vpop.permute.xlu1 %4650  ;;  %v5961_v10 = vpop.permute.xlu0 %4645  ;;  %v4036_v51 = vpack.c.bf16 %v1333_v0, %v1311_v57 }
 0x54a   :  { %v4648_v6 = vunpack.i.h.bf16 %v5961_v10  ;;  %v4647_v61 = vunpack.i.l.bf16 %v5961_v10  ;;  %v4653_v14 = vunpack.i.h.bf16 %v5959_v46  ;;  %v4652_v19 = vunpack.i.l.bf16 %v5959_v46 }
 0x54c   :  { %v1355_v36 = vsel %vm475_vm7, %v4647_v61, %v4648_v6  ;;  %v1378_v50 = vsel %vm1376_vm14, %v4652_v19, %v4653_v14 }
 0x54d   :  { %v5965_v29 = vpop.permute.xlu1 %4660  ;;  %v5967_v18 = vpop.permute.xlu0 %4655  ;;  %v4040_v16 = vpack.c.bf16 %v1378_v50, %v1355_v36 }
 0x54e   :  { %v4663_v60 = vunpack.i.h.bf16 %v5965_v29  ;;  %v4662_v56 = vunpack.i.l.bf16 %v5965_v29  ;;  %v4658_v52 = vunpack.i.h.bf16 %v5967_v18  ;;  %v4657_v4 = vunpack.i.l.bf16 %v5967_v18 }
 0x550   :  { %v1401_v7 = vsel %vm1399_vm0, %v4657_v4, %v4658_v52  ;;  %v1424_v2 = vsel %vm1422_vm15, %v4662_v56, %v4663_v60  ;;  %v1423_v47 = vsel %vm1422_vm15, %v5948_v49, %v4662_v56 }
 0x551   :  { %v4666_v9 = vpop.permute.xlu1 %4665  ;;  %v5973_v44 = vpop.permute.xlu0 %1437 }
 0x552   :  { %v4667_v24 = vunpack.i.l.bf16 %v4666_v9  ;;  %v4668_v28 = vunpack.i.h.bf16 %v4666_v9  ;;  %v4044_v9 = vpack.c.bf16 %v1424_v2, %v1401_v7 }
 0x554   :  { %v1290_v23 = vsel %vm165_vm1, %v4667_v24, %v4632_v39  ;;  %v1292_v33 = vsel %vm165_vm1, %v4633_v5, %v4668_v28 }
 0x555   :  { %v4034_v42 = vpack.c.bf16 %v1290_v23, %v5897_v21  ;;  %v5983_v32 = vpop.permute.xlu1 %4675  ;;  %v4671_v48 = vpop.permute.xlu0 %4670  ;;  %v4050_v57 = vpack.c.bf16 %v1292_v33, %v5895_v37 }
 0x556   :  { %v4677_v35 = vunpack.i.l.bf16 %v5983_v32  ;;  %v4672_v1 = vunpack.i.l.bf16 %v4671_v48  ;;  %v4678_v25 = vunpack.i.h.bf16 %v5983_v32  ;;  %v4673_v26 = vunpack.i.h.bf16 %v4671_v48 }
 0x557   :  { %4035 = vmatpush1.bf16.msra.mxu1 %v4034_v42 }
 0x558   :  { %v1332_v54 = vsel %vm373_vm5, %v4677_v35, %v4642_v27  ;;  %v1310_v63 = vsel %vm1309_vm13, %v4672_v1, %v4637_v40  ;;  %4037 = vmatprep.subr.bf16.mxu1 %v4036_v51  ;;  %v1400_v40 = vsel %vm1399_vm0, %v5950_v41, %v4657_v4  ;;  %v1312_v24 = vsel %vm1309_vm13, %v4638_v45, %v4673_v26 }
 0x559   :  { %v4038_v21 = vpack.c.bf16 %v1332_v54, %v1310_v63  ;;  %v5998_v30 = vpop.permute.xlu1 %4685  ;;  %v4681_v59 = vpop.permute.xlu0 %4680  ;;  %v4046_v42 = vpack.c.bf16 %v1423_v47, %v1400_v40 }
 0x55a   :  { %v4687_v31 = vunpack.i.l.bf16 %v5998_v30  ;;  %v4682_v62 = vunpack.i.l.bf16 %v4681_v59  ;;  %v4688_v49 = vunpack.i.h.bf16 %v5998_v30  ;;  %v4683_v0 = vunpack.i.h.bf16 %v4681_v59 }
 0x55b   :  { %4039 = vmatpush1.bf16.msra.mxu1 %v4038_v21 }
 0x55c   :  { %v1377_v38 = vsel %vm1376_vm14, %v4687_v31, %v4652_v19  ;;  %v1354_v39 = vsel %vm475_vm7, %v4682_v62, %v4647_v61  ;;  %4041 = vmatprep.subr.bf16.mxu1 %v4040_v16  ;;  %v1334_v61 = vsel %vm373_vm5, %v4643_v43, %v4678_v25  ;;  %v1379_v55 = vsel %vm1376_vm14, %v4653_v14, %v4688_v49 }
 0x55d   :  { %v4042_v8 = vpack.c.bf16 %v1377_v38, %v1354_v39  ;;  %v1434_v34 = vpop.permute.xlu1 %1433  ;;  %v1289_v5 = vpop.permute.xlu0 %1288  ;;  %v4054_v48 = vpack.c.bf16 %v1334_v61, %v1312_v24  ;;  %v1356_v45 = vsel %vm475_vm7, %v4648_v6, %v4683_v0  ;;  %v1273_v6 = vld [vmem:[%s7041_s2 + $0x40] sm:$0xff] }
 0x55e   :  { %v1293_v27 = vsel %vm165_vm1, %v4668_v28, %v1289_v5  ;;  %v1446_v36 = vsel %vm1445_vm2, %v1434_v34, %v5952_v15  ;;  %v4064_v35 = vpack.c.bf16 %v1289_v5, %v5925_v53  ;;  %v4058_v54 = vpack.c.bf16 %v1379_v55, %v1356_v45 }
 0x55f   :  { %v4048_v19 = vpack.c.bf16 %v1293_v27, %v5911_v20  ;;  %4043 = vmatpush1.bf16.msra.mxu1 %v4042_v8  ;;  %v1447_v20 = vsel %vm1445_vm2, %v5952_v15, %v5973_v44 }
 0x560   :  { %4045 = vmatprep.subr.bf16.mxu1 %v4044_v9 }
 0x561   :  { %v1308_v41 = vpop.permute.xlu1 %1307  ;;  %4049 = vmatprep.subr.bf16.mxu0 %v4048_v19  ;;  %v4691_v23 = vpop.permute.xlu0 %4690 }
 0x562   :  { %v4693_v32 = vunpack.i.h.bf16 %v4691_v23  ;;  %v4692_v37 = vunpack.i.l.bf16 %v4691_v23  ;;  %4051 = vmatpush1.bf16.msra.mxu0 %v4050_v57  ;;  %v1313_v43 = vsel %vm1309_vm13, %v4673_v26, %v1308_v41 }
 0x563   :  { %4047 = vmatpush1.bf16.msra.mxu1 %v4046_v42 }
 0x564   :  { %1478 = vmatprep.subr.mxu1 %v1447_v20  ;;  %v1335_v51 = vsel %vm373_vm5, %v4678_v25, %v4692_v37  ;;  %v1336_v46 = vsel %vm373_vm5, %v4692_v37, %v4693_v32  ;;  %v1274_v25 = vld [vmem:[%s7041_s2 + $0x50] sm:$0xff] }
 0x565   :  { %v4701_v1 = vpop.permute.xlu1 %4700  ;;  %v4696_v50 = vpop.permute.xlu0 %4695  ;;  %v4052_v56 = vpack.c.bf16 %v1335_v51, %v1313_v43  ;;  %v4068_v30 = vpack.c.bf16 %v1336_v46, %v1308_v41 }
 0x566   :  { %v4703_v14 = vunpack.i.h.bf16 %v4701_v1  ;;  %v4702_v4 = vunpack.i.l.bf16 %v4701_v1  ;;  %v4698_v10 = vunpack.i.h.bf16 %v4696_v50  ;;  %v4697_v28 = vunpack.i.l.bf16 %v4696_v50 }
 0x567   :  { %1479 = vmatpush1.msra.mxu1 %v1446_v36  ;;  %4053 = vmatprep.subr.bf16.mxu0 %v4052_v56 }
 0x568   :  { %4055 = vmatpush1.bf16.msra.mxu0 %v4054_v48  ;;  %4065 = vmatprep.subr.bf16.mxu1 %v4064_v35  ;;  %v1357_v53 = vsel %vm475_vm7, %v4683_v0, %v4697_v28  ;;  %v1380_v15 = vsel %vm1376_vm14, %v4688_v49, %v4702_v4  ;;  %v1358_v31 = vsel %vm475_vm7, %v4697_v28, %v4698_v10 }
 0x569   :  { %v4711_v63 = vpop.permute.xlu1 %4710  ;;  %v4706_v21 = vpop.permute.xlu0 %4705  ;;  %3806 = vmatmul.mubr.msk.f32.vlgmr.msra.gmra.mrb[10].mxu1 %vm704_vm8, %v1273_v6  ;;  %v4056_v59 = vpack.c.bf16 %v1380_v15, %v1357_v53  ;;  %v1381_v62 = vsel %vm1376_vm14, %v4702_v4, %v4703_v14 }
 0x56a   :  { %v4713_v16 = vunpack.i.h.bf16 %v4711_v63  ;;  %v4712_v33 = vunpack.i.l.bf16 %v4711_v63  ;;  %v4708_v7 = vunpack.i.h.bf16 %v4706_v21  ;;  %v4707_v2 = vunpack.i.l.bf16 %v4706_v21  ;;  %4067 = vmatpush3.bf16.msra.mxu1 %v4064_v35  ;;  %1532 = vmatprep.mubr.f32.mxu1 %v7050_v3 }
 0x56b   :  { %4069 = vmatprep.subr.bf16.mxu1 %v4068_v30  ;;  %4057 = vmatprep.subr.bf16.mxu0 %v4056_v59  ;;  %v4072_v40 = vpack.c.bf16 %v1381_v62, %v1358_v31  ;;  %v1705_v59 = vld [vmem:[%s7042_s3 + $0x20] sm:$0xff]  ;;  %v1706_v31 = vld [vmem:[%s7042_s3 + $0x28] sm:$0xff] }
 0x56c   :  { %v1425_v26 = vsel %vm1422_vm15, %v4663_v60, %v4712_v33  ;;  %v1402_v38 = vsel %vm1399_vm0, %v4658_v52, %v4707_v2  ;;  %4059 = vmatpush1.bf16.msra.mxu0 %v4058_v54  ;;  %v1403_v39 = vsel %vm1399_vm0, %v4707_v2, %v4708_v7  ;;  %v1426_v8 = vsel %vm1422_vm15, %v4712_v33, %v4713_v16 }
 0x56d   :  { %v4062_v34 = vpack.c.bf16 %v1425_v26, %v1402_v38  ;;  %v1421_v5 = vpop.permute.xlu1 %1420  ;;  %v1398_v47 = vpop.permute.xlu0 %1397  ;;  %v4060_v27 = vpack.c.bf16 %v1426_v8, %v1403_v39  ;;  %3807 = vmatmul.mubr.msk.f32.gmra.mrb[12].mxu1 %vm704_vm8, %v1274_v25 }
 0x56e   :  { %v1427_v29 = vsel %vm1422_vm15, %v4713_v16, %v1421_v5  ;;  %v1404_v60 = vsel %vm1399_vm0, %v4708_v7, %v1398_v47  ;;  %4071 = vmatpush3.bf16.msra.mxu1 %v4068_v30  ;;  %3948 = vmatprep.mubr.msk.f32.mxu1 %vm704_vm8, %v1273_v6  ;;  %v6111_v30 = vld [vmem:[%s7041_s2 + $0x68] sm:$0xff] }
 0x56f   :  { %v4076_v18 = vpack.c.bf16 %v1427_v29, %v1404_v60  ;;  %4073 = vmatprep.subr.bf16.mxu1 %v4072_v40  ;;  %4061 = vmatprep.subr.bf16.mxu0 %v4060_v27 }
 0x570   :  { %4063 = vmatpush1.bf16.msra.mxu0 %v4062_v34 }
 0x571   :  { %v1442_v52 = vpop.permute.xlu1 %1441  ;;  %v1440_v9 = vpop.permute.xlu0 %1439 }
 0x572   :  { %v1448_v57 = vsel %vm1445_vm2, %v5973_v44, %v1440_v9  ;;  %4075 = vmatpush3.bf16.msra.mxu1 %v4072_v40  ;;  %v1449_v19 = vsel %vm1445_vm2, %v1440_v9, %v1442_v52 }
 0x573   :  { %4077 = vmatprep.subr.bf16.mxu1 %v4076_v18  ;;  %1555 = vmatprep.subr.mxu0 %v1449_v19 }
 0x574   :  { %1556 = vmatpush1.msra.mxu0 %v1448_v57 }
 0x575   :  { %v1444_v61 = vpop.permute.xlu0 %1443  ;;  %3808 = vmatmul.mubr.msk.f32.vlgmr.msra.gmra.mrb[8].mxu0 %vm704_vm8, %v1273_v6 }
 0x576   :  { %4079 = vmatpush3.bf16.msra.mxu1 %v4076_v18  ;;  %v1450_v24 = vsel %vm1445_vm2, %v1442_v52, %v1444_v61  ;;  %1609 = vmatprep.mubr.f32.mxu0 %v7050_v3 }
 0x577   :  { %3946 = vmatprep.subr.mxu1 %v1450_v24 }
 0x579   :  { %3809 = vmatmul.mubr.msk.f32.gmra.mrb[10].mxu0 %vm704_vm8, %v1274_v25 }
 0x57a   :  { %3947 = vmatpush3.msra.mxu1 %v1450_v24  ;;  %3812 = vmatprep.mubr.msk.f32.mxu0 %vm2031_vm3, %v6111_v30 }
 0x57b   :  { %3949 = vmatmul.mubr.msk.f32.vlgmr.msra.gmra.mrb[14].mxu1 %vm704_vm8, %v1274_v25  ;;  %vm3774_vm8 = vcmask 9216  }
 0x57c   :  { %3814 = vmatprep.mubr.msk.f32.mxu1 %vm2031_vm3, %v6111_v30 }
 0x63c   :  { %v1528_v44 = vpop.f32.mrb[10].mxu1 }
 0x63d   :  { %v1530_v49 = vpop.f32.mrb[11].mxu1  ;;  %v1691_v0 = vmax.f32 %v1528_v44, 0.0 }
 0x63e   :  { %v1692_v41 = vmax.f32 %v1530_v49, 0.0 }
 0x640   :  { %v1534_v23 = vpop.f32.mrb[12].mxu1 }
 0x641   :  { %v1696_v42 = vmax.f32 %v1534_v23, 0.0  ;;  %v1536_v32 = vpop.f32.mrb[13].mxu1 }
 0x642   :  { %v1697_v37 = vmax.f32 %v1536_v32, 0.0 }
 0x643   :  { %v4082_v48 = vpack.c.bf16 %v1696_v42, %v1691_v0 }
 0x644   :  { %v4080_v20 = vpack.c.bf16 %v1697_v37, %v1692_v41 }
 0x646   :  { %4081 = vmatprep.subr.bf16.mxu0 %v4080_v20 }
 0x647   :  { %4083 = vmatpush1.bf16.msra.mxu0 %v4082_v48 }
 0x648   :  { %v1605_v55 = vpop.f32.mrb[8].mxu0 }
 0x649   :  { %v1693_v45 = vmax.f32 %v1605_v55, 0.0  ;;  %v1607_v43 = vpop.f32.mrb[9].mxu0 }
 0x64a   :  { %v1694_v51 = vmax.f32 %v1607_v43, 0.0 }
 0x64b   :  { %v4719_v36 = vpack.i.bf16 %v1693_v45, %v1692_v41 }
 0x64c   :  { %v1611_v35 = vpop.f32.mrb[10].mxu0  ;;  %v4754_v1 = vpack.i.bf16 %v1694_v51, %v1691_v0 }
 0x64d   :  { %v1698_v50 = vmax.f32 %v1611_v35, 0.0  ;;  %v1613_v56 = vpop.f32.mrb[11].mxu0  ;;  %4720 = vrot.lane.b32.xlu0 %v4719_v36, %s5165_s0  ;;  %4715 = vrot.lane.b32.xlu1 %v4719_v36, %s5153_s26 }
 0x64e   :  { %v1699_v46 = vmax.f32 %v1613_v56, 0.0  ;;  %v3950_v14 = vpop.f32.mrb[14].mxu1 }
 0x64f   :  { %v4118_v4 = vpack.c.bf16 %v1698_v50, %v1693_v45  ;;  %v1700_v10 = vmax.f32 %v3950_v14, 0.0  ;;  %v1682_v28 = vpop.f32.mrb[15].mxu1  ;;  %v4779_v6 = vpack.i.bf16 %v1698_v50, %v1697_v37 }
 0x650   :  { %v4116_v54 = vpack.c.bf16 %v1699_v46, %v1694_v51  ;;  %v1695_v53 = vmax.f32 %v1682_v28, 0.0 }
 0x651   :  { %4730 = vrot.lane.b32.xlu0 %v4719_v36, %s5159_s11  ;;  %4725 = vrot.lane.b32.xlu1 %v4719_v36, %s5157_s30  ;;  %v4814_v15 = vpack.i.bf16 %v1700_v10, %v1699_v46 }
 0x652   :  { %4117 = vmatprep.subr.bf16.mxu1 %v4116_v54  ;;  %v4839_v63 = vpack.i.bf16 %v1696_v42, %v1695_v53  ;;  %v6076_v21 = vpack.c.bf16 %v1700_v10, %v1695_v53 }
 0x653   :  { %4119 = vmatpush1.bf16.msra.mxu1 %v4118_v4 }
 0x655   :  { %4740 = vrot.lane.b32.xlu0 %v4719_v36, %s5163_s6  ;;  %4735 = vrot.lane.b32.xlu1 %v4719_v36, %s5166_s27 }
 0x659   :  { %4755 = vrot.lane.b32.xlu0 %v4754_v1, %s5165_s0  ;;  %4745 = vrot.lane.b32.xlu1 %v4719_v36, %s5162_s24 }
 0x65d   :  { %4765 = vrot.lane.b32.xlu0 %v4754_v1, %s5159_s11  ;;  %4750 = vrot.lane.b32.xlu1 %v4754_v1, %s5153_s26 }
 0x661   :  { %4775 = vrot.lane.b32.xlu0 %v4754_v1, %s5163_s6  ;;  %4760 = vrot.lane.b32.xlu1 %v4754_v1, %s5157_s30 }
 0x665   :  { %4770 = vrot.lane.b32.xlu1 %v4754_v1, %s5166_s27  ;;  %4780 = vrot.lane.b32.xlu0 %v4779_v6, %s5153_s26 }
 0x669   :  { %4785 = vrot.lane.b32.xlu1 %v4779_v6, %s5165_s0  ;;  %4790 = vrot.lane.b32.xlu0 %v4779_v6, %s5157_s30 }
 0x66d   :  { %4795 = vrot.lane.b32.xlu1 %v4779_v6, %s5159_s11  ;;  %4800 = vrot.lane.b32.xlu0 %v4779_v6, %s5166_s27 }
 0x671   :  { %4805 = vrot.lane.b32.xlu1 %v4779_v6, %s5163_s6  ;;  %4815 = vrot.lane.b32.xlu0 %v4814_v15, %s5165_s0 }
 0x675   :  { %4825 = vrot.lane.b32.xlu0 %v4814_v15, %s5159_s11  ;;  %4810 = vrot.lane.b32.xlu1 %v4814_v15, %s5153_s26 }
 0x679   :  { %4835 = vrot.lane.b32.xlu0 %v4814_v15, %s5163_s6  ;;  %4820 = vrot.lane.b32.xlu1 %v4814_v15, %s5157_s30 }
 0x67d   :  { %4830 = vrot.lane.b32.xlu1 %v4814_v15, %s5166_s27  ;;  %4840 = vrot.lane.b32.xlu0 %v4839_v63, %s5153_s26 }
 0x681   :  { %4850 = vrot.lane.b32.xlu1 %v4839_v63, %s5165_s0  ;;  %4845 = vrot.lane.b32.xlu0 %v4779_v6, %s5162_s24 }
 0x685   :  { %4855 = vrot.lane.b32.xlu1 %v4754_v1, %s5162_s24  ;;  %4860 = vrot.lane.b32.xlu0 %v4839_v63, %s5157_s30 }
 0x689   :  { %4865 = vrot.lane.b32.xlu1 %v4839_v63, %s5159_s11  ;;  %4875 = vrot.lane.b32.xlu0 %v4719_v36, %s5164_s25 }
 0x68d   :  { %4870 = vrot.lane.b32.xlu1 %v4814_v15, %s5162_s24  ;;  %4880 = vrot.lane.b32.xlu0 %v4839_v63, %s5166_s27 }
 0x691   :  { %4885 = vrot.lane.b32.xlu1 %v4839_v63, %s5163_s6  ;;  %4895 = vrot.lane.b32.xlu0 %v4754_v1, %s5164_s25 }
 0x695   :  { %4890 = vrot.lane.b32.xlu1 %v4779_v6, %s5164_s25  ;;  %4900 = vrot.lane.b32.xlu0 %v4839_v63, %s5162_s24 }
 0x699   :  { %4905 = vrot.lane.b32.xlu1 %v4839_v63, %s5164_s25  ;;  %4910 = vrot.lane.b32.xlu0 %v4814_v15, %s5164_s25 }
 0x69d   :  { %2023 = vperm.xlu1 %4628, %v1705_v59   ;;  %2028 = vperm.xlu0 %4532, %v1706_v31  }
 0x6bf   :  { %v4721_v62 = vpop.permute.xlu0 %4720  ;;  %v6127_v16 = vpop.permute.xlu1 %4715 }
 0x6c0   :  { %v4718_v47 = vunpack.i.h.bf16 %v6127_v16  ;;  %v4717_v40 = vunpack.i.l.bf16 %v6127_v16  ;;  %v4723_v41 = vunpack.i.h.bf16 %v4721_v62  ;;  %v4722_v23 = vunpack.i.l.bf16 %v4721_v62 }
 0x6c2   :  { %v1738_v52 = vsel %vm165_vm1, %v4717_v40, %v4718_v47  ;;  %v6192_v46 = vsel %vm1309_vm13, %v4722_v23, %v4723_v41 }
 0x6c3   :  { %v6129_v33 = vpop.permute.xlu0 %4730  ;;  %v6131_v7 = vpop.permute.xlu1 %4725 }
 0x6c4   :  { %v4728_v42 = vunpack.i.h.bf16 %v6131_v7  ;;  %v4727_v32 = vunpack.i.l.bf16 %v6131_v7  ;;  %v4733_v37 = vunpack.i.h.bf16 %v6129_v33  ;;  %v4732_v48 = vunpack.i.l.bf16 %v6129_v33 }
 0x6c6   :  { %v6195_v14 = vsel %vm373_vm5, %v4727_v32, %v4728_v42  ;;  %v6201_v6 = vsel %vm475_vm7, %v4732_v48, %v4733_v37 }
 0x6c7   :  { %v6133_v2 = vpop.permute.xlu0 %4740  ;;  %v6135_v25 = vpop.permute.xlu1 %4735 }
 0x6c8   :  { %v7055_v20 = vunpack.i.h.bf16 %v6135_v25  ;;  %v4737_v55 = vunpack.i.l.bf16 %v6135_v25  ;;  %v4743_v45 = vunpack.i.h.bf16 %v6133_v2  ;;  %v4742_v43 = vunpack.i.l.bf16 %v6133_v2 }
 0x6ca   :  { %v6209_v63 = vsel %vm1376_vm14, %v4737_v55, %v7055_v20  ;;  %v6225_v7 = vsel %vm1399_vm0, %v4742_v43, %v4743_v45 }
 0x6cb   :  { %v6137_v26 = vpop.permute.xlu0 %4755  ;;  %v6139_v38 = vpop.permute.xlu1 %4745 }
 0x6cc   :  { %v7058_v51 = vunpack.i.h.bf16 %v6137_v26  ;;  %v4757_v36 = vunpack.i.l.bf16 %v6137_v26  ;;  %v7054_v50 = vunpack.i.h.bf16 %v6139_v38  ;;  %v7053_v56 = vunpack.i.l.bf16 %v6139_v38 }
 0x6ce   :  { %v6212_v59 = vsel %vm1309_vm13, %v4757_v36, %v4722_v23  ;;  %v6217_v31 = vsel %vm1309_vm13, %v4723_v41, %v7058_v51 }
 0x6cf   :  { %v6141_v39 = vpop.permute.xlu0 %4765  ;;  %v6143_v8 = vpop.permute.xlu1 %4750 }
 0x6d0   :  { %v7056_v4 = vunpack.i.h.bf16 %v6141_v39  ;;  %v4767_v10 = vunpack.i.l.bf16 %v6141_v39  ;;  %v4752_v28 = vunpack.i.l.bf16 %v6143_v8  ;;  %v4753_v54 = vunpack.i.h.bf16 %v6143_v8 }
 0x6d2   :  { %v6243_v41 = vsel %vm475_vm7, %v4733_v37, %v7056_v4  ;;  %v1737_v23 = vsel %vm165_vm1, %v4752_v28, %v4717_v40 }
 0x6d3   :  { %v6145_v34 = vpop.permute.xlu0 %4775  ;;  %v6147_v5 = vpop.permute.xlu1 %4760 }
 0x6d4   :  { %v7052_v53 = vunpack.i.h.bf16 %v6145_v34  ;;  %v4777_v15 = vunpack.i.l.bf16 %v6145_v34  ;;  %v4762_v62 = vunpack.i.l.bf16 %v6147_v5  ;;  %v7057_v2 = vunpack.i.h.bf16 %v6147_v5 }
 0x6d6   :  { %v6249_v12 = vsel %vm1399_vm0, %v4777_v15, %v4742_v43  ;;  %v6254_v3 = vsel %vm1399_vm0, %v4743_v45, %v7052_v53  ;;  %v6270_v45 = vsel %vm373_vm5, %v4728_v42, %v7057_v2 }
 0x6d7   :  { %v6151_v27 = vpop.permute.xlu1 %4770  ;;  %v6153_v29 = vpop.permute.xlu0 %4780 }
 0x6d8   :  { %v4783_v60 = vunpack.i.h.bf16 %v6153_v29  ;;  %v4782_v18 = vunpack.i.l.bf16 %v6153_v29  ;;  %v4772_v37 = vunpack.i.l.bf16 %v6151_v27 }
 0x6da   :  { %v1742_v9 = vsel %vm165_vm1, %v4782_v18, %v4783_v60  ;;  %v6292_v51 = vsel %vm1376_vm14, %v4772_v37, %v4737_v55 }
 0x6db   :  { %v6163_v57 = vpop.permute.xlu1 %4785  ;;  %v6165_v19 = vpop.permute.xlu0 %4790  ;;  %v4084_v61 = vpack.c.bf16 %v1742_v9, %v1738_v52  ;;  %v6235_v9 = vsel %vm1422_vm15, %v7053_v56, %v7054_v50 }
 0x6dc   :  { %v4788_v8 = vunpack.i.h.bf16 %v6163_v57  ;;  %v4787_v52 = vunpack.i.l.bf16 %v6163_v57  ;;  %v1739_v57 = vsel %vm165_vm1, %v4718_v47, %v4753_v54  ;;  %v4793_v40 = vunpack.i.h.bf16 %v6165_v19 }
 0x6dd   :  { %4085 = vmatprep.subr.bf16.mxu0 %v4084_v61  ;;  %v6238_v61 = vsel %vm475_vm7, %v4767_v10, %v4732_v48  ;;  %v6258_v10 = vsel %vm373_vm5, %v4762_v62, %v4727_v32  ;;  %v4792_v28 = vunpack.i.l.bf16 %v6165_v19 }
 0x6de   :  { %v1780_v62 = vsel %vm1309_vm13, %v4787_v52, %v4788_v8 }
 0x6df   :  { %v6167_v24 = vpop.permute.xlu1 %4795  ;;  %v6169_v44 = vpop.permute.xlu0 %4800  ;;  %v1818_v29 = vsel %vm373_vm5, %v4792_v28, %v4793_v40 }
 0x6e0   :  { %v4798_v53 = vunpack.i.h.bf16 %v6167_v24  ;;  %v4802_v55 = vunpack.i.l.bf16 %v6169_v44  ;;  %v7066_v37 = vunpack.i.l.bf16 %v6167_v24 }
 0x6e3   :  { %v6171_v49 = vpop.permute.xlu1 %4805  ;;  %v6173_v0 = vpop.permute.xlu0 %4815 }
 0x6e4   :  { %v4817_v19 = vunpack.i.l.bf16 %v6173_v0 }
 0x6e7   :  { %v6185_v35 = vpop.permute.xlu0 %4825  ;;  %v6187_v1 = vpop.permute.xlu1 %4810 }
 0x6e8   :  { %v4812_v36 = vunpack.i.l.bf16 %v6187_v1  ;;  %v4813_v48 = vunpack.i.h.bf16 %v6187_v1 }
 0x6ea   :  { %v1743_v50 = vsel %vm165_vm1, %v4783_v60, %v4812_v36  ;;  %v1744_v2 = vsel %vm165_vm1, %v4812_v36, %v4813_v48  ;;  %v4803_v36 = vunpack.i.h.bf16 %v6169_v44 }
 0x6eb   :  { %v6220_v16 = vpop.permute.xlu0 %4835  ;;  %v6222_v33 = vpop.permute.xlu1 %4820 }
 0x6ec   :  { %v7078_v1 = vunpack.i.h.bf16 %v6222_v33 }
 0x6ef   :  { %v6263_v47 = vpop.permute.xlu1 %4830  ;;  %v6265_v43 = vpop.permute.xlu0 %4840 }
 0x6f0   :  { %v4843_v15 = vunpack.i.h.bf16 %v6265_v43  ;;  %v7060_v32 = vunpack.i.l.bf16 %v6265_v43 }
 0x6f2   :  { %v1741_v42 = vsel %vm165_vm1, %v4843_v15, %v4782_v18  ;;  %v1740_v4 = vsel %vm165_vm1, %v4753_v54, %v7060_v32  ;;  %v4122_v18 = vpack.c.bf16 %v1743_v50, %v1739_v57  ;;  %v4088_v32 = vpack.c.bf16 %v1780_v62, %v6192_v46 }
 0x6f3   :  { %v4086_v56 = vpack.c.bf16 %v1741_v42, %v1737_v23  ;;  %v6294_v58 = vpop.permute.xlu1 %4850  ;;  %v6296_v60 = vpop.permute.xlu0 %4845  ;;  %v4120_v20 = vpack.c.bf16 %v1744_v2, %v1740_v4  ;;  %v1781_v23 = vsel %vm1309_vm13, %v4788_v8, %v4817_v19  ;;  %v1856_v4 = vsel %vm475_vm7, %v7066_v37, %v4798_v53 }
 0x6f4   :  { %v4853_v15 = vunpack.i.h.bf16 %v6294_v58  ;;  %v4852_v54 = vunpack.i.l.bf16 %v6294_v58  ;;  %v4822_v50 = vunpack.i.l.bf16 %v6222_v33  ;;  %v7067_v46 = vunpack.i.h.bf16 %v6137_v26 }
 0x6f5   :  { %4087 = vmatpush1.bf16.msra.mxu0 %v4086_v56  ;;  %4121 = vmatprep.subr.bf16.mxu1 %v4120_v20  ;;  %v7068_v8 = vunpack.i.h.bf16 %v6173_v0  ;;  %v7061_v56 = vunpack.i.h.bf16 %v6185_v35  ;;  %v4827_v62 = vunpack.i.l.bf16 %v6185_v35 }
 0x6f6   :  { %v1779_v2 = vsel %vm1309_vm13, %v4853_v15, %v4787_v52  ;;  %4089 = vmatprep.subr.bf16.mxu0 %v4088_v32  ;;  %4123 = vmatpush1.bf16.msra.mxu1 %v4122_v18  ;;  %v1778_v57 = vsel %vm1309_vm13, %v7067_v46, %v4852_v54  ;;  %v7062_v18 = vunpack.i.h.bf16 %v6222_v33  ;;  %v4092_v46 = vpack.c.bf16 %v1818_v29, %v6195_v14 }
 0x6f7   :  { %v1782_v20 = vsel %vm1309_vm13, %v4817_v19, %v7068_v8  ;;  %v4090_v42 = vpack.c.bf16 %v1779_v2, %v6212_v59  ;;  %v6321_v37 = vpop.permute.xlu1 %4855  ;;  %v6323_v52 = vpop.permute.xlu0 %4860  ;;  %v4773_v19 = vunpack.i.h.bf16 %v6151_v27  ;;  %v4126_v8 = vpack.c.bf16 %v1781_v23, %v6217_v31 }
 0x6f8   :  { %v4124_v32 = vpack.c.bf16 %v1782_v20, %v1778_v57  ;;  %v4863_v26 = vunpack.i.h.bf16 %v6323_v52  ;;  %v4862_v15 = vunpack.i.l.bf16 %v6323_v52  ;;  %v4096_v59 = vpack.c.bf16 %v1856_v4, %v6201_v6 }
 0x6f9   :  { %4091 = vmatpush1.bf16.msra.mxu0 %v4090_v42  ;;  %v1894_v2 = vsel %vm1376_vm14, %v4802_v55, %v4803_v36  ;;  %v4808_v57 = vunpack.i.h.bf16 %v6171_v49  ;;  %v4807_v20 = vunpack.i.l.bf16 %v6171_v49  ;;  %v1819_v14 = vsel %vm373_vm5, %v4793_v40, %v4822_v50 }
 0x6fa   :  { %4125 = vmatprep.subr.bf16.mxu1 %v4124_v32  ;;  %v1817_v27 = vsel %vm373_vm5, %v4863_v26, %v4792_v28  ;;  %4093 = vmatprep.subr.bf16.mxu0 %v4092_v46  ;;  %v1857_v31 = vsel %vm475_vm7, %v4798_v53, %v4827_v62  ;;  %v7069_v4 = vunpack.i.h.bf16 %v6147_v5  ;;  %v1858_v40 = vsel %vm475_vm7, %v4827_v62, %v7061_v56 }
 0x6fb   :  { %v4094_v29 = vpack.c.bf16 %v1817_v27, %v6258_v10  ;;  %4127 = vmatpush1.bf16.msra.mxu1 %v4126_v8  ;;  %v6343_v6 = vpop.permute.xlu1 %4865  ;;  %v6345_v23 = vpop.permute.xlu0 %4875  ;;  %v4837_v28 = vunpack.i.l.bf16 %v6220_v16  ;;  %v1820_v32 = vsel %vm373_vm5, %v4822_v50, %v7062_v18  ;;  %v4130_v26 = vpack.c.bf16 %v1819_v14, %v6270_v45 }
 0x6fc   :  { %v1816_v42 = vsel %vm373_vm5, %v7069_v4, %v4862_v15  ;;  %v4868_v53 = vunpack.i.h.bf16 %v6343_v6  ;;  %v4867_v10 = vunpack.i.l.bf16 %v6343_v6  ;;  %v4833_v5 = vunpack.i.h.bf16 %v6263_v47 }
 0x6fd   :  { %v4832_v46 = vunpack.i.l.bf16 %v6263_v47  ;;  %4095 = vmatpush1.bf16.msra.mxu0 %v4094_v29  ;;  %v4128_v8 = vpack.c.bf16 %v1820_v32, %v1816_v42  ;;  %v4848_v62 = vunpack.i.h.bf16 %v6296_v60  ;;  %v4847_v27 = vunpack.i.l.bf16 %v6296_v60 }
 0x6fe   :  { %v7070_v4 = vunpack.i.l.bf16 %v6167_v24  ;;  %4097 = vmatprep.subr.bf16.mxu0 %v4096_v59  ;;  %v7071_v50 = vunpack.i.h.bf16 %v6141_v39  ;;  %v7072_v14 = vunpack.i.h.bf16 %v6135_v25  ;;  %v4100_v59 = vpack.c.bf16 %v1894_v2, %v6209_v63 }
 0x6ff   :  { %4129 = vmatprep.subr.bf16.mxu1 %v4128_v8  ;;  %v6378_v32 = vpop.permute.xlu1 %4870  ;;  %v6380_v18 = vpop.permute.xlu0 %4880  ;;  %v1932_v25 = vsel %vm1399_vm0, %v4807_v20, %v4808_v57  ;;  %v7075_v49 = vunpack.i.h.bf16 %v6145_v34 }
 0x700   :  { %v1855_v56 = vsel %vm475_vm7, %v4868_v53, %v7070_v4  ;;  %v1854_v45 = vsel %vm475_vm7, %v7071_v50, %v4867_v10  ;;  %v1891_v29 = vsel %vm1376_vm14, %v7072_v14, %v4773_v19  ;;  %v4838_v53 = vunpack.i.h.bf16 %v6220_v16  ;;  %4131 = vmatpush1.bf16.msra.mxu1 %v4130_v26 }
 0x701   :  { %v4098_v42 = vpack.c.bf16 %v1855_v56, %v6238_v61  ;;  %v4132_v24 = vpack.c.bf16 %v1858_v40, %v1854_v45  ;;  %v4883_v39 = vunpack.i.h.bf16 %v6380_v18  ;;  %v4882_v4 = vunpack.i.l.bf16 %v6380_v18 }
 0x702   :  { %v4134_v61 = vpack.c.bf16 %v1857_v31, %v6243_v41  ;;  %v1933_v56 = vsel %vm1399_vm0, %v4808_v57, %v4837_v28  ;;  %v1895_v40 = vsel %vm1376_vm14, %v4803_v36, %v4832_v46  ;;  %v1896_v41 = vsel %vm1376_vm14, %v4832_v46, %v4833_v5 }
 0x703   :  { %4099 = vmatpush1.bf16.msra.mxu0 %v4098_v42  ;;  %4133 = vmatprep.subr.bf16.mxu1 %v4132_v24  ;;  %v1893_v63 = vsel %vm1376_vm14, %v4883_v39, %v4802_v55  ;;  %v1892_v2 = vsel %vm1376_vm14, %v4773_v19, %v4882_v4  ;;  %v1970_v57 = vsel %vm1422_vm15, %v4847_v27, %v4848_v62  ;;  %v4858_v36 = vunpack.i.h.bf16 %v6321_v37  ;;  %v6409_v55 = vpop.permute.xlu1 %4885  ;;  %v4896_v26 = vpop.permute.xlu0 %4895 }
 0x704   :  { %4101 = vmatprep.subr.bf16.mxu0 %v4100_v59  ;;  %v4857_v31 = vunpack.i.l.bf16 %v6321_v37  ;;  %v4102_v44 = vpack.c.bf16 %v1893_v63, %v6292_v51  ;;  %v4136_v8 = vpack.c.bf16 %v1896_v41, %v1892_v2  ;;  %4135 = vmatpush1.bf16.msra.mxu1 %v4134_v61  ;;  %v4888_v19 = vunpack.i.h.bf16 %v6409_v55 }
 0x705   :  { %v4887_v50 = vunpack.i.l.bf16 %v6409_v55  ;;  %v4104_v46 = vpack.c.bf16 %v1932_v25, %v6225_v7  ;;  %v1934_v45 = vsel %vm1399_vm0, %v4837_v28, %v4838_v53  ;;  %v4878_v14 = vunpack.i.h.bf16 %v6345_v23 }
 0x706   :  { %v4877_v37 = vunpack.i.l.bf16 %v6345_v23  ;;  %v4873_v51 = vunpack.i.h.bf16 %v6378_v32  ;;  %v4872_v42 = vunpack.i.l.bf16 %v6378_v32  ;;  %4137 = vmatprep.subr.bf16.mxu1 %v4136_v8  ;;  %v4142_v24 = vpack.c.bf16 %v1933_v56, %v6254_v3 }
 0x707   :  { %4103 = vmatpush1.bf16.msra.mxu0 %v4102_v44  ;;  %v4138_v59 = vpack.c.bf16 %v1895_v40, %v1891_v29  ;;  %v1931_v7 = vsel %vm1399_vm0, %v4888_v19, %v4807_v20  ;;  %v4108_v28 = vpack.c.bf16 %v1970_v57, %v6235_v9  ;;  %v7073_v39 = vunpack.i.h.bf16 %v6139_v38  ;;  %v4891_v2 = vpop.permute.xlu1 %4890  ;;  %v6433_v3 = vpop.permute.xlu0 %4900 }
 0x708   :  { %4105 = vmatprep.subr.bf16.mxu0 %v4104_v46  ;;  %v7074_v25 = vunpack.i.l.bf16 %v6139_v38  ;;  %v4106_v63 = vpack.c.bf16 %v1931_v7, %v6249_v12  ;;  %v1930_v20 = vsel %vm1399_vm0, %v7075_v49, %v4887_v50  ;;  %v4893_v9 = vunpack.i.h.bf16 %v4891_v2 }
 0x709   :  { %v1967_v23 = vsel %vm1422_vm15, %v7073_v39, %v4858_v36  ;;  %4139 = vmatpush1.bf16.msra.mxu1 %v4138_v59  ;;  %v4892_v29 = vunpack.i.l.bf16 %v4891_v2  ;;  %v4903_v56 = vunpack.i.h.bf16 %v6433_v3  ;;  %v4902_v38 = vunpack.i.l.bf16 %v6433_v3 }
 0x70a   :  { %v1965_v61 = vsel %vm1422_vm15, %v4857_v31, %v7074_v25  ;;  %v1971_v40 = vsel %vm1422_vm15, %v4848_v62, %v4872_v42  ;;  %v4140_v12 = vpack.c.bf16 %v1934_v45, %v1930_v20  ;;  %v1972_v41 = vsel %vm1422_vm15, %v4872_v42, %v4873_v51 }
 0x70b   :  { %4107 = vmatpush1.bf16.msra.mxu0 %v4106_v63  ;;  %v2004_v57 = vsel %vm1445_vm2, %v4877_v37, %v4878_v14  ;;  %v4897_v34 = vunpack.i.l.bf16 %v4896_v26  ;;  %v1969_v31 = vsel %vm1422_vm15, %v4903_v56, %v4847_v27  ;;  %v1968_v44 = vsel %vm1422_vm15, %v4858_v36, %v4902_v38  ;;  %v4906_v46 = vpop.permute.xlu1 %4905  ;;  %v4911_v45 = vpop.permute.xlu0 %4910 }
 0x70c   :  { %4109 = vmatprep.subr.bf16.mxu0 %v4108_v28  ;;  %v2008_v62 = vsel %vm1445_vm2, %v4892_v29, %v4893_v9  ;;  %v4898_v8 = vunpack.i.h.bf16 %v4896_v26  ;;  %v4110_v19 = vpack.c.bf16 %v1969_v31, %v1965_v61  ;;  %4141 = vmatprep.subr.bf16.mxu1 %v4140_v12  ;;  %v4144_v42 = vpack.c.bf16 %v1972_v41, %v1968_v44 }
 0x70d   :  { %v4112_v59 = vpack.c.bf16 %v2008_v62, %v2004_v57  ;;  %4143 = vmatpush1.bf16.msra.mxu1 %v4142_v24  ;;  %v4908_v7 = vunpack.i.h.bf16 %v4906_v46  ;;  %v4907_v39 = vunpack.i.l.bf16 %v4906_v46  ;;  %v4913_v60 = vunpack.i.h.bf16 %v4911_v45 }
 0x70e   :  { %v4912_v25 = vunpack.i.l.bf16 %v4911_v45  ;;  %v4146_v27 = vpack.c.bf16 %v1971_v40, %v1967_v23  ;;  %4145 = vmatprep.subr.bf16.mxu1 %v4144_v42  ;;  %v2003_v28 = vsel %vm1445_vm2, %v4897_v34, %v4877_v37  ;;  %v2005_v63 = vsel %vm1445_vm2, %v4878_v14, %v4898_v8  ;;  %v1701_v37 = vld [vmem:[%s7041_s2 + $0x60] sm:$0xff]  ;;  %v1703_v14 = vld [vmem:[%s7041_s2 + $0x70] sm:$0xff] }
 0x70f   :  { %4111 = vmatpush1.bf16.msra.mxu0 %v4110_v19  ;;  %v2007_v36 = vsel %vm1445_vm2, %v4908_v7, %v4892_v29  ;;  %v2006_v61 = vsel %vm1445_vm2, %v4898_v8, %v4907_v39  ;;  %v5167_v23 = vmov 0.0|0.0   ;;  %v7076_v29 = vunpack.i.l.bf16 %v6265_v43 }
 0x710   :  { %v2009_v26 = vsel %vm1445_vm2, %v4893_v9, %v4912_v25  ;;  %4113 = vmatprep.subr.bf16.mxu0 %v4112_v59  ;;  %v4114_v2 = vpack.c.bf16 %v2007_v36, %v2003_v28  ;;  %v2010_v24 = vsel %vm1445_vm2, %v4912_v25, %v4913_v60  ;;  %v1704_v9 = vld [vmem:[%s7041_s2 + $0x78] sm:$0xff]  ;;  %v4171_v33 = vpack.c.bf16 %v4838_v53, %v4887_v50 }
 0x711   :  { %v4150_v49 = vpack.c.bf16 %v2009_v26, %v2005_v63  ;;  %4147 = vmatpush1.bf16.msra.mxu1 %v4146_v27  ;;  %v4148_v20 = vpack.c.bf16 %v2010_v24, %v2006_v61  ;;  %v4156_v56 = vpack.c.bf16 %v4813_v48, %v7076_v29  ;;  %v4162_v48 = vpack.c.bf16 %v7078_v1, %v4862_v15 }
 0x712   :  { %v4177_v47 = vpack.c.bf16 %v4913_v60, %v4907_v39 }
 0x713   :  { %4115 = vmatpush1.bf16.msra.mxu0 %v4114_v2  ;;  %4149 = vmatprep.subr.bf16.mxu1 %v4148_v20 }
 0x714   :  { %4152 = vmatprep.subr.bf16.mxu0 %v5167_v23 }
 0x715   :  { %4151 = vmatpush1.bf16.msra.mxu1 %v4150_v49 }
 0x716   :  { %2103 = vmatmul.mubr.f32.vlgmr.msra.gmra.mrb[12].mxu0 %v1701_v37 }
 0x717   :  { %4154 = vmatpush1.bf16.msra.mxu0 %v6076_v21  ;;  %3813 = vmatprep.mubr.msk.f32.mxu0 %vm2031_vm3, %v1704_v9  ;;  %v7077_v21 = vunpack.i.h.bf16 %v6173_v0  ;;  %v4168_v0 = vpack.c.bf16 %v4833_v5, %v4882_v4 }
 0x718   :  { %4155 = vmatprep.subr.bf16.mxu0 %v5167_v23  ;;  %2180 = vmatmul.mubr.f32.vlgmr.msra.gmra.mrb[16].mxu1 %v1701_v37 }
 0x719   :  { %3815 = vmatprep.mubr.msk.f32.mxu1 %vm2031_vm3, %v1704_v9  ;;  %v4159_v40 = vpack.c.bf16 %v7077_v21, %v4852_v54 }
 0x71a   :  { %2109 = vmatmul.mubr.f32.gmra.mrb[14].mxu0 %v1703_v14 }
 0x71b   :  { %4157 = vmatpush1.bf16.msra.mxu0 %v4156_v56  ;;  %3816 = vmatprep.mubr.msk.f32.mxu0 %vm2031_vm3, %v6111_v30  ;;  %v7079_v30 = vunpack.i.h.bf16 %v6185_v35  ;;  %v4174_v35 = vpack.c.bf16 %v4873_v51, %v4902_v38 }
 0x71c   :  { %4158 = vmatprep.subr.bf16.mxu0 %v5167_v23  ;;  %2186 = vmatmul.mubr.f32.gmra.mrb[18].mxu1 %v1703_v14  ;;  %v2024_v16 = vpop.permute.xlu1 %2023  ;;  %v2029_v18 = vpop.permute.xlu0 %2028 }
 0x71d   :  { %v4165_v58 = vpack.c.bf16 %v7079_v30, %v4867_v10 }
 0x71f   :  { %4160 = vmatpush1.bf16.msra.mxu0 %v4159_v40 }
 0x720   :  { %4161 = vmatprep.subr.bf16.mxu0 %v5167_v23 }
 0x723   :  { %4163 = vmatpush1.bf16.msra.mxu0 %v4162_v48 }
 0x724   :  { %4164 = vmatprep.subr.bf16.mxu0 %v5167_v23 }
 0x727   :  { %4166 = vmatpush1.bf16.msra.mxu0 %v4165_v58 }
 0x728   :  { %4167 = vmatprep.subr.bf16.mxu0 %v5167_v23 }
 0x72b   :  { %4169 = vmatpush1.bf16.msra.mxu0 %v4168_v0 }
 0x72c   :  { %4170 = vmatprep.subr.bf16.mxu0 %v5167_v23 }
 0x72f   :  { %4172 = vmatpush1.bf16.msra.mxu0 %v4171_v33 }
 0x730   :  { %4173 = vmatprep.subr.bf16.mxu0 %v5167_v23 }
 0x733   :  { %4175 = vmatpush1.bf16.msra.mxu0 %v4174_v35 }
 0x734   :  { %4176 = vmatprep.subr.bf16.mxu0 %v5167_v23 }
 0x737   :  { %4178 = vmatpush1.bf16.msra.mxu0 %v4177_v47 }
 0x73a   :  { %2257 = vmatmul.mubr.f32.vlgmr.msra.gmra.mrb[16].mxu0 %v1701_v37  ;;  %v2278_v37 = vld [vmem:[%s7041_s2 + $0x88] sm:$0xff] }
 0x73b   :  { %3817 = vmatprep.mubr.msk.f32.mxu0 %vm2031_vm3, %v1704_v9  ;;  %3818 = vmatprep.mubr.msk.f32.mxu1 %vm2031_vm3, %v2278_v37 }
 0x73e   :  { %2262 = vmatmul.mubr.f32.gmra.mrb[18].mxu0 %v1703_v14 }
 0x73f   :  { %3822 = vmatprep.mubr.msk.f32.mxu0 %vm2031_vm3, %v2278_v37 }
 0x7e9   :  { %v2104_v43 = vpop.f32.mrb[12].mxu0 }
 0x7ea   :  { %v2106_v54 = vpop.f32.mrb[13].mxu0  ;;  %v2105_v15 = vadd.f32 %v2104_v43, %v2024_v16 }
 0x7eb   :  { %v2107_v52 = vadd.f32 %v2106_v54, %v2024_v16  ;;  %v2181_v6 = vpop.f32.mrb[16].mxu1 }
 0x7ec   :  { %v2182_v5 = vadd.f32 %v2181_v6, %v2024_v16  ;;  %v2183_v32 = vpop.f32.mrb[17].mxu1  ;;  %v2267_v38 = vmax.f32 %v2105_v15, 0.0 }
 0x7ed   :  { %v2268_v10 = vmax.f32 %v2107_v52, 0.0  ;;  %v2110_v53 = vpop.f32.mrb[14].mxu0  ;;  %v2184_v4 = vadd.f32 %v2183_v32, %v2024_v16 }
 0x7ee   :  { %v2111_v55 = vadd.f32 %v2110_v53, %v2029_v18  ;;  %v2112_v50 = vpop.f32.mrb[15].mxu0  ;;  %v2269_v51 = vmax.f32 %v2182_v5, 0.0 }
 0x7ef   :  { %v2113_v3 = vadd.f32 %v2112_v50, %v2029_v18  ;;  %v2270_v12 = vmax.f32 %v2184_v4, 0.0  ;;  %v2187_v57 = vpop.f32.mrb[18].mxu1 }
 0x7f0   :  { %v2272_v41 = vmax.f32 %v2111_v55, 0.0  ;;  %v2188_v31 = vadd.f32 %v2187_v57, %v2029_v18  ;;  %v2189_v44 = vpop.f32.mrb[19].mxu1  ;;  %v4939_v62 = vpack.i.bf16 %v2269_v51, %v2268_v10 }
 0x7f1   :  { %v2273_v34 = vmax.f32 %v2113_v3, 0.0  ;;  %v2190_v8 = vadd.f32 %v2189_v44, %v2029_v18 }
 0x7f2   :  { %v4919_v19 = vpack.i.bf16 %v2272_v41, %v2267_v38  ;;  %v4181_v46 = vpack.c.bf16 %v2272_v41, %v2267_v38  ;;  %v2274_v45 = vmax.f32 %v2188_v31, 0.0 }
 0x7f3   :  { %v4179_v42 = vpack.c.bf16 %v2273_v34, %v2268_v10  ;;  %v2275_v59 = vmax.f32 %v2190_v8, 0.0 }
 0x7f4   :  { %4920 = vrot.lane.b32.xlu0 %v4919_v19, %s5165_s0  ;;  %4915 = vrot.lane.b32.xlu1 %v4919_v19, %s5153_s26  ;;  %v4217_v7 = vpack.c.bf16 %v2274_v45, %v2269_v51  ;;  %v4969_v39 = vpack.i.bf16 %v2274_v45, %v2273_v34 }
 0x7f5   :  { %4180 = vmatprep.subr.bf16.mxu1 %v4179_v42  ;;  %v4215_v60 = vpack.c.bf16 %v2275_v59, %v2270_v12  ;;  %v5034_v25 = vpack.i.bf16 %v2275_v59, %v2270_v12 }
 0x7f6   :  { %4182 = vmatpush1.bf16.msra.mxu1 %v4181_v46 }
 0x7f7   :  { %4216 = vmatprep.subr.bf16.mxu0 %v4215_v60 }
 0x7f8   :  { %4930 = vrot.lane.b32.xlu0 %v4919_v19, %s5159_s11  ;;  %4218 = vmatpush1.bf16.msra.mxu0 %v4217_v7 }
 0x7f9   :  { %4925 = vrot.lane.b32.xlu1 %v4919_v19, %s5157_s30 }
 0x7fc   :  { %4935 = vrot.lane.b32.xlu0 %v4919_v19, %s5166_s27 }
 0x7fd   :  { %4940 = vrot.lane.b32.xlu1 %v4939_v62, %s5153_s26 }
 0x800   :  { %4945 = vrot.lane.b32.xlu0 %v4939_v62, %s5165_s0 }
 0x801   :  { %4950 = vrot.lane.b32.xlu1 %v4939_v62, %s5157_s30 }
 0x804   :  { %4955 = vrot.lane.b32.xlu0 %v4939_v62, %s5159_s11 }
 0x805   :  { %4960 = vrot.lane.b32.xlu1 %v4939_v62, %s5166_s27 }
 0x808   :  { %4970 = vrot.lane.b32.xlu0 %v4969_v39, %s5153_s26 }
 0x809   :  { %4965 = vrot.lane.b32.xlu1 %v4939_v62, %s5163_s6 }
 0x80c   :  { %4975 = vrot.lane.b32.xlu0 %v4919_v19, %s5163_s6 }
 0x80d   :  { %4980 = vrot.lane.b32.xlu1 %v4939_v62, %s5162_s24  ;;  %v2258_v27 = vpop.f32.mrb[16].mxu0 }
 0x80e   :  { %v2259_v28 = vadd.f32 %v2258_v27, %v2024_v16  ;;  %v2260_v36 = vpop.f32.mrb[17].mxu0 }
 0x810   :  { %v2271_v26 = vmax.f32 %v2259_v28, 0.0  ;;  %4990 = vrot.lane.b32.xlu0 %v4969_v39, %s5157_s30 }
 0x811   :  { %4985 = vrot.lane.b32.xlu1 %v4969_v39, %s5165_s0  ;;  %v2263_v61 = vpop.f32.mrb[18].mxu0 }
 0x812   :  { %v5069_v63 = vpack.i.bf16 %v2271_v26, %v2270_v12  ;;  %v2264_v2 = vadd.f32 %v2263_v61, %v2029_v18  ;;  %v2265_v24 = vpop.f32.mrb[19].mxu0 }
 0x814   :  { %v2276_v49 = vmax.f32 %v2264_v2, 0.0  ;;  %4995 = vrot.lane.b32.xlu0 %v4919_v19, %s5162_s24 }
 0x815   :  { %5000 = vrot.lane.b32.xlu1 %v4939_v62, %s5164_s25 }
 0x816   :  { %v5084_v20 = vpack.i.bf16 %v2276_v49, %v2275_v59 }
 0x818   :  { %5010 = vrot.lane.b32.xlu0 %v4969_v39, %s5166_s27 }
 0x819   :  { %5005 = vrot.lane.b32.xlu1 %v4969_v39, %s5159_s11 }
 0x81c   :  { %5015 = vrot.lane.b32.xlu0 %v4969_v39, %s5163_s6 }
 0x81d   :  { %5035 = vrot.lane.b32.xlu1 %v5034_v25, %s5153_s26 }
 0x820   :  { %5020 = vrot.lane.b32.xlu0 %v4969_v39, %s5162_s24 }
 0x821   :  { %5040 = vrot.lane.b32.xlu1 %v5034_v25, %s5165_s0 }
 0x824   :  { %5025 = vrot.lane.b32.xlu0 %v4969_v39, %s5164_s25 }
 0x825   :  { %5045 = vrot.lane.b32.xlu1 %v5034_v25, %s5157_s30 }
 0x828   :  { %5030 = vrot.lane.b32.xlu0 %v4919_v19, %s5164_s25 }
 0x829   :  { %5050 = vrot.lane.b32.xlu1 %v5034_v25, %s5159_s11  ;;  %s5171_s11 = smov [#allocation5]  }
 0x82c   :  { %5060 = vrot.lane.b32.xlu0 %v5069_v63, %s5163_s6 }
 0x82d   :  { %5055 = vrot.lane.b32.xlu1 %v5034_v25, %s5166_s27 }
 0x830   :  { %5065 = vrot.lane.b32.xlu0 %v5069_v63, %s5162_s24 }
 0x831   :  { %5075 = vrot.lane.b32.xlu1 %v5084_v20, %s5163_s6 }
 0x834   :  { %5070 = vrot.lane.b32.xlu0 %v5069_v63, %s5164_s25 }
 0x835   :  { %5080 = vrot.lane.b32.xlu1 %v5084_v20, %s5162_s24  ;;  %s3782_s24 = sshll.u32 %s5171_s11, 4  ;;  %s3783_s24 = int_to_ptr.vmem [resolvable:$true] %s3782_s24 }
 0x836   :  { %s5114_s6 = scalar_lea.vmem %s3783_s24, 32  ;;  %p5119_p9 = scmp.lt.s32.totalorder %s3783_s24, %s3783_s24 }
 0x837   :  { %p5115_p8 = scmp.ne.s32.totalorder %s3783_s24, %s5114_s6  ;;  %p5120_p10 = scmp.lt.s32.totalorder %s5114_s6, %s5114_s6 }
 0x839   :  { %5085 = vrot.lane.b32.xlu1 %v5084_v20, %s5164_s25  ;;  %p5121_p11 = por %p5120_p10, %p5119_p9 }
 0x83b   :  { %p5122_p12 = pnand %p5121_p11, %p5115_p8 }
 0x866   :  { %v4921_v9 = vpop.permute.xlu0 %4920  ;;  %v4916_v14 = vpop.permute.xlu1 %4915 }
 0x867   :  { %v4918_v47 = vunpack.i.h.bf16 %v4916_v14  ;;  %v4917_v43 = vunpack.i.l.bf16 %v4916_v14  ;;  %v4923_v3 = vunpack.i.h.bf16 %v4921_v9  ;;  %v4922_v38 = vunpack.i.l.bf16 %v4921_v9 }
 0x86a   :  { %v6552_v29 = vpop.permute.xlu0 %4930 }
 0x86b   :  { %v6554_v56 = vpop.permute.xlu1 %4925  ;;  %v4932_v28 = vunpack.i.l.bf16 %v6552_v29  ;;  %v4933_v20 = vunpack.i.h.bf16 %v6552_v29 }
 0x86c   :  { %v4928_v7 = vunpack.i.h.bf16 %v6554_v56  ;;  %v4927_v36 = vunpack.i.l.bf16 %v6554_v56 }
 0x86e   :  { %v6556_v21 = vpop.permute.xlu0 %4935 }
 0x86f   :  { %v6558_v40 = vpop.permute.xlu1 %4940  ;;  %v4938_v37 = vunpack.i.h.bf16 %v6556_v21  ;;  %v4937_v9 = vunpack.i.l.bf16 %v6556_v21 }
 0x870   :  { %v4943_v0 = vunpack.i.h.bf16 %v6558_v40  ;;  %v4942_v33 = vunpack.i.l.bf16 %v6558_v40 }
 0x872   :  { %v6560_v1 = vpop.permute.xlu0 %4945  ;;  %v2309_v18 = vsel %vm165_vm1, %v4917_v43, %v4942_v33  ;;  %v2310_v6 = vsel %vm165_vm1, %v4942_v33, %v4943_v0 }
 0x873   :  { %v6562_v48 = vpop.permute.xlu1 %4950  ;;  %v4947_v55 = vunpack.i.l.bf16 %v6560_v1  ;;  %v4948_v50 = vunpack.i.h.bf16 %v6560_v1 }
 0x874   :  { %v4953_v34 = vunpack.i.h.bf16 %v6562_v48  ;;  %v4952_v31 = vunpack.i.l.bf16 %v6562_v48 }
 0x875   :  { %v2339_v8 = vsel %vm1309_vm13, %v4922_v38, %v4947_v55  ;;  %v2340_v45 = vsel %vm1309_vm13, %v4947_v55, %v4948_v50 }
 0x876   :  { %v6564_v30 = vpop.permute.xlu0 %4955  ;;  %v2370_v61 = vsel %vm373_vm5, %v4952_v31, %v4953_v34  ;;  %v2369_v56 = vsel %vm373_vm5, %v4927_v36, %v4952_v31 }
 0x877   :  { %v6566_v58 = vpop.permute.xlu1 %4960  ;;  %v4957_v39 = vunpack.i.l.bf16 %v6564_v30  ;;  %v4958_v26 = vunpack.i.h.bf16 %v6564_v30 }
 0x878   :  { %v4963_v63 = vunpack.i.h.bf16 %v6566_v58  ;;  %v4962_v2 = vunpack.i.l.bf16 %v6566_v58 }
 0x879   :  { %v2399_v33 = vsel %vm475_vm7, %v4932_v28, %v4957_v39  ;;  %v2400_v21 = vsel %vm475_vm7, %v4957_v39, %v4958_v26 }
 0x87a   :  { %v6570_v35 = vpop.permute.xlu0 %4970 }
 0x87b   :  { %v4973_v16 = vunpack.i.h.bf16 %v6570_v35  ;;  %v4972_v54 = vunpack.i.l.bf16 %v6570_v35  ;;  %v6574_v52 = vpop.permute.xlu1 %4965 }
 0x87d   :  { %v2312_v15 = vsel %vm165_vm1, %v4918_v47, %v4972_v54  ;;  %v2313_v10 = vsel %vm165_vm1, %v4972_v54, %v4973_v16 }
 0x87e   :  { %v4185_v5 = vpack.c.bf16 %v2312_v15, %v2309_v18  ;;  %v6584_v32 = vpop.permute.xlu0 %4975  ;;  %v4183_v53 = vpack.c.bf16 %v2313_v10, %v2310_v6  ;;  %v2429_v6 = vsel %vm1376_vm14, %v4937_v9, %v4962_v2  ;;  %v4968_v10 = vunpack.i.h.bf16 %v6574_v52 }
 0x87f   :  { %v6586_v4 = vpop.permute.xlu1 %4980  ;;  %v4977_v55 = vunpack.i.l.bf16 %v6584_v32 }
 0x880   :  { %4184 = vmatprep.subr.bf16.mxu1 %v4183_v53  ;;  %v2430_v53 = vsel %vm1376_vm14, %v4962_v2, %v4963_v63 }
 0x881   :  { %4186 = vmatpush1.bf16.msra.mxu1 %v4185_v5  ;;  %v4967_v5 = vunpack.i.l.bf16 %v6574_v52 }
 0x882   :  { %v6590_v51 = vpop.permute.xlu0 %4990 }
 0x883   :  { %v4993_v12 = vunpack.i.h.bf16 %v6590_v51  ;;  %v4992_v41 = vunpack.i.l.bf16 %v6590_v51  ;;  %v6594_v57 = vpop.permute.xlu1 %4985 }
 0x884   :  { %v4988_v44 = vunpack.i.h.bf16 %v6594_v57  ;;  %v4987_v62 = vunpack.i.l.bf16 %v6594_v57 }
 0x885   :  { %v2373_v59 = vsel %vm373_vm5, %v4992_v41, %v4993_v12  ;;  %v2372_v24 = vsel %vm373_vm5, %v4928_v7, %v4992_v41  ;;  %v4982_v7 = vunpack.i.l.bf16 %v6586_v4 }
 0x886   :  { %v2342_v19 = vsel %vm1309_vm13, %v4923_v3, %v4987_v62  ;;  %v6602_v46 = vpop.permute.xlu0 %4995  ;;  %v2343_v42 = vsel %vm1309_vm13, %v4987_v62, %v4988_v44  ;;  %v4191_v49 = vpack.c.bf16 %v2373_v59, %v2370_v61  ;;  %v4193_v18 = vpack.c.bf16 %v2372_v24, %v2369_v56 }
 0x887   :  { %v4189_v60 = vpack.c.bf16 %v2342_v19, %v2339_v8  ;;  %v6615_v25 = vpop.permute.xlu1 %5000  ;;  %v4187_v27 = vpack.c.bf16 %v2343_v42, %v2340_v45  ;;  %v4983_v59 = vunpack.i.h.bf16 %v6586_v4  ;;  %v2466_v61 = vsel %vm1399_vm0, %v4967_v5, %v4968_v10 }
 0x888   :  { %v5002_v57 = vunpack.i.l.bf16 %v6615_v25 }
 0x889   :  { %4188 = vmatprep.subr.bf16.mxu1 %v4187_v27  ;;  %v4978_v27 = vunpack.i.h.bf16 %v6584_v32 }
 0x88a   :  { %4190 = vmatpush1.bf16.msra.mxu1 %v4189_v60  ;;  %v6629_v14 = vpop.permute.xlu0 %5010 }
 0x88b   :  { %v5013_v47 = vunpack.i.h.bf16 %v6629_v14  ;;  %v5012_v43 = vunpack.i.l.bf16 %v6629_v14  ;;  %v6635_v54 = vpop.permute.xlu1 %5005  ;;  %4192 = vmatprep.subr.bf16.mxu1 %v4191_v49  ;;  %v2280_v14 = vld [vmem:[%s7041_s2 + $0x98] sm:$0xff] }
 0x88c   :  { %v5008_v29 = vunpack.i.h.bf16 %v6635_v54  ;;  %v5007_v15 = vunpack.i.l.bf16 %v6635_v54 }
 0x88d   :  { %v2433_v31 = vsel %vm1376_vm14, %v5012_v43, %v5013_v47  ;;  %v2432_v28 = vsel %vm1376_vm14, %v4938_v37, %v5012_v43  ;;  %v2465_v37 = vsel %vm1399_vm0, %v4977_v55, %v4967_v5  ;;  %v2502_v43 = vsel %vm1422_vm15, %v4982_v7, %v4983_v59 }
 0x88e   :  { %v2402_v3 = vsel %vm475_vm7, %v4933_v20, %v5007_v15  ;;  %4194 = vmatpush1.bf16.msra.mxu1 %v4193_v18  ;;  %v6650_v38 = vpop.permute.xlu0 %5015  ;;  %v2403_v41 = vsel %vm475_vm7, %v5007_v15, %v5008_v29  ;;  %v4199_v36 = vpack.c.bf16 %v2433_v31, %v2430_v53  ;;  %v4201_v40 = vpack.c.bf16 %v2432_v28, %v2429_v6 }
 0x88f   :  { %v4197_v62 = vpack.c.bf16 %v2402_v3, %v2399_v33  ;;  %v5018_v8 = vunpack.i.h.bf16 %v6650_v38  ;;  %v5017_v19 = vunpack.i.l.bf16 %v6650_v38  ;;  %v5036_v45 = vpop.permute.xlu1 %5035  ;;  %v4195_v42 = vpack.c.bf16 %v2403_v41, %v2400_v21  ;;  %v2282_v38 = vld [vmem:[%s7041_s2 + $0xa8] sm:$0xff] }
 0x890   :  { %v5038_v39 = vunpack.i.h.bf16 %v5036_v45  ;;  %v5037_v60 = vunpack.i.l.bf16 %v5036_v45  ;;  %v4998_v18 = vunpack.i.h.bf16 %v6602_v46  ;;  %v4997_v15 = vunpack.i.l.bf16 %v6602_v46 }
 0x891   :  { %4196 = vmatprep.subr.bf16.mxu1 %v4195_v42  ;;  %v2470_v32 = vsel %vm1399_vm0, %v5017_v19, %v5018_v8  ;;  %v2469_v21 = vsel %vm1399_vm0, %v4978_v27, %v5017_v19  ;;  %v5003_v41 = vunpack.i.h.bf16 %v6615_v25 }
 0x892   :  { %v2314_v2 = vsel %vm165_vm1, %v4973_v16, %v5038_v39  ;;  %v2311_v24 = vsel %vm165_vm1, %v4943_v0, %v5037_v60  ;;  %v4219_v49 = vpack.c.bf16 %v5038_v39, %v5037_v60  ;;  %4198 = vmatpush1.bf16.msra.mxu1 %v4197_v62  ;;  %v6673_v20 = vpop.permute.xlu0 %5020  ;;  %v4203_v5 = vpack.c.bf16 %v2470_v32, %v2466_v61 }
 0x893   :  { %v4221_v9 = vpack.c.bf16 %v2314_v2, %v2311_v24  ;;  %v5023_v56 = vunpack.i.h.bf16 %v6673_v20  ;;  %v5022_v35 = vunpack.i.l.bf16 %v6673_v20  ;;  %v5041_v16 = vpop.permute.xlu1 %5040  ;;  %4200 = vmatprep.subr.bf16.mxu1 %v4199_v36  ;;  %v2501_v2 = vsel %vm1422_vm15, %v4997_v15, %v4982_v7  ;;  %v2284_v20 = vld [vmem:[%s7041_s2 + $0xb8] sm:$0xff] }
 0x894   :  { %v5043_v33 = vunpack.i.h.bf16 %v5041_v16  ;;  %v5042_v0 = vunpack.i.l.bf16 %v5041_v16  ;;  %4220 = vmatprep.subr.bf16.mxu0 %v4219_v49  ;;  %v2538_v48 = vsel %vm1445_vm2, %v5002_v57, %v5003_v41  ;;  %vm2765_vm1 = vcmask 482304  }
 0x895   :  { %4222 = vmatpush1.bf16.msra.mxu0 %v4221_v9  ;;  %v2506_v46 = vsel %vm1422_vm15, %v5022_v35, %v5023_v56  ;;  %v2505_v42 = vsel %vm1422_vm15, %v4998_v18, %v5022_v35  ;;  %vm6823_vm4 = vmpackc.low %vm2765_vm1, %vm2765_vm1 }
 0x896   :  { %v2341_v53 = vsel %vm1309_vm13, %v4948_v50, %v5042_v0  ;;  %v2344_v6 = vsel %vm1309_vm13, %v4988_v44, %v5043_v33  ;;  %v4223_v55 = vpack.c.bf16 %v5043_v33, %v5042_v0  ;;  %4202 = vmatpush1.bf16.msra.mxu1 %v4201_v40  ;;  %v6693_v3 = vpop.permute.xlu0 %5025  ;;  %v4205_v44 = vpack.c.bf16 %v2469_v21, %v2465_v37 }
 0x897   :  { %v4225_v31 = vpack.c.bf16 %v2344_v6, %v2341_v53  ;;  %v5028_v62 = vunpack.i.h.bf16 %v6693_v3  ;;  %v5027_v1 = vunpack.i.l.bf16 %v6693_v3  ;;  %v5046_v50 = vpop.permute.xlu1 %5045  ;;  %4204 = vmatprep.subr.bf16.mxu1 %v4203_v5  ;;  %v4207_v39 = vpack.c.bf16 %v2506_v46, %v2502_v43 }
 0x898   :  { %v5048_v19 = vunpack.i.h.bf16 %v5046_v50  ;;  %v5047_v45 = vunpack.i.l.bf16 %v5046_v50  ;;  %4224 = vmatprep.subr.bf16.mxu0 %v4223_v55  ;;  %v4209_v51 = vpack.c.bf16 %v2505_v42, %v2501_v2  ;;  %v2277_v55 = vld [vmem:[%s7041_s2 + $0x80] sm:$0xff]  ;;  %v7080_v3 = vmov 0.0  }
 0x899   :  { %4226 = vmatpush1.bf16.msra.mxu0 %v4225_v31  ;;  %v2542_v61 = vsel %vm1445_vm2, %v5027_v1, %v5028_v62  ;;  %v2281_v2 = vld [vmem:[%s7041_s2 + $0xa0] sm:$0xff] }
 0x89a   :  { %v2374_v60 = vsel %vm373_vm5, %v4993_v12, %v5048_v19  ;;  %v2371_v27 = vsel %vm373_vm5, %v4953_v34, %v5047_v45  ;;  %v4227_v28 = vpack.c.bf16 %v5048_v19, %v5047_v45  ;;  %4206 = vmatpush1.bf16.msra.mxu1 %v4205_v44  ;;  %v5031_v36 = vpop.permute.xlu0 %5030  ;;  %v4211_v16 = vpack.c.bf16 %v2542_v61, %v2538_v48  ;;  %v2279_v19 = vld [vmem:[%s7041_s2 + $0x90] sm:$0xff] }
 0x89b   :  { %v4229_v24 = vpack.c.bf16 %v2374_v60, %v2371_v27  ;;  %v5033_v49 = vunpack.i.h.bf16 %v5031_v36  ;;  %v5032_v32 = vunpack.i.l.bf16 %v5031_v36  ;;  %v5051_v37 = vpop.permute.xlu1 %5050  ;;  %4208 = vmatprep.subr.bf16.mxu1 %v4207_v39  ;;  %vm2925_vm5 = vcmask 261120  }
 0x89c   :  { %v5053_v12 = vunpack.i.h.bf16 %v5051_v37  ;;  %v5052_v9 = vunpack.i.l.bf16 %v5051_v37  ;;  %4228 = vmatprep.subr.bf16.mxu0 %v4227_v28 }
 0x89d   :  { %v2537_v34 = vsel %vm1445_vm2, %v5032_v32, %v5002_v57  ;;  %v2541_v35 = vsel %vm1445_vm2, %v5033_v49, %v5027_v1  ;;  %4230 = vmatpush1.bf16.msra.mxu0 %v4229_v24 }
 0x89e   :  { %v4213_v7 = vpack.c.bf16 %v2541_v35, %v2537_v34  ;;  %v2401_v40 = vsel %vm475_vm7, %v4958_v26, %v5052_v9  ;;  %v2404_v33 = vsel %vm475_vm7, %v5008_v29, %v5053_v12  ;;  %v4231_v0 = vpack.c.bf16 %v5053_v12, %v5052_v9  ;;  %4210 = vmatpush1.bf16.msra.mxu1 %v4209_v51  ;;  %v5061_v43 = vpop.permute.xlu0 %5060  ;;  %v2283_v9 = vld [vmem:[%s7041_s2 + $0xb0] sm:$0xff] }
 0x89f   :  { %v4233_v18 = vpack.c.bf16 %v2404_v33, %v2401_v40  ;;  %v5056_v15 = vpop.permute.xlu1 %5055  ;;  %4212 = vmatprep.subr.bf16.mxu1 %v4211_v16  ;;  %v5062_v53 = vunpack.i.l.bf16 %v5061_v43  ;;  %v5063_v29 = vunpack.i.h.bf16 %v5061_v43  ;;  %vm5170_vm7 = vmmov 0  }
 0x8a0   :  { %v5058_v21 = vunpack.i.h.bf16 %v5056_v15  ;;  %v5057_v5 = vunpack.i.l.bf16 %v5056_v15  ;;  %4232 = vmatprep.subr.bf16.mxu0 %v4231_v0  ;;  %v2920_v15 = vld [vmem:[%s7040_s1] sm:$0x3] }
 0x8a1   :  { %4234 = vmatpush1.bf16.msra.mxu0 %v4233_v18  ;;  %v2467_v58 = vsel %vm1399_vm0, %v4968_v10, %v5062_v53  ;;  %v2468_v45 = vsel %vm1399_vm0, %v5062_v53, %v5063_v29 }
 0x8a2   :  { %v2434_v30 = vsel %vm1376_vm14, %v5013_v47, %v5058_v21  ;;  %v2431_v26 = vsel %vm1376_vm14, %v4963_v63, %v5057_v5  ;;  %v4235_v54 = vpack.c.bf16 %v5058_v21, %v5057_v5  ;;  %4214 = vmatpush1.bf16.msra.mxu1 %v4213_v7  ;;  %v5066_v6 = vpop.permute.xlu0 %5065  ;;  %v2743_v7 = vld [vmem:[%s7043_s4] sm:$0xff]  ;;  %v2928_v21 = vld [vmem:[%s7044_s5 + $0x8] sm:$0xff]  ;;  %s5169_s4 = smov 32  }
 0x8a3   :  { %v4237_v46 = vpack.c.bf16 %v2434_v30, %v2431_v26  ;;  %v5076_v31 = vpop.permute.xlu1 %5075  ;;  %v5067_v63 = vunpack.i.l.bf16 %v5066_v6  ;;  %v5068_v57 = vunpack.i.h.bf16 %v5066_v6  ;;  %v2745_v0 = vcombine.high %v2743_v7, %v2743_v7  ;;  %v2932_v5 = vld [vmem:[%s7044_s5 + $0x28] sm:$0xff]  ;;  %2922 = vrot.lane.b32.xlu0 %v2920_v15, %s5169_s4  ;;  %v2927_v30 = vld [vmem:[%s7044_s5] sm:$0xff]  ;;  %v3181_v15 = vld [vmem:[#allocation2 + $0x190] sm:$0xff] }
 0x8a4   :  { %v5078_v1 = vunpack.i.h.bf16 %v5076_v31  ;;  %v5077_v47 = vunpack.i.l.bf16 %v5076_v31  ;;  %4236 = vmatprep.subr.bf16.mxu0 %v4235_v54  ;;  %v4269_v53 = vpack.c.bf16 %v2932_v5, %v2928_v21  ;;  %v2931_v26 = vld [vmem:[%s7044_s5 + $0x20] sm:$0xff]  ;;  %v2936_v54 = vld [vmem:[%s7044_s5 + $0x48] sm:$0xff]  ;;  %v3184_v21 = vld [vmem:[#allocation2 + $0x1a8] sm:$0xff] }
 0x8a5   :  { %2630 = vmatmul.mubr.f32.vlgmr.msra.gmra.mrb[20].mxu1 %v2277_v55  ;;  %4238 = vmatpush1.bf16.msra.mxu0 %v4237_v46  ;;  %v2503_v27 = vsel %vm1422_vm15, %v4983_v59, %v5067_v63  ;;  %v2504_v24 = vsel %vm1422_vm15, %v5067_v63, %v5068_v57  ;;  %v4271_v29 = vpack.c.bf16 %v2931_v26, %v2927_v30  ;;  %v2940_v6 = vld [vmem:[%s7044_s5 + $0x68] sm:$0xff]  ;;  %v2935_v46 = vld [vmem:[%s7044_s5 + $0x40] sm:$0xff] }
 0x8a6   :  { %v2471_v50 = vsel %vm1399_vm0, %v5018_v8, %v5077_v47  ;;  %v5071_v44 = vpop.permute.xlu0 %5070  ;;  %3819 = vmatprep.mubr.msk.f32.mxu1 %vm2031_vm3, %v2280_v14  ;;  %v2472_v52 = vsel %vm1399_vm0, %v5077_v47, %v5078_v1  ;;  %v2939_v31 = vld [vmem:[%s7044_s5 + $0x60] sm:$0xff]  ;;  %v2944_v1 = vld [vmem:[%s7044_s5 + $0x88] sm:$0xf]  ;;  %v4385_v5 = vpack.c.bf16 %v3184_v21, %v3181_v15  ;;  %v3157_v15 = vld [vmem:[#allocation2 + $0xd0] sm:$0xff] }
 0x8a7   :  { %v4241_v10 = vpack.c.bf16 %v2471_v50, %v2467_v58  ;;  %v5081_v42 = vpop.permute.xlu1 %5080  ;;  %v4239_v39 = vpack.c.bf16 %v2472_v52, %v2468_v45  ;;  %v5072_v28 = vunpack.i.l.bf16 %v5071_v44  ;;  %v5073_v61 = vunpack.i.h.bf16 %v5071_v44  ;;  %v2943_v47 = vld [vmem:[%s7044_s5 + $0x80] sm:$0xf]  ;;  %v3160_v21 = vld [vmem:[#allocation2 + $0xe8] sm:$0xff] }
 0x8a8   :  { %v5083_v8 = vunpack.i.h.bf16 %v5081_v42  ;;  %v5082_v60 = vunpack.i.l.bf16 %v5081_v42  ;;  %v3134_v30 = vld [vmem:[#allocation2 + $0x18] sm:$0xff] }
 0x8a9   :  { %2636 = vmatmul.mubr.f32.gmra.mrb[22].mxu1 %v2279_v19  ;;  %4240 = vmatprep.subr.bf16.mxu0 %v4239_v39  ;;  %v2539_v51 = vsel %vm1445_vm2, %v5003_v41, %v5072_v28  ;;  %v2540_v48 = vsel %vm1445_vm2, %v5072_v28, %v5073_v61  ;;  %v5168_v41 = vmov 1983009808   ;;  %v3138_v26 = vld [vmem:[#allocation2 + $0x38] sm:$0xff] }
 0x8aa   :  { %v2507_v36 = vsel %vm1422_vm15, %v5023_v56, %v5082_v60  ;;  %4242 = vmatpush1.bf16.msra.mxu0 %v4241_v10  ;;  %3820 = vmatprep.mubr.msk.f32.mxu1 %vm2031_vm3, %v2282_v38  ;;  %v2508_v4 = vsel %vm1422_vm15, %v5082_v60, %v5083_v8  ;;  %v3150_v61 = vld [vmem:[#allocation2 + $0x98] sm:$0xff] }
 0x8ab   :  { %v4245_v59 = vpack.c.bf16 %v2507_v36, %v2503_v27  ;;  %v5086_v49 = vpop.permute.xlu1 %5085  ;;  %v4243_v32 = vpack.c.bf16 %v2508_v4, %v2504_v24 }
 0x8ac   :  { %v5088_v56 = vunpack.i.h.bf16 %v5086_v49  ;;  %v5087_v37 = vunpack.i.l.bf16 %v5086_v49  ;;  %v2930_v49 = vld [vmem:[%s7044_s5 + $0x18] sm:$0xff] }
 0x8ad   :  { %2642 = vmatmul.mubr.f32.gmra.mrb[24].mxu1 %v2281_v2  ;;  %4244 = vmatprep.subr.bf16.mxu0 %v4243_v32  ;;  %v2934_v32 = vld [vmem:[%s7044_s5 + $0x38] sm:$0xff] }
 0x8ae   :  { %v2543_v12 = vsel %vm1445_vm2, %v5028_v62, %v5087_v37  ;;  %4246 = vmatpush1.bf16.msra.mxu0 %v4245_v59  ;;  %3821 = vmatprep.mubr.msk.f32.mxu1 %vm2031_vm3, %v2284_v20  ;;  %v2544_v34 = vsel %vm1445_vm2, %v5087_v37, %v5088_v56  ;;  %v2747_v62 = vunpack.c.l.s4 %v5168_v41 }
 0x8af   :  { %v4249_v25 = vpack.c.bf16 %v2543_v12, %v2539_v51  ;;  %v4247_v35 = vpack.c.bf16 %v2544_v34, %v2540_v48  ;;  %v4277_v12 = vpack.c.bf16 %v2934_v32, %v2930_v49  ;;  %v2933_v48 = vld [vmem:[%s7044_s5 + $0x30] sm:$0xff]  ;;  %v2938_v34 = vld [vmem:[%s7044_s5 + $0x58] sm:$0xff]  ;;  %v3199_v49 = vld [vmem:[#allocation2 + $0x220] sm:$0xff] }
 0x8b0   :  { %v2748_v16 = vunpack.c.0.s8 %v2747_v62  ;;  %v2937_v62 = vld [vmem:[%s7044_s5 + $0x50] sm:$0xff]  ;;  %v3202_v32 = vld [vmem:[#allocation2 + $0x238] sm:$0xff] }
 0x8b1   :  { %2648 = vmatmul.mubr.f32.gmra.mrb[26].mxu1 %v2283_v9  ;;  %4248 = vmatprep.subr.bf16.mxu0 %v4247_v35 }
 0x8b2   :  { %4250 = vmatpush1.bf16.msra.mxu0 %v4249_v25  ;;  %v2751_v40 = vsub.s32 %v2748_v16, %v5237_v11  ;;  %v2942_v25 = vld [vmem:[%s7044_s5 + $0x78] sm:$0xff]  ;;  %v2941_v16 = vld [vmem:[%s7044_s5 + $0x70] sm:$0xff] }
 0x8b3   :  { %4270 = vmatprep.subr.bf16.mxu0 %v4269_v53  ;;  %v4281_v41 = vpack.c.bf16 %v2942_v25, %v2938_v34  ;;  %v3131_v53 = vld [vmem:[#allocation2] sm:$0xff]  ;;  %v3154_v25 = vld [vmem:[#allocation2 + $0xb8] sm:$0xff] }
 0x8b4   :  { %v2752_v33 = vrot.slane %v2743_v7, %v2751_v40  ;;  %v6786_v18 = vrot.slane %v2745_v0, %v2751_v40  ;;  %v4283_v7 = vpack.c.bf16 %v2941_v16, %v2937_v62  ;;  %v2946_v40 = vld [vmem:[%s7044_s5 + $0x98] sm:$0xf]  ;;  %v3132_v0 = vld [vmem:[#allocation2 + $0x8] sm:$0xff]  ;;  %v3151_v34 = vld [vmem:[#allocation2 + $0xa0] sm:$0xff] }
 0x8b5   :  { %2719 = vmatmul.mubr.f32.vlgmr.msra.gmra.mrb[20].mxu0 %v2277_v55  ;;  %v4273_v55 = vpack.c.bf16 %v2940_v6, %v2936_v54  ;;  %v3133_v54 = vld [vmem:[#allocation2 + $0x10] sm:$0xff]  ;;  %v3208_v62 = vld [vmem:[#allocation2 + $0x268] sm:$0xff] }
 0x8b6   :  { %3823 = vmatprep.mubr.msk.f32.mxu0 %vm2031_vm3, %v2280_v14  ;;  %v2760_v43 = vcombine.high %v2752_v33, %v2752_v33  ;;  %4272 = vmatpush1.bf16.msra.mxu0 %v4271_v29  ;;  %v4275_v14 = vpack.c.bf16 %v2939_v31, %v2935_v46  ;;  %v3136_v29 = vld [vmem:[#allocation2 + $0x28] sm:$0xff]  ;;  %v3141_v6 = vld [vmem:[#allocation2 + $0x50] sm:$0xff]  ;;  %v3190_v46 = vld [vmem:[#allocation2 + $0x1d8] sm:$0xff] }
 0x8b7   :  { %4274 = vmatprep.subr.bf16.mxu0 %v4273_v55  ;;  %v3187_v55 = vld [vmem:[#allocation2 + $0x1c0] sm:$0xff] }
 0x8b8   :  { %2844 = vmatprep.mubr.f32.mxu1 %v2760_v43  ;;  %v3135_v43 = vld [vmem:[#allocation2 + $0x20] sm:$0xff] }
 0x8b9   :  { %2725 = vmatmul.mubr.f32.gmra.mrb[22].mxu0 %v2279_v19 }
 0x8ba   :  { %3824 = vmatprep.mubr.msk.f32.mxu0 %vm2031_vm3, %v2282_v38  ;;  %4276 = vmatpush1.bf16.msra.mxu0 %v4275_v14  ;;  %v4287_v14 = vpack.c.bf16 %v3134_v30, %v3131_v53  ;;  %v3211_v53 = vld [vmem:[#allocation2 + $0x280] sm:$0xff]  ;;  %v3214_v30 = vld [vmem:[#allocation2 + $0x298] sm:$0xff] }
 0x8bb   :  { %3831 = vmatprep.subr.msk.mxu0 %vm965_vm9, %v2944_v1  ;;  %v3137_v1 = vld [vmem:[#allocation2 + $0x30] sm:$0xff] }
 0x8bd   :  { %2731 = vmatmul.mubr.f32.gmra.mrb[24].mxu0 %v2281_v2  ;;  %v2761_v2 = vcombine.high %v6786_v18, %v6786_v18 }
 0x8be   :  { %3825 = vmatprep.mubr.msk.f32.mxu0 %vm2031_vm3, %v2284_v20  ;;  %3832 = vmatpush1.msk.msra.mxu0 %vm965_vm9, %v2943_v47  ;;  %v3140_v47 = vld [vmem:[#allocation2 + $0x48] sm:$0xff] }
 0x8c1   :  { %2737 = vmatmul.mubr.f32.gmra.mrb[26].mxu0 %v2283_v9  ;;  %v2929_v9 = vld [vmem:[%s7044_s5 + $0x10] sm:$0xff] }
 0x8c2   :  { %3049 = vmatprep.mubr.f32.mxu0 %v7080_v3  ;;  %v4279_v35 = vpack.c.bf16 %v2933_v48, %v2929_v9  ;;  %v3156_v9 = vld [vmem:[#allocation2 + $0xc8] sm:$0xff]  ;;  %v4397_v48 = vpack.c.bf16 %v3202_v32, %v3199_v49  ;;  %v3182_v49 = vld [vmem:[#allocation2 + $0x198] sm:$0xff] }
 0x8c3   :  { %v3186_v32 = vld [vmem:[#allocation2 + $0x1b8] sm:$0xff] }
 0x915   :  { %v2923_v31 = vpop.permute.xlu0 %2922 }
 0x978   :  { %v2631_v58 = vpop.f32.mrb[20].mxu1 }
 0x979   :  { %v2633_v63 = vpop.f32.mrb[21].mxu1 }
 0x97c   :  { %v2637_v50 = vpop.f32.mrb[22].mxu1 }
 0x97d   :  { %v4253_v57 = vpack.c.bf16 %v2637_v50, %v2631_v58  ;;  %v2639_v44 = vpop.f32.mrb[23].mxu1  ;;  %v4387_v58 = vpack.c.bf16 %v3136_v29, %v3133_v54  ;;  %v4289_v50 = vpack.c.bf16 %v3141_v6, %v3138_v26  ;;  %v3161_v54 = vld [vmem:[#allocation2 + $0xf0] sm:$0xff]  ;;  %v3164_v29 = vld [vmem:[#allocation2 + $0x108] sm:$0xff]  ;;  %v4403_v6 = vpack.c.bf16 %v3160_v21, %v3157_v15 }
 0x97e   :  { %v4251_v19 = vpack.c.bf16 %v2639_v44, %v2633_v63  ;;  %v4389_v44 = vpack.c.bf16 %v3190_v46, %v3187_v55  ;;  %v3168_v46 = vld [vmem:[#allocation2 + $0x128] sm:$0xff] }
 0x980   :  { %v2643_v45 = vpop.f32.mrb[24].mxu1  ;;  %4252 = vmatprep.subr.bf16.mxu1 %v4251_v19  ;;  %v3139_v19 = vld [vmem:[#allocation2 + $0x40] sm:$0xff] }
 0x981   :  { %v2645_v52 = vpop.f32.mrb[25].mxu1  ;;  %4254 = vmatpush1.bf16.xpose.msra.mxu1 %v4253_v57  ;;  %v3144_v57 = vld [vmem:[#allocation2 + $0x68] sm:$0xff] }
 0x984   :  { %v2649_v10 = vpop.f32.mrb[26].mxu1 }
 0x985   :  { %v4257_v42 = vpack.c.bf16 %v2649_v10, %v2643_v45  ;;  %v2651_v39 = vpop.f32.mrb[27].mxu1  ;;  %v3142_v45 = vld [vmem:[#allocation2 + $0x58] sm:$0xff] }
 0x986   :  { %v4255_v38 = vpack.c.bf16 %v2651_v39, %v2645_v52  ;;  %v3193_v39 = vld [vmem:[#allocation2 + $0x1f0] sm:$0xff] }
 0x988   :  { %v2720_v8 = vpop.f32.mrb[20].mxu0  ;;  %4256 = vmatprep.subr.bf16.mxu1 %v4255_v38  ;;  %v3196_v38 = vld [vmem:[#allocation2 + $0x208] sm:$0xff] }
 0x989   :  { %v2722_v60 = vpop.f32.mrb[21].mxu0  ;;  %4258 = vmatpush1.bf16.xpose.msra.mxu1 %v4257_v42  ;;  %v3147_v42 = vld [vmem:[#allocation2 + $0x80] sm:$0xff] }
 0x98c   :  { %v2726_v27 = vpop.f32.mrb[22].mxu0 }
 0x98d   :  { %v4262_v28 = vpack.c.bf16 %v2726_v27, %v2720_v8  ;;  %v2728_v36 = vpop.f32.mrb[23].mxu0  ;;  %v4291_v8 = vpack.c.bf16 %v3140_v47, %v3137_v1  ;;  %v3146_v27 = vld [vmem:[#allocation2 + $0x78] sm:$0xff]  ;;  %v3171_v47 = vld [vmem:[#allocation2 + $0x140] sm:$0xff] }
 0x98e   :  { %v4259_v24 = vpack.c.bf16 %v2728_v36, %v2722_v60  ;;  %v3143_v60 = vld [vmem:[#allocation2 + $0x60] sm:$0xff]  ;;  %v4293_v36 = vpack.c.bf16 %v3147_v42, %v3144_v57  ;;  %v3166_v1 = vld [vmem:[#allocation2 + $0x118] sm:$0xff]  ;;  %v3172_v42 = vld [vmem:[#allocation2 + $0x148] sm:$0xff] }
 0x98f   :  { %v3167_v57 = vld [vmem:[#allocation2 + $0x120] sm:$0xff] }
 0x990   :  { %v2732_v4 = vpop.f32.mrb[24].mxu0  ;;  %4261 = vmatprep.subr.msk.bf16.mxu1 %vm6823_vm4, %v4259_v24  ;;  %2845 = vmatmul.mubr.f32.vlgmr.msra.gmra.mrb[28].mxu1 %v2752_v33  ;;  %v2945_v33 = vld [vmem:[%s7044_s5 + $0x90] sm:$0xf]  ;;  %v3145_v24 = vld [vmem:[#allocation2 + $0x70] sm:$0xff] }
 0x991   :  { %v2734_v59 = vpop.f32.mrb[25].mxu0  ;;  %4263 = vmatpush1.bf16.xpose.msra.mxu1 %v4262_v28  ;;  %3830 = vmatprep.mubr.msk.f32.mxu1 %vm2765_vm1, %v2761_v2  ;;  %v4391_v28 = vpack.c.bf16 %v3142_v45, %v3139_v19  ;;  %v4393_v2 = vpack.c.bf16 %v3196_v38, %v3193_v39  ;;  %v4309_v19 = vpack.c.bf16 %v3171_v47, %v3168_v46  ;;  %v3170_v45 = vld [vmem:[#allocation2 + $0x138] sm:$0xff]  ;;  %v3177_v38 = vld [vmem:[#allocation2 + $0x170] sm:$0xff]  ;;  %v3216_v46 = vld [vmem:[#allocation2 + $0x2a8] sm:$0xff] }
 0x992   :  { %v3174_v39 = vld [vmem:[#allocation2 + $0x158] sm:$0xff]  ;;  %v3215_v47 = vld [vmem:[#allocation2 + $0x2a0] sm:$0xff] }
 0x994   :  { %v2738_v20 = vpop.f32.mrb[26].mxu0 }
 0x995   :  { %v4267_v56 = vpack.c.bf16 %v2738_v20, %v2732_v4  ;;  %v2740_v37 = vpop.f32.mrb[27].mxu0  ;;  %v3148_v4 = vld [vmem:[#allocation2 + $0x88] sm:$0xff]  ;;  %v4295_v20 = vpack.c.bf16 %v3146_v27, %v3143_v60  ;;  %v4313_v27 = vpack.c.bf16 %v3177_v38, %v3174_v39  ;;  %v3175_v38 = vld [vmem:[#allocation2 + $0x160] sm:$0xff] }
 0x996   :  { %v4264_v51 = vpack.c.bf16 %v2740_v37, %v2734_v59  ;;  %v3153_v59 = vld [vmem:[#allocation2 + $0xb0] sm:$0xff]  ;;  %v3152_v37 = vld [vmem:[#allocation2 + $0xa8] sm:$0xff] }
 0x998   :  { %4266 = vmatprep.subr.msk.bf16.mxu1 %vm6823_vm4, %v4264_v51  ;;  %v4395_v51 = vpack.c.bf16 %v3148_v4, %v3145_v24 }
 0x999   :  { %4268 = vmatpush1.bf16.xpose.msra.mxu1 %v4267_v56  ;;  %v3149_v56 = vld [vmem:[#allocation2 + $0x90] sm:$0xff] }
 0x99a   :  { %4278 = vmatprep.subr.bf16.mxu1 %v4277_v12  ;;  %v4297_v12 = vpack.c.bf16 %v3153_v59, %v3150_v61  ;;  %v4299_v16 = vpack.c.bf16 %v3152_v37, %v3149_v56  ;;  %v3180_v61 = vld [vmem:[#allocation2 + $0x188] sm:$0xff]  ;;  %v3179_v59 = vld [vmem:[#allocation2 + $0x180] sm:$0xff] }
 0x99b   :  { %v4319_v56 = vpack.c.bf16 %v3182_v49, %v3179_v59 }
 0x9a0   :  { %2915 = vmatmul.mubr.f32.vlgmr.msra.gmra.mrb[28].mxu1 %v6786_v18  ;;  %v4285_v18 = vpack.c.bf16 %v3135_v43, %v3132_v0  ;;  %v3162_v43 = vld [vmem:[#allocation2 + $0xf8] sm:$0xff] }
 0x9a1   :  { %4280 = vmatpush1.bf16.msra.mxu1 %v4279_v35  ;;  %3120 = vmatprep.mubr.f32.mxu1 %v7080_v3  ;;  %v3159_v35 = vld [vmem:[#allocation2 + $0xe0] sm:$0xff] }
 0x9a2   :  { %4282 = vmatprep.subr.bf16.mxu1 %v4281_v41  ;;  %4286 = vmatprep.subr.bf16.mxu0 %v4285_v18  ;;  %v3205_v41 = vld [vmem:[#allocation2 + $0x250] sm:$0xff]  ;;  %v4301_v0 = vpack.c.bf16 %v3159_v35, %v3156_v9  ;;  %v3192_v9 = vld [vmem:[#allocation2 + $0x1e8] sm:$0xff]  ;;  %v3191_v35 = vld [vmem:[#allocation2 + $0x1e0] sm:$0xff] }
 0x9a3   :  { %v4401_v18 = vpack.c.bf16 %v3208_v62, %v3205_v41  ;;  %v3194_v41 = vld [vmem:[#allocation2 + $0x1f8] sm:$0xff] }
 0x9a4   :  { %v3198_v62 = vld [vmem:[#allocation2 + $0x218] sm:$0xff] }
 0x9a5   :  { %4284 = vmatpush1.bf16.msra.mxu1 %v4283_v7  ;;  %v3155_v7 = vld [vmem:[#allocation2 + $0xc0] sm:$0xff] }
 0x9a6   :  { %3834 = vmatprep.subr.msk.mxu1 %vm965_vm9, %v2946_v40  ;;  %v3158_v40 = vld [vmem:[#allocation2 + $0xd8] sm:$0xff] }
 0x9a7   :  { %v4303_v26 = vpack.c.bf16 %v3158_v40, %v3155_v7  ;;  %v4327_v7 = vpack.c.bf16 %v3194_v41, %v3191_v35  ;;  %v3234_v35 = vld [vmem:[#allocation2 + $0x338] sm:$0xff]  ;;  %v3237_v41 = vld [vmem:[#allocation2 + $0x350] sm:$0xff] }
 0x9a9   :  { %3835 = vmatpush1.msk.msra.mxu1 %vm965_vm9, %v2945_v33  ;;  %v4399_v33 = vpack.c.bf16 %v3154_v25, %v3151_v34 }
 0x9aa   :  { %4386 = vmatprep.subr.bf16.mxu1 %v4385_v5  ;;  %v3165_v5 = vld [vmem:[#allocation2 + $0x110] sm:$0xff] }
 0x9ab   :  { %v4305_v55 = vpack.c.bf16 %v3165_v5, %v3162_v43  ;;  %v3204_v43 = vld [vmem:[#allocation2 + $0x248] sm:$0xff]  ;;  %v3203_v5 = vld [vmem:[#allocation2 + $0x240] sm:$0xff] }
 0xa73   :  { %v2916_v63 = vpop.f32.mrb[28].mxu1 }
 0xa74   :  { %v2926_v52 = vsel %vm2925_vm5, %v2916_v63, %v2923_v31  ;;  %v2918_v10 = vpop.f32.mrb[29].mxu1  ;;  %v4405_v31 = vpack.c.bf16 %v3214_v30, %v3211_v53  ;;  %v3220_v63 = vld [vmem:[#allocation2 + $0x2c8] sm:$0xff]  ;;  %v3206_v53 = vld [vmem:[#allocation2 + $0x258] sm:$0xff] }
 0xa75   :  { %3833 = vmatmul.mubr.msk.f32.vlgmr.msra.gmra.mrb[28].mxu0 %vm2969_vm6, %v2926_v52  ;;  %3836 = vmatmul.mubr.msk.f32.vlgmr.msra.gmra.mrb[30].mxu1 %vm2969_vm6, %v2926_v52  ;;  %v3169_v10 = vld [vmem:[#allocation2 + $0x130] sm:$0xff]  ;;  %v3210_v30 = vld [vmem:[#allocation2 + $0x278] sm:$0xff] }
 0xa76   :  { %4288 = vmatpush1.bf16.msra.mxu0 %v4287_v14  ;;  %4388 = vmatpush3.bf16.msra.mxu1 %v4387_v58  ;;  %v3163_v14 = vld [vmem:[#allocation2 + $0x100] sm:$0xff]  ;;  %v3217_v58 = vld [vmem:[#allocation2 + $0x2b0] sm:$0xff]  ;;  %v4411_v60 = vpack.c.bf16 %v3172_v42, %v3169_v10  ;;  %v3224_v10 = vld [vmem:[#allocation2 + $0x2e8] sm:$0xff] }
 0xa77   :  { %4290 = vmatprep.subr.bf16.mxu0 %v4289_v50  ;;  %4390 = vmatprep.subr.bf16.mxu1 %v4389_v44  ;;  %v4307_v50 = vpack.c.bf16 %v3164_v29, %v3161_v54  ;;  %v4407_v44 = vpack.c.bf16 %v3166_v1, %v3163_v14  ;;  %v4409_v52 = vpack.c.bf16 %v3220_v63, %v3217_v58  ;;  %v3218_v58 = vld [vmem:[#allocation2 + $0x2b8] sm:$0xff] }
 0xa78   :  { %v4335_v54 = vpack.c.bf16 %v3206_v53, %v3203_v5  ;;  %v4343_v63 = vpack.c.bf16 %v3218_v58, %v3215_v47  ;;  %v3245_v47 = vld [vmem:[#allocation2 + $0x390] sm:$0xff] }
 0xa7a   :  { %4292 = vmatpush1.bf16.msra.mxu0 %v4291_v8  ;;  %4392 = vmatpush3.bf16.msra.mxu1 %v4391_v28  ;;  %v4311_v8 = vpack.c.bf16 %v3170_v45, %v3167_v57  ;;  %v3173_v28 = vld [vmem:[#allocation2 + $0x150] sm:$0xff]  ;;  %v3226_v45 = vld [vmem:[#allocation2 + $0x2f8] sm:$0xff] }
 0xa7b   :  { %4294 = vmatprep.subr.bf16.mxu0 %v4293_v36  ;;  %4394 = vmatprep.subr.bf16.mxu1 %v4393_v2  ;;  %v3176_v36 = vld [vmem:[#allocation2 + $0x168] sm:$0xff]  ;;  %v3183_v2 = vld [vmem:[#allocation2 + $0x1a0] sm:$0xff]  ;;  %v3225_v57 = vld [vmem:[#allocation2 + $0x2f0] sm:$0xff] }
 0xa7c   :  { %v4315_v24 = vpack.c.bf16 %v3176_v36, %v3173_v28  ;;  %v4317_v4 = vpack.c.bf16 %v3183_v2, %v3180_v61  ;;  %v3231_v28 = vld [vmem:[#allocation2 + $0x320] sm:$0xff] }
 0xa7d   :  { %v6873_v61 = vld [vmem:[%s7047_s8] ss:$8 sm:$0xf] }
 0xa7e   :  { %4296 = vmatpush1.bf16.msra.mxu0 %v4295_v20  ;;  %4396 = vmatpush3.bf16.msra.mxu1 %v4395_v51  ;;  %v3189_v20 = vld [vmem:[#allocation2 + $0x1d0] sm:$0xff]  ;;  %v2952_v2 = vrot.slane %v6873_v61, %v5271_v22 }
 0xa7f   :  { %4298 = vmatprep.subr.bf16.mxu0 %v4297_v12  ;;  %4398 = vmatprep.subr.bf16.mxu1 %v4397_v48  ;;  %v4321_v37 = vpack.c.bf16 %v3189_v20, %v3186_v32  ;;  %v3185_v51 = vld [vmem:[#allocation2 + $0x1b0] sm:$0xff]  ;;  %v3188_v12 = vld [vmem:[#allocation2 + $0x1c8] sm:$0xff]  ;;  %v3195_v48 = vld [vmem:[#allocation2 + $0x200] sm:$0xff] }
 0xa80   :  { %v4323_v34 = vpack.c.bf16 %v3188_v12, %v3185_v51  ;;  %v4325_v25 = vpack.c.bf16 %v3195_v48, %v3192_v9  ;;  %v3227_v20 = vld [vmem:[#allocation2 + $0x300] sm:$0xff]  ;;  %v3230_v12 = vld [vmem:[#allocation2 + $0x318] sm:$0xff]  ;;  %v3229_v9 = vld [vmem:[#allocation2 + $0x310] sm:$0xff] }
 0xa81   :  { %v3232_v48 = vld [vmem:[#allocation2 + $0x328] sm:$0xff] }
 0xa82   :  { %4300 = vmatpush1.bf16.msra.mxu0 %v4299_v16  ;;  %4400 = vmatpush3.bf16.msra.mxu1 %v4399_v33  ;;  %v3201_v16 = vld [vmem:[#allocation2 + $0x230] sm:$0xff] }
 0xa83   :  { %4302 = vmatprep.subr.bf16.mxu0 %v4301_v0  ;;  %4402 = vmatprep.subr.bf16.mxu1 %v4401_v18  ;;  %v4329_v40 = vpack.c.bf16 %v3201_v16, %v3198_v62  ;;  %v3197_v33 = vld [vmem:[#allocation2 + $0x210] sm:$0xff]  ;;  %v3200_v0 = vld [vmem:[#allocation2 + $0x228] sm:$0xff]  ;;  %v3207_v18 = vld [vmem:[#allocation2 + $0x260] sm:$0xff]  ;;  %v4351_v16 = vpack.c.bf16 %v3230_v12, %v3227_v20 }
 0xa84   :  { %v4331_v15 = vpack.c.bf16 %v3200_v0, %v3197_v33  ;;  %v4333_v21 = vpack.c.bf16 %v3207_v18, %v3204_v43  ;;  %v3236_v33 = vld [vmem:[#allocation2 + $0x348] sm:$0xff]  ;;  %v3235_v0 = vld [vmem:[#allocation2 + $0x340] sm:$0xff]  ;;  %v3238_v43 = vld [vmem:[#allocation2 + $0x358] sm:$0xff]  ;;  %v4353_v18 = vpack.c.bf16 %v3237_v41, %v3234_v35 }
 0xa85   :  { %v3264_v20 = vld [vmem:[#allocation2 + $0x428] sm:$0xff]  ;;  %v3263_v12 = vld [vmem:[#allocation2 + $0x420] sm:$0xff]  ;;  %v3270_v35 = vld [vmem:[#allocation2 + $0x458] sm:$0xff] }
 0xa86   :  { %4304 = vmatpush1.bf16.msra.mxu0 %v4303_v26  ;;  %4404 = vmatpush3.bf16.msra.mxu1 %v4403_v6  ;;  %v3213_v26 = vld [vmem:[#allocation2 + $0x290] sm:$0xff] }
 0xa87   :  { %4306 = vmatprep.subr.bf16.mxu0 %v4305_v55  ;;  %4406 = vmatprep.subr.bf16.mxu1 %v4405_v31  ;;  %v4337_v29 = vpack.c.bf16 %v3213_v26, %v3210_v30  ;;  %v3209_v6 = vld [vmem:[#allocation2 + $0x270] sm:$0xff]  ;;  %v3212_v55 = vld [vmem:[#allocation2 + $0x288] sm:$0xff]  ;;  %v3219_v31 = vld [vmem:[#allocation2 + $0x2c0] sm:$0xff]  ;;  %v4421_v30 = vpack.c.bf16 %v3238_v43, %v3235_v0 }
 0xa88   :  { %v4339_v14 = vpack.c.bf16 %v3212_v55, %v3209_v6  ;;  %v4341_v1 = vpack.c.bf16 %v3219_v31, %v3216_v46  ;;  %v3239_v26 = vld [vmem:[#allocation2 + $0x360] sm:$0xff]  ;;  %v3241_v6 = vld [vmem:[#allocation2 + $0x370] sm:$0xff]  ;;  %v3244_v55 = vld [vmem:[#allocation2 + $0x388] sm:$0xff] }
 0xa89   :  { %v3246_v46 = vld [vmem:[#allocation2 + $0x398] sm:$0xff]  ;;  %v3249_v31 = vld [vmem:[#allocation2 + $0x3b0] sm:$0xff]  ;;  %v3276_v43 = vld [vmem:[#allocation2 + $0x488] sm:$0xff] }
 0xa8a   :  { %4308 = vmatpush1.bf16.msra.mxu0 %v4307_v50  ;;  %4408 = vmatpush3.bf16.msra.mxu1 %v4407_v44  ;;  %v3222_v50 = vld [vmem:[#allocation2 + $0x2d8] sm:$0xff]  ;;  %v3223_v44 = vld [vmem:[#allocation2 + $0x2e0] sm:$0xff]  ;;  %v4361_v58 = vpack.c.bf16 %v3249_v31, %v3246_v46  ;;  %v3273_v41 = vld [vmem:[#allocation2 + $0x470] sm:$0xff] }
 0xa8b   :  { %4310 = vmatprep.subr.bf16.mxu0 %v4309_v19  ;;  %4410 = vmatprep.subr.bf16.mxu1 %v4409_v52  ;;  %v4345_v19 = vpack.c.bf16 %v3225_v57, %v3222_v50  ;;  %v3221_v52 = vld [vmem:[#allocation2 + $0x2d0] sm:$0xff]  ;;  %v4413_v42 = vpack.c.bf16 %v3226_v45, %v3223_v44  ;;  %v3247_v50 = vld [vmem:[#allocation2 + $0x3a0] sm:$0xff]  ;;  %v3250_v57 = vld [vmem:[#allocation2 + $0x3b8] sm:$0xff] }
 0xa8c   :  { %v4347_v39 = vpack.c.bf16 %v3224_v10, %v3221_v52  ;;  %v3252_v44 = vld [vmem:[#allocation2 + $0x3c8] sm:$0xff]  ;;  %v4427_v52 = vpack.c.bf16 %v3250_v57, %v3247_v50  ;;  %v3251_v10 = vld [vmem:[#allocation2 + $0x3c0] sm:$0xff]  ;;  %v3274_v0 = vld [vmem:[#allocation2 + $0x478] sm:$0xff] }
 0xa8e   :  { %4312 = vmatpush1.bf16.msra.mxu0 %v4311_v8  ;;  %4412 = vmatpush3.bf16.msra.mxu1 %v4411_v60  ;;  %v3178_v8 = vld [vmem:[#allocation2 + $0x178] sm:$0xff]  ;;  %v3228_v60 = vld [vmem:[#allocation2 + $0x308] sm:$0xff] }
 0xa8f   :  { %4314 = vmatprep.subr.bf16.mxu0 %v4313_v27  ;;  %v4415_v27 = vpack.c.bf16 %v3178_v8, %v3175_v38  ;;  %4414 = vmatprep.subr.bf16.mxu1 %v4413_v42  ;;  %v4349_v36 = vpack.c.bf16 %v3231_v28, %v3228_v60  ;;  %v3253_v38 = vld [vmem:[#allocation2 + $0x3d0] sm:$0xff]  ;;  %v3256_v8 = vld [vmem:[#allocation2 + $0x3e8] sm:$0xff]  ;;  %v3258_v60 = vld [vmem:[#allocation2 + $0x3f8] sm:$0xff] }
 0xa92   :  { %4316 = vmatpush1.bf16.msra.mxu0 %v4315_v24  ;;  %4416 = vmatpush3.bf16.msra.mxu1 %v4415_v27  ;;  %v2956_v24 = vrot.slane %v6873_v61, %v5241_v13  ;;  %v3261_v27 = vld [vmem:[#allocation2 + $0x410] sm:$0xff] }
 0xa93   :  { %4318 = vmatprep.subr.bf16.mxu0 %v4317_v4  ;;  %4417 = vmatprep.subr.bf16.mxu1 %v5167_v23  ;;  %v7083_v4 = vsub.s32 3, %v5237_v11  ;;  %v3233_v11 = vld [vmem:[#allocation2 + $0x330] sm:$0xff] }
 0xa94   :  { %v4355_v53 = vpack.c.bf16 %v3236_v33, %v3233_v11  ;;  %v4377_v11 = vpack.c.bf16 %v3273_v41, %v3270_v35  ;;  %v3271_v33 = vld [vmem:[#allocation2 + $0x460] sm:$0xff]  ;;  %v3614_v35 = vld [vmem:[%s7046_s7 + $0xd8] sm:$0xff] }
 0xa95   :  { %v2964_v59 = vrot.slane %v6873_v61, %v7083_v4  ;;  %v3260_v4 = vld [vmem:[#allocation2 + $0x408] sm:$0xff] }
 0xa96   :  { %4320 = vmatpush1.bf16.msra.mxu0 %v4319_v56 }
 0xa97   :  { %4322 = vmatprep.subr.bf16.mxu0 %v4321_v37 }
 0xa9a   :  { %4324 = vmatpush1.bf16.msra.mxu0 %v4323_v34 }
 0xa9b   :  { %4326 = vmatprep.subr.bf16.mxu0 %v4325_v25 }
 0xa9e   :  { %4328 = vmatpush1.bf16.msra.mxu0 %v4327_v7  ;;  %v4418_v7 = vpack.c.bf16 %v3232_v48, %v3229_v9  ;;  %v3266_v48 = vld [vmem:[#allocation2 + $0x438] sm:$0xff] }
 0xa9f   :  { %4330 = vmatprep.subr.bf16.mxu0 %v4329_v40 }
 0xaa2   :  { %4332 = vmatpush1.bf16.msra.mxu0 %v4331_v15  ;;  %v3240_v15 = vld [vmem:[#allocation2 + $0x368] sm:$0xff] }
 0xaa3   :  { %4334 = vmatprep.subr.bf16.mxu0 %v4333_v21  ;;  %v3243_v21 = vld [vmem:[#allocation2 + $0x380] sm:$0xff] }
 0xaa6   :  { %4336 = vmatpush1.bf16.msra.mxu0 %v4335_v54  ;;  %v4357_v54 = vpack.c.bf16 %v3243_v21, %v3240_v15  ;;  %v4439_v21 = vpack.c.bf16 %v3274_v0, %v3271_v33  ;;  %v3599_v0 = vld [vmem:[%s7046_s7 + $0x60] sm:$0xff] }
 0xaa7   :  { %4338 = vmatprep.subr.bf16.mxu0 %v4337_v29  ;;  %v3242_v29 = vld [vmem:[#allocation2 + $0x378] sm:$0xff] }
 0xaaa   :  { %4340 = vmatpush1.bf16.msra.mxu0 %v4339_v14  ;;  %v4359_v14 = vpack.c.bf16 %v3242_v29, %v3239_v26  ;;  %v3278_v26 = vld [vmem:[#allocation2 + $0x498] sm:$0xff]  ;;  %v3280_v29 = vld [vmem:[#allocation2 + $0x4a8] sm:$0xff] }
 0xaab   :  { %4342 = vmatprep.subr.bf16.mxu0 %v4341_v1  ;;  %v4424_v1 = vpack.c.bf16 %v3244_v55, %v3241_v6 }
 0xaae   :  { %4344 = vmatpush1.bf16.msra.mxu0 %v4343_v63  ;;  %v3248_v63 = vld [vmem:[#allocation2 + $0x3a8] sm:$0xff] }
 0xaaf   :  { %4346 = vmatprep.subr.bf16.mxu0 %v4345_v19  ;;  %v3255_v19 = vld [vmem:[#allocation2 + $0x3e0] sm:$0xff]  ;;  %v4363_v45 = vpack.c.bf16 %v3248_v63, %v3245_v47  ;;  %v3606_v63 = vld [vmem:[%s7046_s7 + $0x98] sm:$0xff] }
 0xab0   :  { %v4365_v42 = vpack.c.bf16 %v3255_v19, %v3252_v44  ;;  %v3588_v47 = vld [vmem:[%s7046_s7 + $0x8] sm:$0xff]  ;;  %v3589_v44 = vld [vmem:[%s7046_s7 + $0x10] sm:$0xff]  ;;  %v3590_v19 = vld [vmem:[%s7046_s7 + $0x18] sm:$0xff] }
 0xab2   :  { %4348 = vmatpush1.bf16.msra.mxu0 %v4347_v39  ;;  %v3254_v39 = vld [vmem:[#allocation2 + $0x3d8] sm:$0xff] }
 0xab3   :  { %4350 = vmatprep.subr.bf16.mxu0 %v4349_v36  ;;  %v4367_v28 = vpack.c.bf16 %v3254_v39, %v3251_v10  ;;  %v4430_v36 = vpack.c.bf16 %v3256_v8, %v3253_v38  ;;  %v4450_v10 = vpack.c.bf16 %v3590_v19, %v3589_v44  ;;  %v3591_v39 = vld [vmem:[%s7046_s7 + $0x20] sm:$0xff]  ;;  %v3592_v38 = vld [vmem:[%s7046_s7 + $0x28] sm:$0xff]  ;;  %v3609_v8 = vld [vmem:[%s7046_s7 + $0xb0] sm:$0xff] }
 0xb48   :  { %v3051_v49 = vpop.f32.mrb[28].mxu0  ;;  %v6882_v32 = vpop.f32.mrb[30].mxu1 }
 0xb49   :  { %v3052_v56 = vadd.f32 %v3051_v49, %v2952_v2  ;;  %v3053_v37 = vpop.f32.mrb[29].mxu0  ;;  %v3124_v51 = vpop.f32.mrb[31].mxu1  ;;  %v3257_v2 = vld [vmem:[#allocation2 + $0x3f0] sm:$0xff]  ;;  %v3262_v49 = vld [vmem:[#allocation2 + $0x418] sm:$0xff] }
 0xb4a   :  { %v3054_v34 = vadd.f32 %v3053_v37, %v2956_v24  ;;  %v3125_v25 = vadd.f32 %v3124_v51, %v2964_v59  ;;  %v4369_v24 = vpack.c.bf16 %v3261_v27, %v3258_v60  ;;  %v3259_v59 = vld [vmem:[#allocation2 + $0x400] sm:$0xff]  ;;  %v4371_v37 = vpack.c.bf16 %v3260_v4, %v3257_v2  ;;  %v3610_v60 = vld [vmem:[%s7046_s7 + $0xb8] sm:$0xff]  ;;  %v3619_v27 = vld [vmem:[%s7046_s7 + $0x100] sm:$0xff] }
 0xb4b   :  { %v3127_v40 = vmax.f32 %v3052_v56, 0.0  ;;  %v3267_v56 = vld [vmem:[#allocation2 + $0x440] sm:$0xff]  ;;  %v4433_v51 = vpack.c.bf16 %v3262_v49, %v3259_v59  ;;  %v4456_v4 = vpack.c.bf16 %v3610_v60, %v3609_v8  ;;  %v3593_v59 = vld [vmem:[%s7046_s7 + $0x30] sm:$0xff]  ;;  %v3594_v49 = vld [vmem:[%s7046_s7 + $0x38] sm:$0xff] }
 0xb4c   :  { %v3128_v62 = vmax.f32 %v3054_v34, 0.0  ;;  %v3130_v5 = vmax.f32 %v3125_v25, 0.0  ;;  %v4373_v9 = vpack.c.bf16 %v3267_v56, %v3264_v20  ;;  %v3265_v34 = vld [vmem:[#allocation2 + $0x430] sm:$0xff]  ;;  %v3268_v25 = vld [vmem:[#allocation2 + $0x448] sm:$0xff]  ;;  %v3611_v56 = vld [vmem:[%s7046_s7 + $0xc0] sm:$0xff] }
 0xb4d   :  { %v3622_v20 = vld [vmem:[%s7046_s7 + $0x118] sm:$0xff] }
 0xb4e   :  { %3366 = vmatprep.mubr.f32.mxu0 %v3128_v62  ;;  %3508 = vmatprep.mubr.f32.mxu1 %v3128_v62  ;;  %v4375_v62 = vpack.c.bf16 %v3266_v48, %v3263_v12  ;;  %v4458_v12 = vpack.c.bf16 %v3594_v49, %v3593_v59  ;;  %v3595_v48 = vld [vmem:[%s7046_s7 + $0x40] sm:$0xff] }
 0xb4f   :  { %3367 = vmatmul.mubr.f32.vlgmr.msra.gmra.mrb[30].mxu0 %v3127_v40  ;;  %3509 = vmatmul.mubr.f32.vlgmr.msra.gmra.mrb[32].mxu1 %v3127_v40  ;;  %v3272_v40 = vld [vmem:[#allocation2 + $0x468] sm:$0xff] }
 0xb50   :  { %4352 = vmatpush1.bf16.msra.mxu0 %v4351_v16  ;;  %4419 = vmatpush1.bf16.msra.mxu1 %v4418_v7  ;;  %v4436_v16 = vpack.c.bf16 %v3268_v25, %v3265_v34  ;;  %v3269_v7 = vld [vmem:[#allocation2 + $0x450] sm:$0xff]  ;;  %v3596_v34 = vld [vmem:[%s7046_s7 + $0x48] sm:$0xff]  ;;  %v3613_v25 = vld [vmem:[%s7046_s7 + $0xd0] sm:$0xff] }
 0xb51   :  { %3838 = vmatprep.mubr.msk.f32.mxu0 %vm2031_vm3, %v3130_v5  ;;  %3839 = vmatprep.mubr.msk.f32.mxu1 %vm2031_vm3, %v3130_v5  ;;  %v4379_v15 = vpack.c.bf16 %v3272_v40, %v3269_v7  ;;  %v3275_v5 = vld [vmem:[#allocation2 + $0x480] sm:$0xff]  ;;  %v4462_v41 = vpack.c.bf16 %v3596_v34, %v3595_v48  ;;  %v3598_v7 = vld [vmem:[%s7046_s7 + $0x58] sm:$0xff] }
 0xb52   :  { %4354 = vmatprep.subr.bf16.mxu0 %v4353_v18  ;;  %4420 = vmatprep.subr.bf16.mxu1 %v5167_v23  ;;  %v3279_v18 = vld [vmem:[#allocation2 + $0x4a0] sm:$0xff]  ;;  %v4383_v6 = vpack.c.bf16 %v3278_v26, %v3275_v5  ;;  %v3617_v5 = vld [vmem:[%s7046_s7 + $0xf0] sm:$0xff] }
 0xb53   :  { %v3601_v26 = vld [vmem:[%s7046_s7 + $0x70] sm:$0xff] }
 0xb54   :  { %4356 = vmatpush1.bf16.msra.mxu0 %v4355_v53  ;;  %4422 = vmatpush1.bf16.msra.mxu1 %v4421_v30  ;;  %v2960_v53 = vrot.slane %v6873_v61, %v5258_v17  ;;  %v4381_v30 = vpack.c.bf16 %v3279_v18, %v3276_v43  ;;  %v3603_v61 = vld [vmem:[%s7046_s7 + $0x80] sm:$0xff]  ;;  %v3600_v43 = vld [vmem:[%s7046_s7 + $0x68] sm:$0xff] }
 0xb55   :  { %4358 = vmatprep.subr.bf16.mxu0 %v4357_v54  ;;  %4423 = vmatprep.subr.bf16.mxu1 %v5167_v23  ;;  %v3277_v54 = vld [vmem:[#allocation2 + $0x490] sm:$0xff]  ;;  %v4470_v18 = vpack.c.bf16 %v3600_v43, %v3599_v0 }
 0xb56   :  { %v4442_v55 = vpack.c.bf16 %v3280_v29, %v3277_v54  ;;  %v3123_v46 = vadd.f32 %v6882_v32, %v2960_v53  ;;  %v3587_v32 = vld [vmem:[%s7046_s7] sm:$0xff]  ;;  %v3602_v54 = vld [vmem:[%s7046_s7 + $0x78] sm:$0xff] }
 0xb57   :  { %v4446_v50 = vpack.c.bf16 %v3588_v47, %v3587_v32 }
 0xb58   :  { %4360 = vmatpush1.bf16.msra.mxu0 %v4359_v14  ;;  %4425 = vmatpush1.bf16.msra.mxu1 %v4424_v1  ;;  %v3129_v31 = vmax.f32 %v3123_v46, 0.0  ;;  %v3604_v14 = vld [vmem:[%s7046_s7 + $0x88] sm:$0xff] }
 0xb59   :  { %4362 = vmatprep.subr.bf16.mxu0 %v4361_v58  ;;  %4426 = vmatprep.subr.bf16.mxu1 %v5167_v23  ;;  %v4444_v1 = vpack.c.bf16 %v3604_v14, %v3603_v61  ;;  %v3605_v58 = vld [vmem:[%s7046_s7 + $0x90] sm:$0xff] }
 0xb5a   :  { %v4448_v57 = vpack.c.bf16 %v3606_v63, %v3605_v58  ;;  %v3837_v14 = vld [vmem:[%s7047_s8 + $0x20] ss:$8 sm:$0x7] }
 0xb5b   :  { %v3295_v32 = vrot.slane %v3837_v14, %v5258_v17 }
 0xb5c   :  { %4364 = vmatpush1.bf16.msra.mxu0 %v4363_v45  ;;  %4428 = vmatpush1.bf16.msra.mxu1 %v4427_v52  ;;  %v3607_v45 = vld [vmem:[%s7046_s7 + $0xa0] sm:$0xff]  ;;  %v3608_v52 = vld [vmem:[%s7046_s7 + $0xa8] sm:$0xff] }
 0xb5d   :  { %4366 = vmatprep.subr.bf16.mxu0 %v4365_v42  ;;  %4429 = vmatprep.subr.bf16.mxu1 %v5167_v23  ;;  %v4452_v42 = vpack.c.bf16 %v3608_v52, %v3607_v45 }
 0xb60   :  { %4368 = vmatpush1.bf16.msra.mxu0 %v4367_v28  ;;  %4431 = vmatpush1.bf16.msra.mxu1 %v4430_v36  ;;  %v3620_v28 = vld [vmem:[%s7046_s7 + $0x108] sm:$0xff]  ;;  %v4454_v36 = vpack.c.bf16 %v3592_v38, %v3591_v39 }
 0xb61   :  { %4370 = vmatprep.subr.bf16.mxu0 %v4369_v24  ;;  %4432 = vmatprep.subr.bf16.mxu1 %v5167_v23  ;;  %v4477_v2 = vpack.c.bf16 %v3620_v28, %v3619_v27  ;;  %v3621_v24 = vld [vmem:[%s7046_s7 + $0x110] sm:$0xff] }
 0xb64   :  { %4372 = vmatpush1.bf16.msra.mxu0 %v4371_v37  ;;  %4434 = vmatpush1.bf16.msra.mxu1 %v4433_v51  ;;  %v3612_v37 = vld [vmem:[%s7046_s7 + $0xc8] sm:$0xff]  ;;  %v4480_v51 = vpack.c.bf16 %v3622_v20, %v3621_v24 }
 0xb65   :  { %4374 = vmatprep.subr.bf16.mxu0 %v4373_v9  ;;  %4435 = vmatprep.subr.bf16.mxu1 %v5167_v23  ;;  %v4460_v9 = vpack.c.bf16 %v3612_v37, %v3611_v56 }
 0xb68   :  { %4376 = vmatpush1.bf16.msra.mxu0 %v4375_v62  ;;  %4437 = vmatpush1.bf16.msra.mxu1 %v4436_v16  ;;  %v4464_v62 = vpack.c.bf16 %v3614_v35, %v3613_v25  ;;  %v3597_v16 = vld [vmem:[%s7046_s7 + $0x50] sm:$0xff] }
 0xb69   :  { %4378 = vmatprep.subr.bf16.mxu0 %v4377_v11  ;;  %4438 = vmatprep.subr.bf16.mxu1 %v5167_v23  ;;  %v3615_v11 = vld [vmem:[%s7046_s7 + $0xe0] sm:$0xff]  ;;  %v4466_v40 = vpack.c.bf16 %v3598_v7, %v3597_v16 }
 0xb6c   :  { %4380 = vmatpush1.bf16.msra.mxu0 %v4379_v15  ;;  %4440 = vmatpush1.bf16.msra.mxu1 %v4439_v21  ;;  %v3623_v15 = vld [vmem:[%s7046_s7 + $0x120] sm:$0xff]  ;;  %v3624_v21 = vld [vmem:[%s7046_s7 + $0x128] sm:$0xf] }
 0xb6d   :  { %4382 = vmatprep.subr.bf16.mxu0 %v4381_v30  ;;  %4441 = vmatprep.subr.bf16.mxu1 %v5167_v23  ;;  %v4483_v53 = vpack.c.bf16 %v3624_v21, %v3623_v15  ;;  %v3618_v30 = vld [vmem:[%s7046_s7 + $0xf8] sm:$0xff] }
 0xb6e   :  { %v4472_v29 = vpack.c.bf16 %v3618_v30, %v3617_v5 }
 0xb70   :  { %4384 = vmatpush1.bf16.msra.mxu0 %v4383_v6  ;;  %4443 = vmatpush1.bf16.msra.mxu1 %v4442_v55  ;;  %v4474_v6 = vpack.c.bf16 %v3602_v54, %v3601_v26 }
 0xb71   :  { %4476 = vmatprep.subr.bf16.mxu0 %v5167_v23  ;;  %4445 = vmatprep.subr.bf16.mxu1 %v4444_v1  ;;  %v3287_v1 = vrot.slane %v3837_v14, %v5271_v22 }
 0xb73   :  { %3438 = vmatmul.mubr.f32.vlgmr.msra.gmra.mrb[30].mxu0 %v3129_v31  ;;  %3579 = vmatmul.mubr.f32.vlgmr.msra.gmra.mrb[34].mxu1 %v3129_v31 }
 0xb74   :  { %4447 = vmatpush3.bf16.msra.mxu1 %v4446_v50  ;;  %4478 = vmatpush3.bf16.msra.mxu0 %v4477_v2 }
 0xb75   :  { %4449 = vmatprep.subr.bf16.mxu1 %v4448_v57  ;;  %4479 = vmatprep.subr.bf16.mxu0 %v5167_v23 }
 0xb76   :  { %3963 = vmatprep.mubr.msk.f32.mxu0 %vm5170_vm7, %v7080_v3  ;;  %v3291_v3 = vrot.slane %v3837_v14, %v5241_v13  ;;  %v3625_v13 = vld [vmem:[%s7047_s8 + $0x40] ss:$0 sm:$0xff] }
 0xb78   :  { %4451 = vmatpush3.bf16.msra.mxu1 %v4450_v10  ;;  %4481 = vmatpush3.bf16.msra.mxu0 %v4480_v51 }
 0xb79   :  { %4453 = vmatprep.subr.bf16.mxu1 %v4452_v42  ;;  %4482 = vmatprep.subr.bf16.mxu0 %v5167_v23  ;;  %v3616_v23 = vld [vmem:[%s7046_s7 + $0xe8] sm:$0xff] }
 0xb7a   :  { %v4468_v33 = vpack.c.bf16 %v3616_v23, %v3615_v11 }
 0xb7c   :  { %4455 = vmatpush3.bf16.msra.mxu1 %v4454_v36  ;;  %4485 = vmatpush3.bf16.msk.msra.mxu0 %vm5850_vm11, %v4483_v53 }
 0xb7d   :  { %4457 = vmatprep.subr.bf16.mxu1 %v4456_v4 }
 0xb80   :  { %4459 = vmatpush3.bf16.msra.mxu1 %v4458_v12 }
 0xb81   :  { %4461 = vmatprep.subr.bf16.mxu1 %v4460_v9 }
 0xb84   :  { %4463 = vmatpush3.bf16.msra.mxu1 %v4462_v41 }
 0xb85   :  { %4465 = vmatprep.subr.bf16.mxu1 %v4464_v62 }
 0xb88   :  { %4467 = vmatpush3.bf16.msra.mxu1 %v4466_v40 }
 0xb89   :  { %4469 = vmatprep.subr.bf16.mxu1 %v4468_v33 }
 0xb8c   :  { %4471 = vmatpush3.bf16.msra.mxu1 %v4470_v18 }
 0xb8d   :  { %4473 = vmatprep.subr.bf16.mxu1 %v4472_v29 }
 0xb90   :  { %4475 = vmatpush3.bf16.msra.mxu1 %v4474_v6 }
 0xc22   :  { %v3885_v46 = vpop.f32.mrb[32].mxu1 }
 0xc23   :  { %v3886_v31 = vpop.f32.mrb[33].mxu1 }
 0xc24   :  { %v3887_v61 = vadd.f32 %v3886_v31, %v3885_v46 }
 0xc26   :  { %v3511_v47 = vadd.f32 %v3887_v61, %v3295_v32 }
 0xc46   :  { %v3439_v58 = vpop.f32.mrb[30].mxu0  ;;  %v3580_v63 = vpop.f32.mrb[34].mxu1 }
 0xc47   :  { %v4486_v50 = vadd.f32 %v3439_v58, %v3287_v1  ;;  %v3581_v57 = vadd.f32 %v3580_v63, %v3511_v47  ;;  %v3441_v44 = vpop.f32.mrb[31].mxu0  ;;  %v3582_v19 = vpop.f32.mrb[35].mxu1 }
 0xc48   :  { %v4487_v45 = vadd.f32 %v3441_v44, %v3291_v3 }
 0xc49   :  { %v3586_v52 = vmax.f32 %v3581_v57, 0.0  ;;  %v3584_v42 = vmax.f32 %v4486_v50, 0.0 }
 0xc4a   :  { %v3585_v10 = vmax.f32 %v4487_v45, 0.0 }
 0xc4b   :  { %3964 = vmatmul.mubr.msk.f32.vlgmr.msra.gmra.mrb[32].mxu0 %vm1445_vm2, %v3586_v52 }
 0xc4c   :  { %3696 = vmatprep.mubr.f32.mxu1 %v3585_v10 }
 0xc4d   :  { %3697 = vmatmul.mubr.f32.vlgmr.msra.gmra.mrb[36].mxu1 %v3584_v42 }
 0xd1e   :  { %v3768_v17 = vpop.f32.mrb[32].mxu0 }
 0xd1f   :  { %v3965_v39 = vpop.f32.mrb[33].mxu0 }
 0xd20   :  { %v3920_v22 = vpop.f32.mrb[36].mxu1 }
 0xd21   :  { %v3921_v38 = vpop.f32.mrb[37].mxu1 }
 0xd22   :  { %v3922_v8 = vadd.f32 %v3921_v38, %v3920_v22 }
 0xd24   :  { %v3699_v60 = vadd.f32 %v3922_v8, %v3625_v13 }
 0xd26   :  { %v3769_v27 = vadd.f32 %v3768_v17, %v3699_v60 }
 0xd28   :  { %5090 = vtanh.f32 %v3769_v27 }
 0xd32   :  { %v5091_v28 = vpop.eup %5090 }
 0xd33   :  { %v3773_v36 = vmul.f32 2.0, %v5091_v28 }
 0xd35   :  { %3775 = vst.msk [vmem:[#allocation5] sm:$0x3] %vm3774_vm8, %v3773_v36 }
 0xd36   :  { %5125 = shalt.err (!%p5122_p12)
}
 0xd37   :  { %s5126_s25 = scalar_lea.hbm %s7048_s9, 32 }
 0xd38   :  { %p5127_p13 = scmp.ne.s32.totalorder %s7048_s9, %s5126_s25  ;;  %p5130_p0 = scmp.lt.u32.totalorder %s5126_s25, %s7048_s9 }
 0xd3a   :  { %p5132_p1 = pnand %p5130_p0, %p5127_p13 }
 0xd3c   :  { %5135 = shalt.err (!%p5132_p1)
}
 0xd3d   :  { %3785 = dma.vmem_to_hbm [thread:$0]  %s3783_s24, 32, %s7048_s9, [#allocation4]  }
 0xd3e   :  { %5138 = dma.done.wait [#allocation4], 32  }
 0xd3f   :  { %5139 = vsyncadd [#allocation4], 4294967264 }
 0xd40   :  { %3789 = vsyncpa [#allocation3], 1 }
 0xd41   :  { %3790 = vsyncpa [#allocation4], 1 }

</bundles_post_ra>
